<compile_context>
chip_gen: v7x
topology: tpu7x:2x2x1
jax: 0.10.0
libtpu: 0.0.40
codegen_flags: <defaults>
</compile_context>

<pallas_src>
import functools

import jax
import jax.numpy as jnp
from jax.experimental import pallas as pl
from jax.experimental.pallas import tpu as pltpu

LN_EPS = 1e-5

_PARAM_ORDER = ("f_lng", "f_lnb", "f_w1", "f_b1", "f_w2", "f_b2",
                "g_lng", "g_lnb", "g_w1", "g_b1", "g_w2", "g_b2")
_BF16_PARAMS = ("f_w1", "f_w2", "g_w1", "g_w2")


def _mlp(h, ln_g, ln_b, w1, b1, w2, b2, inv_d):
    """Pre-LayerNorm MLP. LN / GELU / bias math in f32, matmul operands bf16.

    Padded (zero) feature lanes are handled by using the *true* feature count
    `1/inv_d` as the LN divisor; zero lanes contribute nothing to the sums and
    the corresponding weight rows/cols are zero-padded in the wrapper.
    """
    s1 = jnp.sum(h, axis=-1, keepdims=True)
    s2 = jnp.sum(h * h, axis=-1, keepdims=True)
    mu = s1 * inv_d
    var = jnp.maximum(s2 * inv_d - mu * mu, 0.0)   # single pass, clamp fp error
    hn = (h - mu) * jax.lax.rsqrt(var + LN_EPS)
    hn = hn * ln_g + ln_b
    z = jnp.dot(hn.astype(w1.dtype), w1,
                preferred_element_type=jnp.float32) + b1
    z = jax.nn.gelu(z, approximate=True)
    z = jnp.dot(z.astype(w2.dtype), w2,
                preferred_element_type=jnp.float32) + b2
    return z


def rev_block_kernel(x_ref,
                     f_lng, f_lnb, f_w1, f_b1, f_w2, f_b2,
                     g_lng, g_lnb, g_w1, g_b1, g_w2, g_b2,
                     out_ref, *, dim, inv_d):
    x = x_ref[...].astype(jnp.float32)          # (TM, 2*dim), dim % 128 == 0
    x1 = x[:, :dim]
    x2 = x[:, dim:]

    y1 = x1 + _mlp(x2, f_lng[...], f_lnb[...], f_w1[...], f_b1[...],
                   f_w2[...], f_b2[...], inv_d)
    y2 = x2 + _mlp(y1, g_lng[...], g_lnb[...], g_w1[...], g_b1[...],
                   g_w2[...], g_b2[...], inv_d)

    # Lane-aligned split stores (no concat temp).
    out_ref[:, :dim] = y1.astype(out_ref.dtype)
    out_ref[:, dim:] = y2.astype(out_ref.dtype)


def _num_tensorcores():
    """Heuristic TensorCore count (v7x has 2 per chip; v5e/v6e have 1)."""
    try:
        kind = (getattr(jax.devices()[0], "device_kind", "") or "").lower()
        if "v7" in kind or "tpu7" in kind or "7x" in kind:
            return 2
    except Exception:
        pass
    return 1


def _vmem_capacity_bytes():
    try:
        cap = getattr(pltpu.get_tpu_info(), "vmem_capacity_bytes", None)
        if cap:
            return int(cap)
    except Exception:
        pass
    return 64 * 1024 * 1024     # conservative (v7x per-core) fallback


def _choose_row_tile(rows, two_d, hidden, param_bytes, budget_bytes, num_cores):
    """Largest row tile whose working set (incl. resident weights) fits the
    budget, with a grid-length policy that depends on the TensorCore count."""
    def fits(t):
        io = 2 * 2 * t * two_d * 4                    # x/out tiles, double-buffered
        interm = t * (4 * two_d + 3 * hidden) * 4     # rough f32 intermediates
        return io + interm + 2 * param_bytes <= budget_bytes

    cands = [t for t in (512, 256, 128, 64, 32, 16, 8) if fits(t)]
    if not cands:
        return 8

    if num_cores >= 2 and rows >= 32:
        # v7x: even grid with >= 2 steps per TensorCore so each core's HBM DMAs
        # overlap a neighbouring step's compute.
        for t in cands:
            g = pl.cdiv(rows, t)
            if g >= 2 * num_cores and g % num_cores == 0:
                return t

    # Single-TC chips (v5e/v6e) or tiny inputs: biggest tile not overshooting rows.
    for t in cands:
        if t <= max(rows, 8):
            return t
    return cands[-1]


def reversible_block_forward(x, params, *, row_tile=None):
    """x: (B, S, 2*D) float32. params: dict of f/g weights. Returns (B, S, 2*D)."""
    B, S, two_d = x.shape
    D = two_d // 2
    H = params["f_w1"].shape[1]
    rows = B * S
    Dp = -(-D // 128) * 128         # lane-aligned half width inside the kernel
    two_dp = 2 * Dp

    # --- prepare parameters: bf16 matmul weights, zero-pad D -> Dp once here ---
    kparams = []
    param_bytes = 0
    for name in _PARAM_ORDER:
        p = params[name].astype(
            jnp.bfloat16 if name in _BF16_PARAMS else jnp.float32)
        if Dp != D:
            if name in ("f_w1", "g_w1"):
                p = jnp.pad(p, ((0, Dp - D), (0, 0)))
            elif name in ("f_w2", "g_w2"):
                p = jnp.pad(p, ((0, 0), (0, Dp - D)))
            elif name in ("f_lng", "f_lnb", "f_b2", "g_lng", "g_lnb", "g_b2"):
                p = jnp.pad(p, ((0, 0), (0, Dp - D)))
        kparams.append(p)
        param_bytes += int(p.size) * p.dtype.itemsize

    # --- prepare x: no row padding; only (rare) feature-lane padding ---
    x2d = x.reshape(rows, two_d)
    if Dp != D:
        # Layout plumbing once in the wrapper: zero padded lanes never affect
        # real lanes (weights/LN params are zero there), and every in-kernel
        # slice/store stays lane aligned.
        x2d = jnp.concatenate(
            [jnp.pad(x2d[:, :D], ((0, 0), (0, Dp - D))),
             jnp.pad(x2d[:, D:], ((0, 0), (0, Dp - D)))], axis=-1)

    num_cores = _num_tensorcores()
    vmem_cap = _vmem_capacity_bytes()
    # Leave 16 MiB headroom below physical; don't exceed ~100 MiB on 128 MiB parts.
    vmem_limit = int(min(max(vmem_cap - 16 * 2**20, 32 * 2**20), 100 * 2**20))
    if row_tile is None:
        row_tile = _choose_row_tile(
            rows, two_dp, H, param_bytes,
            budget_bytes=max(vmem_limit - 8 * 2**20, 16 * 2**20),
            num_cores=num_cores)
    n_steps = pl.cdiv(rows, row_tile)   # ragged last block handled by Pallas

    kernel = functools.partial(rev_block_kernel, dim=Dp, inv_d=1.0 / D)

    cost = pl.CostEstimate(
        flops=8 * rows * D * H,                 # 4 matmuls of 2*M*K*N each
        transcendentals=2 * rows * H,           # tanh-GELU, both nets
        bytes_accessed=2 * rows * two_d * 4 + param_bytes)

    def run(weight_buffers):
        def param_spec(shape):
            kwargs = {}
            if weight_buffers == 1:
                # Same block every grid step -> no need to double-buffer weights.
                kwargs["pipeline_mode"] = pl.Buffered(1)
            return pl.BlockSpec(shape, lambda *_: (0,) * len(shape), **kwargs)

        grid_spec = pltpu.PrefetchScalarGridSpec(
            num_scalar_prefetch=0,
            grid=(n_steps,),
            in_specs=[pl.BlockSpec((row_tile, two_dp), lambda i: (i, 0))]
                     + [param_spec(p.shape) for p in kparams],
            out_specs=pl.BlockSpec((row_tile, two_dp), lambda i: (i, 0)),
        )
        fn = pl.pallas_call(
            kernel,
            out_shape=jax.ShapeDtypeStruct((rows, two_dp), x.dtype),
            grid_spec=grid_spec,
            compiler_params=pltpu.CompilerParams(
                dimension_semantics=("parallel",),
                vmem_limit_bytes=vmem_limit),
            cost_estimate=cost,
        )
        return fn(x2d, *kparams)

    try:
        out2d = run(weight_buffers=1)
    except (pltpu.LoweringException, NotImplementedError, ValueError, TypeError):
        # Only Buffered(1) support differs between the two paths; any genuine
        # error will re-raise from this default-buffering fallback.
        out2d = run(weight_buffers=2)

    if Dp != D:
        out2d = jnp.concatenate([out2d[:, :D], out2d[:, Dp:Dp + D]], axis=-1)
    return out2d.reshape(B, S, two_d)


def init_params(key, dim, hidden):
    ks = jax.random.split(key, 4)
    s1 = 1.0 / float(dim) ** 0.5
    s2 = 1.0 / float(hidden) ** 0.5
    return {
        # f net
        "f_lng": jnp.ones((1, dim), jnp.float32),
        "f_lnb": jnp.zeros((1, dim), jnp.float32),
        "f_w1": jax.random.normal(ks[0], (dim, hidden), jnp.float32) * s1,
        "f_b1": jnp.zeros((1, hidden), jnp.float32),
        "f_w2": jax.random.normal(ks[1], (hidden, dim), jnp.float32) * s2,
        "f_b2": jnp.zeros((1, dim), jnp.float32),
        # g net
        "g_lng": jnp.ones((1, dim), jnp.float32),
        "g_lnb": jnp.zeros((1, dim), jnp.float32),
        "g_w1": jax.random.normal(ks[2], (dim, hidden), jnp.float32) * s1,
        "g_b1": jnp.zeros((1, hidden), jnp.float32),
        "g_w2": jax.random.normal(ks[3], (hidden, dim), jnp.float32) * s2,
        "g_b2": jnp.zeros((1, dim), jnp.float32),
    }


def reference_forward(x, params, *, mirror_kernel=False):
    """Pure-JAX reference.

    mirror_kernel=True mirrors the kernel math exactly (bf16 MXU operands,
    single-pass LN variance); False is the pure-f32 module semantics.
    """
    d = x.shape[-1] // 2
    x1, x2 = x[..., :d], x[..., d:]

    def mlp(h, pre):
        mu = jnp.mean(h, -1, keepdims=True)
        if mirror_kernel:
            var = jnp.maximum(jnp.mean(h * h, -1, keepdims=True) - mu * mu, 0.0)
        else:
            var = jnp.mean((h - mu) ** 2, -1, keepdims=True)
        hn = (h - mu) * jax.lax.rsqrt(var + LN_EPS)
        hn = hn * params[pre + "_lng"][0] + params[pre + "_lnb"][0]
        w1, w2 = params[pre + "_w1"], params[pre + "_w2"]
        if mirror_kernel:
            w1, w2 = w1.astype(jnp.bfloat16), w2.astype(jnp.bfloat16)
        z = jnp.dot(hn.astype(w1.dtype), w1,
                    preferred_element_type=jnp.float32) + params[pre + "_b1"][0]
        z = jax.nn.gelu(z, approximate=True)
        return jnp.dot(z.astype(w2.dtype), w2,
                       preferred_element_type=jnp.float32) + params[pre + "_b2"][0]

    y1 = x1 + mlp(x2, "f")
    y2 = x2 + mlp(y1, "g")
    return jnp.concatenate([y1, y2], axis=-1)


if __name__ == "__main__":
    key = jax.random.PRNGKey(0)
    kx, kp, kx2, kp2 = jax.random.split(key, 4)

    # Small but lane/MXU friendly: x is (2, 128, 256) -> D = 128, hidden = 256.
    B, S, D, H = 2, 128, 128, 256
    x = jax.random.normal(kx, (B, S, 2 * D), jnp.float32)
    params = init_params(kp, D, H)

    out = jax.block_until_ready(reversible_block_forward(x, params))
    assert out.shape == (B, S, 2 * D)

    # Tight check vs a reference mirroring the kernel math (bf16 MXU operands).
    ref_k = reference_forward(x, params, mirror_kernel=True)
    assert jnp.allclose(out, ref_k, atol=2e-2, rtol=2e-2), "mismatch (kernel-mirror ref)"

    # Loose check vs pure-f32 module semantics (documents the bf16 MXU trade-off).
    ref_f32 = reference_forward(x, params, mirror_kernel=False)
    assert jnp.allclose(out, ref_f32, atol=6e-2, rtol=6e-2), "mismatch (f32 ref)"

    # Tiny second case exercising the padded-D (D % 128 != 0) and ragged-rows
    # (rows % row_tile != 0) code paths.
    B2, S2, D2, H2 = 2, 12, 96, 160     # rows = 24 -> ragged last block
    x_s = jax.random.normal(kx2, (B2, S2, 2 * D2), jnp.float32)
    params_s = init_params(kp2, D2, H2)
    out_s = jax.block_until_ready(reversible_block_forward(x_s, params_s))
    assert out_s.shape == (B2, S2, 2 * D2)
    ref_s = reference_forward(x_s, params_s, mirror_kernel=True)
    assert jnp.allclose(out_s, ref_s, atol=2e-2, rtol=2e-2), "mismatch (padded-D case)"

    print("KERNEL_OK")
</pallas_src>

<mosaic_0001>
module attributes {stable_mosaic.version = 11 : i64} {
  func.func @rev_block_kernel(%arg0: i32, %arg1: memref<256x256xf32, #tpu.memory_space<vmem>>, %arg2: memref<1x128xf32, #tpu.memory_space<vmem>>, %arg3: memref<1x128xf32, #tpu.memory_space<vmem>>, %arg4: memref<128x256xbf16, #tpu.memory_space<vmem>>, %arg5: memref<1x256xf32, #tpu.memory_space<vmem>>, %arg6: memref<256x128xbf16, #tpu.memory_space<vmem>>, %arg7: memref<1x128xf32, #tpu.memory_space<vmem>>, %arg8: memref<1x128xf32, #tpu.memory_space<vmem>>, %arg9: memref<1x128xf32, #tpu.memory_space<vmem>>, %arg10: memref<128x256xbf16, #tpu.memory_space<vmem>>, %arg11: memref<1x256xf32, #tpu.memory_space<vmem>>, %arg12: memref<256x128xbf16, #tpu.memory_space<vmem>>, %arg13: memref<1x128xf32, #tpu.memory_space<vmem>>, %arg14: memref<256x256xf32, #tpu.memory_space<vmem>>) attributes {dimension_semantics = [#tpu.dimension_semantics<parallel>], iteration_bounds = array<i64: 1>, scalar_prefetch = 0 : i64, scratch_operands = 0 : i64, tpu.core_type = #tpu.core_type<tc>, window_params = [{transform_indices = @transform_0, window_bounds = array<i64: 256, 256>}, {pipeline_mode = #tpu.pipeline_mode<synchronous>, transform_indices = @transform_1, window_bounds = array<i64: 1, 128>}, {pipeline_mode = #tpu.pipeline_mode<synchronous>, transform_indices = @transform_2, window_bounds = array<i64: 1, 128>}, {pipeline_mode = #tpu.pipeline_mode<synchronous>, transform_indices = @transform_3, window_bounds = array<i64: 128, 256>}, {pipeline_mode = #tpu.pipeline_mode<synchronous>, transform_indices = @transform_4, window_bounds = array<i64: 1, 256>}, {pipeline_mode = #tpu.pipeline_mode<synchronous>, transform_indices = @transform_5, window_bounds = array<i64: 256, 128>}, {pipeline_mode = #tpu.pipeline_mode<synchronous>, transform_indices = @transform_6, window_bounds = array<i64: 1, 128>}, {pipeline_mode = #tpu.pipeline_mode<synchronous>, transform_indices = @transform_7, window_bounds = array<i64: 1, 128>}, {pipeline_mode = #tpu.pipeline_mode<synchronous>, transform_indices = @transform_8, window_bounds = array<i64: 1, 128>}, {pipeline_mode = #tpu.pipeline_mode<synchronous>, transform_indices = @transform_9, window_bounds = array<i64: 128, 256>}, {pipeline_mode = #tpu.pipeline_mode<synchronous>, transform_indices = @transform_10, window_bounds = array<i64: 1, 256>}, {pipeline_mode = #tpu.pipeline_mode<synchronous>, transform_indices = @transform_11, window_bounds = array<i64: 256, 128>}, {pipeline_mode = #tpu.pipeline_mode<synchronous>, transform_indices = @transform_12, window_bounds = array<i64: 1, 128>}, {transform_indices = @transform_13, window_bounds = array<i64: 256, 256>}]} {
    %c0 = arith.constant 0 : index
    %c0_0 = arith.constant 0 : index
    %0 = vector.load %arg1[%c0, %c0_0] : memref<256x256xf32, #tpu.memory_space<vmem>>, vector<256x256xf32>
    %1 = vector.extract_strided_slice %0 {offsets = [0, 0], sizes = [256, 128], strides = [1, 1]} : vector<256x256xf32> to vector<256x128xf32>
    %2 = vector.extract_strided_slice %0 {offsets = [0, 128], sizes = [256, 128], strides = [1, 1]} : vector<256x256xf32> to vector<256x128xf32>
    %c0_1 = arith.constant 0 : index
    %c0_2 = arith.constant 0 : index
    %3 = vector.load %arg2[%c0_1, %c0_2] : memref<1x128xf32, #tpu.memory_space<vmem>>, vector<1x128xf32>
    %c0_3 = arith.constant 0 : index
    %c0_4 = arith.constant 0 : index
    %4 = vector.load %arg3[%c0_3, %c0_4] : memref<1x128xf32, #tpu.memory_space<vmem>>, vector<1x128xf32>
    %c0_5 = arith.constant 0 : index
    %c0_6 = arith.constant 0 : index
    %5 = vector.load %arg4[%c0_5, %c0_6] : memref<128x256xbf16, #tpu.memory_space<vmem>>, vector<128x256xbf16>
    %c0_7 = arith.constant 0 : index
    %c0_8 = arith.constant 0 : index
    %6 = vector.load %arg5[%c0_7, %c0_8] : memref<1x256xf32, #tpu.memory_space<vmem>>, vector<1x256xf32>
    %c0_9 = arith.constant 0 : index
    %c0_10 = arith.constant 0 : index
    %7 = vector.load %arg6[%c0_9, %c0_10] : memref<256x128xbf16, #tpu.memory_space<vmem>>, vector<256x128xbf16>
    %c0_11 = arith.constant 0 : index
    %c0_12 = arith.constant 0 : index
    %8 = vector.load %arg7[%c0_11, %c0_12] : memref<1x128xf32, #tpu.memory_space<vmem>>, vector<1x128xf32>
    %cst = arith.constant dense<0.000000e+00> : vector<256xf32>
    %9 = vector.multi_reduction <add>, %2, %cst [1] : vector<256x128xf32> to vector<256xf32>
    %10 = vector.shape_cast %9 : vector<256xf32> to vector<256x1xf32>
    %11 = arith.mulf %2, %2 : vector<256x128xf32>
    %cst_13 = arith.constant dense<0.000000e+00> : vector<256xf32>
    %12 = vector.multi_reduction <add>, %11, %cst_13 [1] : vector<256x128xf32> to vector<256xf32>
    %13 = vector.shape_cast %12 : vector<256xf32> to vector<256x1xf32>
    %cst_14 = arith.constant 7.812500e-03 : f32
    %14 = vector.broadcast %cst_14 : f32 to vector<256x1xf32>
    %15 = arith.mulf %10, %14 : vector<256x1xf32>
    %cst_15 = arith.constant 7.812500e-03 : f32
    %16 = vector.broadcast %cst_15 : f32 to vector<256x1xf32>
    %17 = arith.mulf %13, %16 : vector<256x1xf32>
    %18 = arith.mulf %15, %15 : vector<256x1xf32>
    %19 = arith.subf %17, %18 : vector<256x1xf32>
    %cst_16 = arith.constant 0.000000e+00 : f32
    %20 = vector.broadcast %cst_16 : f32 to vector<256x1xf32>
    %21 = arith.maximumf %19, %20 : vector<256x1xf32>
    %22 = vector.broadcast %15 : vector<256x1xf32> to vector<256x128xf32>
    %23 = arith.subf %2, %22 : vector<256x128xf32>
    %cst_17 = arith.constant 9.99999974E-6 : f32
    %24 = vector.broadcast %cst_17 : f32 to vector<256x1xf32>
    %25 = arith.addf %21, %24 : vector<256x1xf32>
    %26 = math.rsqrt %25 : vector<256x1xf32>
    %27 = vector.broadcast %26 : vector<256x1xf32> to vector<256x128xf32>
    %28 = arith.mulf %23, %27 : vector<256x128xf32>
    %29 = vector.broadcast %3 : vector<1x128xf32> to vector<256x128xf32>
    %30 = arith.mulf %28, %29 : vector<256x128xf32>
    %31 = vector.broadcast %4 : vector<1x128xf32> to vector<256x128xf32>
    %32 = arith.addf %30, %31 : vector<256x128xf32>
    %33 = arith.truncf %32 : vector<256x128xf32> to vector<256x128xbf16>
    %cst_18 = arith.constant dense<0.000000e+00> : vector<256x256xf32>
    %34 = tpu.matmul %33, %5, %cst_18 {dimension_numbers = #tpu.dot_dimension_numbers<[1], [0], [0], [1], [0, 0, 1, 1], [], []>} : vector<256x128xbf16>, vector<128x256xbf16>, vector<256x256xf32> -> vector<256x256xf32>
    %35 = vector.broadcast %6 : vector<1x256xf32> to vector<256x256xf32>
    %36 = arith.addf %34, %35 : vector<256x256xf32>
    %37 = arith.mulf %36, %36 : vector<256x256xf32>
    %38 = arith.mulf %36, %37 : vector<256x256xf32>
    %cst_19 = arith.constant 4.471500e-02 : f32
    %39 = vector.broadcast %cst_19 : f32 to vector<256x256xf32>
    %40 = arith.mulf %39, %38 : vector<256x256xf32>
    %41 = arith.addf %36, %40 : vector<256x256xf32>
    %cst_20 = arith.constant 0.797884583 : f32
    %42 = vector.broadcast %cst_20 : f32 to vector<256x256xf32>
    %43 = arith.mulf %42, %41 : vector<256x256xf32>
    %44 = math.tanh %43 : vector<256x256xf32>
    %cst_21 = arith.constant 1.000000e+00 : f32
    %45 = vector.broadcast %cst_21 : f32 to vector<256x256xf32>
    %46 = arith.addf %45, %44 : vector<256x256xf32>
    %cst_22 = arith.constant 5.000000e-01 : f32
    %47 = vector.broadcast %cst_22 : f32 to vector<256x256xf32>
    %48 = arith.mulf %47, %46 : vector<256x256xf32>
    %49 = arith.mulf %36, %48 : vector<256x256xf32>
    %50 = arith.truncf %49 : vector<256x256xf32> to vector<256x256xbf16>
    %cst_23 = arith.constant dense<0.000000e+00> : vector<256x128xf32>
    %51 = tpu.matmul %50, %7, %cst_23 {dimension_numbers = #tpu.dot_dimension_numbers<[1], [0], [0], [1], [0, 0, 1, 1], [], []>} : vector<256x256xbf16>, vector<256x128xbf16>, vector<256x128xf32> -> vector<256x128xf32>
    %52 = vector.broadcast %8 : vector<1x128xf32> to vector<256x128xf32>
    %53 = arith.addf %51, %52 : vector<256x128xf32>
    %54 = arith.addf %1, %53 : vector<256x128xf32>
    %c0_24 = arith.constant 0 : index
    %c0_25 = arith.constant 0 : index
    %55 = vector.load %arg8[%c0_24, %c0_25] : memref<1x128xf32, #tpu.memory_space<vmem>>, vector<1x128xf32>
    %c0_26 = arith.constant 0 : index
    %c0_27 = arith.constant 0 : index
    %56 = vector.load %arg9[%c0_26, %c0_27] : memref<1x128xf32, #tpu.memory_space<vmem>>, vector<1x128xf32>
    %c0_28 = arith.constant 0 : index
    %c0_29 = arith.constant 0 : index
    %57 = vector.load %arg10[%c0_28, %c0_29] : memref<128x256xbf16, #tpu.memory_space<vmem>>, vector<128x256xbf16>
    %c0_30 = arith.constant 0 : index
    %c0_31 = arith.constant 0 : index
    %58 = vector.load %arg11[%c0_30, %c0_31] : memref<1x256xf32, #tpu.memory_space<vmem>>, vector<1x256xf32>
    %c0_32 = arith.constant 0 : index
    %c0_33 = arith.constant 0 : index
    %59 = vector.load %arg12[%c0_32, %c0_33] : memref<256x128xbf16, #tpu.memory_space<vmem>>, vector<256x128xbf16>
    %c0_34 = arith.constant 0 : index
    %c0_35 = arith.constant 0 : index
    %60 = vector.load %arg13[%c0_34, %c0_35] : memref<1x128xf32, #tpu.memory_space<vmem>>, vector<1x128xf32>
    %cst_36 = arith.constant dense<0.000000e+00> : vector<256xf32>
    %61 = vector.multi_reduction <add>, %54, %cst_36 [1] : vector<256x128xf32> to vector<256xf32>
    %62 = vector.shape_cast %61 : vector<256xf32> to vector<256x1xf32>
    %63 = arith.mulf %54, %54 : vector<256x128xf32>
    %cst_37 = arith.constant dense<0.000000e+00> : vector<256xf32>
    %64 = vector.multi_reduction <add>, %63, %cst_37 [1] : vector<256x128xf32> to vector<256xf32>
    %65 = vector.shape_cast %64 : vector<256xf32> to vector<256x1xf32>
    %cst_38 = arith.constant 7.812500e-03 : f32
    %66 = vector.broadcast %cst_38 : f32 to vector<256x1xf32>
    %67 = arith.mulf %62, %66 : vector<256x1xf32>
    %cst_39 = arith.constant 7.812500e-03 : f32
    %68 = vector.broadcast %cst_39 : f32 to vector<256x1xf32>
    %69 = arith.mulf %65, %68 : vector<256x1xf32>
    %70 = arith.mulf %67, %67 : vector<256x1xf32>
    %71 = arith.subf %69, %70 : vector<256x1xf32>
    %cst_40 = arith.constant 0.000000e+00 : f32
    %72 = vector.broadcast %cst_40 : f32 to vector<256x1xf32>
    %73 = arith.maximumf %71, %72 : vector<256x1xf32>
    %74 = vector.broadcast %67 : vector<256x1xf32> to vector<256x128xf32>
    %75 = arith.subf %54, %74 : vector<256x128xf32>
    %cst_41 = arith.constant 9.99999974E-6 : f32
    %76 = vector.broadcast %cst_41 : f32 to vector<256x1xf32>
    %77 = arith.addf %73, %76 : vector<256x1xf32>
    %78 = math.rsqrt %77 : vector<256x1xf32>
    %79 = vector.broadcast %78 : vector<256x1xf32> to vector<256x128xf32>
    %80 = arith.mulf %75, %79 : vector<256x128xf32>
    %81 = vector.broadcast %55 : vector<1x128xf32> to vector<256x128xf32>
    %82 = arith.mulf %80, %81 : vector<256x128xf32>
    %83 = vector.broadcast %56 : vector<1x128xf32> to vector<256x128xf32>
    %84 = arith.addf %82, %83 : vector<256x128xf32>
    %85 = arith.truncf %84 : vector<256x128xf32> to vector<256x128xbf16>
    %cst_42 = arith.constant dense<0.000000e+00> : vector<256x256xf32>
    %86 = tpu.matmul %85, %57, %cst_42 {dimension_numbers = #tpu.dot_dimension_numbers<[1], [0], [0], [1], [0, 0, 1, 1], [], []>} : vector<256x128xbf16>, vector<128x256xbf16>, vector<256x256xf32> -> vector<256x256xf32>
    %87 = vector.broadcast %58 : vector<1x256xf32> to vector<256x256xf32>
    %88 = arith.addf %86, %87 : vector<256x256xf32>
    %89 = arith.mulf %88, %88 : vector<256x256xf32>
    %90 = arith.mulf %88, %89 : vector<256x256xf32>
    %cst_43 = arith.constant 4.471500e-02 : f32
    %91 = vector.broadcast %cst_43 : f32 to vector<256x256xf32>
    %92 = arith.mulf %91, %90 : vector<256x256xf32>
    %93 = arith.addf %88, %92 : vector<256x256xf32>
    %cst_44 = arith.constant 0.797884583 : f32
    %94 = vector.broadcast %cst_44 : f32 to vector<256x256xf32>
    %95 = arith.mulf %94, %93 : vector<256x256xf32>
    %96 = math.tanh %95 : vector<256x256xf32>
    %cst_45 = arith.constant 1.000000e+00 : f32
    %97 = vector.broadcast %cst_45 : f32 to vector<256x256xf32>
    %98 = arith.addf %97, %96 : vector<256x256xf32>
    %cst_46 = arith.constant 5.000000e-01 : f32
    %99 = vector.broadcast %cst_46 : f32 to vector<256x256xf32>
    %100 = arith.mulf %99, %98 : vector<256x256xf32>
    %101 = arith.mulf %88, %100 : vector<256x256xf32>
    %102 = arith.truncf %101 : vector<256x256xf32> to vector<256x256xbf16>
    %cst_47 = arith.constant dense<0.000000e+00> : vector<256x128xf32>
    %103 = tpu.matmul %102, %59, %cst_47 {dimension_numbers = #tpu.dot_dimension_numbers<[1], [0], [0], [1], [0, 0, 1, 1], [], []>} : vector<256x256xbf16>, vector<256x128xbf16>, vector<256x128xf32> -> vector<256x128xf32>
    %104 = vector.broadcast %60 : vector<1x128xf32> to vector<256x128xf32>
    %105 = arith.addf %103, %104 : vector<256x128xf32>
    %106 = arith.addf %2, %105 : vector<256x128xf32>
    %c0_48 = arith.constant 0 : index
    %c0_49 = arith.constant 0 : index
    %107 = vector.load %arg14[%c0_48, %c0_49] : memref<256x256xf32, #tpu.memory_space<vmem>>, vector<256x128xf32>
    tpu.vector_store %arg14[%c0_48, %c0_49], %54 {strides = array<i32>} : memref<256x256xf32, #tpu.memory_space<vmem>>, vector<256x128xf32>,
    %c0_50 = arith.constant 0 : index
    %c128 = arith.constant 128 : index
    %108 = vector.load %arg14[%c0_50, %c128] : memref<256x256xf32, #tpu.memory_space<vmem>>, vector<256x128xf32>
    tpu.vector_store %arg14[%c0_50, %c128], %106 {strides = array<i32>} : memref<256x256xf32, #tpu.memory_space<vmem>>, vector<256x128xf32>,
    return
  }
  func.func @transform_0(%arg0: i32) -> (i32, i32) {
    %c0_i32 = arith.constant 0 : i32
    %c0_i32_0 = arith.constant 0 : i32
    return %arg0, %c0_i32 : i32, i32
  }
  func.func @transform_1(%arg0: i32) -> (i32, i32) {
    %c0_i32 = arith.constant 0 : i32
    %c0_i32_0 = arith.constant 0 : i32
    %c0_i32_1 = arith.constant 0 : i32
    return %c0_i32, %c0_i32_0 : i32, i32
  }
  func.func @transform_2(%arg0: i32) -> (i32, i32) {
    %c0_i32 = arith.constant 0 : i32
    %c0_i32_0 = arith.constant 0 : i32
    %c0_i32_1 = arith.constant 0 : i32
    return %c0_i32, %c0_i32_0 : i32, i32
  }
  func.func @transform_3(%arg0: i32) -> (i32, i32) {
    %c0_i32 = arith.constant 0 : i32
    %c0_i32_0 = arith.constant 0 : i32
    %c0_i32_1 = arith.constant 0 : i32
    return %c0_i32, %c0_i32_0 : i32, i32
  }
  func.func @transform_4(%arg0: i32) -> (i32, i32) {
    %c0_i32 = arith.constant 0 : i32
    %c0_i32_0 = arith.constant 0 : i32
    %c0_i32_1 = arith.constant 0 : i32
    return %c0_i32, %c0_i32_0 : i32, i32
  }
  func.func @transform_5(%arg0: i32) -> (i32, i32) {
    %c0_i32 = arith.constant 0 : i32
    %c0_i32_0 = arith.constant 0 : i32
    %c0_i32_1 = arith.constant 0 : i32
    return %c0_i32, %c0_i32_0 : i32, i32
  }
  func.func @transform_6(%arg0: i32) -> (i32, i32) {
    %c0_i32 = arith.constant 0 : i32
    %c0_i32_0 = arith.constant 0 : i32
    %c0_i32_1 = arith.constant 0 : i32
    return %c0_i32, %c0_i32_0 : i32, i32
  }
  func.func @transform_7(%arg0: i32) -> (i32, i32) {
    %c0_i32 = arith.constant 0 : i32
    %c0_i32_0 = arith.constant 0 : i32
    %c0_i32_1 = arith.constant 0 : i32
    return %c0_i32, %c0_i32_0 : i32, i32
  }
  func.func @transform_8(%arg0: i32) -> (i32, i32) {
    %c0_i32 = arith.constant 0 : i32
    %c0_i32_0 = arith.constant 0 : i32
    %c0_i32_1 = arith.constant 0 : i32
    return %c0_i32, %c0_i32_0 : i32, i32
  }
  func.func @transform_9(%arg0: i32) -> (i32, i32) {
    %c0_i32 = arith.constant 0 : i32
    %c0_i32_0 = arith.constant 0 : i32
    %c0_i32_1 = arith.constant 0 : i32
    return %c0_i32, %c0_i32_0 : i32, i32
  }
  func.func @transform_10(%arg0: i32) -> (i32, i32) {
    %c0_i32 = arith.constant 0 : i32
    %c0_i32_0 = arith.constant 0 : i32
    %c0_i32_1 = arith.constant 0 : i32
    return %c0_i32, %c0_i32_0 : i32, i32
  }
  func.func @transform_11(%arg0: i32) -> (i32, i32) {
    %c0_i32 = arith.constant 0 : i32
    %c0_i32_0 = arith.constant 0 : i32
    %c0_i32_1 = arith.constant 0 : i32
    return %c0_i32, %c0_i32_0 : i32, i32
  }
  func.func @transform_12(%arg0: i32) -> (i32, i32) {
    %c0_i32 = arith.constant 0 : i32
    %c0_i32_0 = arith.constant 0 : i32
    %c0_i32_1 = arith.constant 0 : i32
    return %c0_i32, %c0_i32_0 : i32, i32
  }
  func.func @transform_13(%arg0: i32) -> (i32, i32) {
    %c0_i32 = arith.constant 0 : i32
    %c0_i32_0 = arith.constant 0 : i32
    return %arg0, %c0_i32 : i32, i32
  }
}

</mosaic_0001>

<bundles_post_ra>
// kernel: tpu_custom_call.1
= control target key start
LH: loop header
LB: loop body
LE: loop exit
PB: predicated region body
PF: predicated region fallthrough
CT: control target
= control target key end

     0   :  { %18 = vsyncpa [#allocation3], 0  ;;  %s7180_s0 = inlined_call_operand.hbm [shape: f32[256,256], index: 0, kind: input, shape index: {}]   ;;  %s7181_s1 = inlined_call_operand.vmem [shape: f32[1,128], index: 1, kind: input, shape index: {}]   ;;  %s7182_s2 = inlined_call_operand.vmem [shape: f32[1,128], index: 2, kind: input, shape index: {}]   ;;  %s7183_s3 = inlined_call_operand.hbm [shape: bf16[128,256], index: 3, kind: input, shape index: {}]   ;;  %s7184_s4 = inlined_call_operand.vmem [shape: f32[1,256], index: 4, kind: input, shape index: {}]   ;;  %s7185_s5 = inlined_call_operand.hbm [shape: bf16[256,128], index: 5, kind: input, shape index: {}]   ;;  %s7186_s6 = inlined_call_operand.vmem [shape: f32[1,128], index: 6, kind: input, shape index: {}]   ;;  %s7187_s7 = inlined_call_operand.vmem [shape: f32[1,128], index: 7, kind: input, shape index: {}]   ;;  %s7188_s8 = inlined_call_operand.vmem [shape: f32[1,128], index: 8, kind: input, shape index: {}]   ;;  %s7189_s9 = inlined_call_operand.hbm [shape: bf16[128,256], index: 9, kind: input, shape index: {}]   ;;  %s7190_s10 = inlined_call_operand.vmem [shape: f32[1,256], index: 10, kind: input, shape index: {}]   ;;  %s7191_s11 = inlined_call_operand.hbm [shape: bf16[256,128], index: 11, kind: input, shape index: {}]   ;;  %s7192_s12 = inlined_call_operand.vmem [shape: f32[1,128], index: 12, kind: input, shape index: {}]   ;;  %s7193_s13 = inlined_call_operand.hbm [shape: f32[256,256], index: 13, kind: output, shape index: {}]  }
   0x1   :  { %19 = vsyncpa [#allocation6], 0 }
   0x2   :  { %20 = vsyncpa [#allocation9], 0 }
   0x3   :  { %21 = vsyncpa [#allocation4], 0  ;;  %s4768_s25 = smov [#allocation5]   ;;  %s4628_s29 = scalar_lea.hbm %s7183_s3, 2048 }
   0x4   :  { %s43_s26 = sshll.u32 %s4768_s25, 4  ;;  %p4629_p0 = scmp.ne.s32.totalorder %s7183_s3, %s4628_s29  ;;  %s44_s26 = int_to_ptr.vmem [resolvable:$true] %s43_s26 }
   0x5   :  { %p4632_p1 = scmp.lt.u32.totalorder %s4628_s29, %s7183_s3 }
   0x7   :  { %p4634_p2 = pnand %p4632_p1, %p4629_p0 }
   0x9   :  { %4637 = shalt.err (!%p4634_p2)
}
   0xa   :  { %s4638_s17 = scalar_lea.vmem %s44_s26, 2048  ;;  %p4643_p4 = scmp.lt.s32.totalorder %s44_s26, %s44_s26 }
   0xb   :  { %p4639_p3 = scmp.ne.s32.totalorder %s44_s26, %s4638_s17  ;;  %p4644_p5 = scmp.lt.s32.totalorder %s4638_s17, %s4638_s17 }
   0xd   :  { %p4645_p6 = por %p4644_p5, %p4643_p4 }
   0xf   :  { %p4646_p7 = pnand %p4645_p6, %p4639_p3 }
  0x11   :  { %4649 = shalt.err (!%p4646_p7)
}
  0x12   :  { %s4769_s18 = smov 128   ;;  %s4770_s19 = smov 8  }
  0x13   :  { %49 = dma.hbm_to_vmem [thread:$0]  %s7183_s3, 2048, %s44_s26, [#allocation6], %s4769_s18, %s4769_s18, %s4770_s19  }
  0x14   :  { %s4771_s22 = smov [#allocation8]   ;;  %s4772_s24 = smov [#allocation2]  }
  0x15   :  { %s75_s23 = sshll.u32 %s4771_s22, 4  ;;  %s27_s25 = sshll.u32 %s4772_s24, 4  ;;  %s76_s23 = int_to_ptr.vmem [resolvable:$true] %s75_s23  ;;  %s28_s25 = int_to_ptr.vmem [resolvable:$true] %s27_s25 }
  0x16   :  { %s4650_s29 = scalar_lea.hbm %s7189_s9, 2048 }
  0x17   :  { %p4651_p8 = scmp.ne.s32.totalorder %s7189_s9, %s4650_s29  ;;  %p4654_p9 = scmp.lt.u32.totalorder %s4650_s29, %s7189_s9 }
  0x19   :  { %p4656_p10 = pnand %p4654_p9, %p4651_p8 }
  0x1b   :  { %4659 = shalt.err (!%p4656_p10)
}
  0x1c   :  { %s4660_s3 = scalar_lea.vmem %s76_s23, 2048  ;;  %p4665_p12 = scmp.lt.s32.totalorder %s76_s23, %s76_s23 }
  0x1d   :  { %p4661_p11 = scmp.ne.s32.totalorder %s76_s23, %s4660_s3  ;;  %p4666_p13 = scmp.lt.s32.totalorder %s4660_s3, %s4660_s3 }
  0x1f   :  { %p4667_p0 = por %p4666_p13, %p4665_p12 }
  0x21   :  { %p4668_p1 = pnand %p4667_p0, %p4661_p11 }
  0x23   :  { %4671 = shalt.err (!%p4668_p1)
}
  0x24   :  { %81 = dma.hbm_to_vmem [thread:$0]  %s7189_s9, 2048, %s76_s23, [#allocation9], %s4769_s18, %s4769_s18, %s4770_s19  }
  0x25   :  { %s4672_s22 = scalar_lea.hbm %s7180_s0, 8192 }
  0x26   :  { %p4673_p2 = scmp.ne.s32.totalorder %s7180_s0, %s4672_s22  ;;  %p4676_p3 = scmp.lt.u32.totalorder %s4672_s22, %s7180_s0 }
  0x28   :  { %p4678_p4 = pnand %p4676_p3, %p4673_p2 }
  0x2a   :  { %4681 = shalt.err (!%p4678_p4)
}
  0x2b   :  { %s4682_s30 = scalar_lea.vmem %s28_s25, 8192  ;;  %p4687_p6 = scmp.lt.s32.totalorder %s28_s25, %s28_s25 }
  0x2c   :  { %p4683_p5 = scmp.ne.s32.totalorder %s28_s25, %s4682_s30  ;;  %p4688_p7 = scmp.lt.s32.totalorder %s4682_s30, %s4682_s30 }
  0x2e   :  { %p4689_p8 = por %p4688_p7, %p4687_p6 }
  0x30   :  { %p4690_p9 = pnand %p4689_p8, %p4683_p5 }
  0x32   :  { %4693 = shalt.err (!%p4690_p9)
}
  0x33   :  { %s4773_s9 = smov 256   ;;  %s4774_s18 = smov 16  }
  0x34   :  { %33 = dma.hbm_to_vmem [thread:$0]  %s7180_s0, 8192, %s28_s25, [#allocation3], %s4773_s9, %s4773_s9, %s4774_s18  }
  0x35   :  { %s4775_s14 = smov [#allocation7]   ;;  %s4694_s26 = scalar_lea.hbm %s7185_s5, 2048 }
  0x36   :  { %s57_s15 = sshll.u32 %s4775_s14, 4  ;;  %p4695_p10 = scmp.ne.s32.totalorder %s7185_s5, %s4694_s26  ;;  %s58_s15 = int_to_ptr.vmem [resolvable:$true] %s57_s15 }
  0x37   :  { %p4698_p11 = scmp.lt.u32.totalorder %s4694_s26, %s7185_s5 }
  0x39   :  { %p4700_p12 = pnand %p4698_p11, %p4695_p10 }
  0x3b   :  { %4703 = shalt.err (!%p4700_p12)
}
  0x3c   :  { %s4704_s24 = scalar_lea.vmem %s58_s15, 2048  ;;  %p4709_p0 = scmp.lt.s32.totalorder %s58_s15, %s58_s15 }
  0x3d   :  { %p4705_p13 = scmp.ne.s32.totalorder %s58_s15, %s4704_s24  ;;  %p4710_p1 = scmp.lt.s32.totalorder %s4704_s24, %s4704_s24 }
  0x3f   :  { %p4711_p2 = por %p4710_p1, %p4709_p0 }
  0x41   :  { %p4712_p3 = pnand %p4711_p2, %p4705_p13 }
  0x43   :  { %4715 = shalt.err (!%p4712_p3)
}
  0x44   :  { %s4776_s0 = smov 64   ;;  %s4777_s25 = smov 4  }
  0x45   :  { %63 = dma.hbm_to_vmem [thread:$0]  %s7185_s5, 2048, %s58_s15, [#allocation6], %s4776_s0, %s4776_s0, %s4777_s25  }
  0x46   :  { %s4778_s29 = smov [#allocation10]   ;;  %s4716_s14 = scalar_lea.hbm %s7191_s11, 2048 }
  0x47   :  { %s89_s30 = sshll.u32 %s4778_s29, 4  ;;  %p4717_p4 = scmp.ne.s32.totalorder %s7191_s11, %s4716_s14  ;;  %s90_s30 = int_to_ptr.vmem [resolvable:$true] %s89_s30 }
  0x48   :  { %p4720_p5 = scmp.lt.u32.totalorder %s4716_s14, %s7191_s11 }
  0x4a   :  { %p4722_p6 = pnand %p4720_p5, %p4717_p4 }
  0x4c   :  { %4725 = shalt.err (!%p4722_p6)
}
  0x4d   :  { %s4726_s20 = scalar_lea.vmem %s90_s30, 2048  ;;  %p4731_p8 = scmp.lt.s32.totalorder %s90_s30, %s90_s30 }
  0x4e   :  { %p4727_p7 = scmp.ne.s32.totalorder %s90_s30, %s4726_s20  ;;  %p4732_p9 = scmp.lt.s32.totalorder %s4726_s20, %s4726_s20 }
  0x50   :  { %p4733_p10 = por %p4732_p9, %p4731_p8 }
  0x52   :  { %p4734_p11 = pnand %p4733_p10, %p4727_p7 }
  0x54   :  { %4737 = shalt.err (!%p4734_p11)
}
  0x55   :  { %95 = dma.hbm_to_vmem [thread:$0]  %s7191_s11, 2048, %s90_s30, [#allocation9], %s4776_s0, %s4776_s0, %s4777_s25  }
  0x56   :  { %4760 = dma.done.wait [#allocation3], 8192  }
  0x57   :  { %4761 = vsyncadd [#allocation3], 4294959104 }
  0x58   :  { %4762 = dma.done.wait [#allocation6], 4096  }
  0x59   :  { %4763 = vsyncadd [#allocation6], 4294963200 }
  0x5a   :  { %4764 = dma.done.wait [#allocation9], 4096  }
  0x5b   :  { %4765 = vsyncadd [#allocation9], 4294963200  ;;  %v4914_v0 = vld [vmem:[#allocation2 + $0x8] sm:$0xff]  ;;  %v4916_v1 = vld [vmem:[#allocation2 + $0x18] sm:$0xff]  ;;  %v7196_v42 = vmov 0  }
  0x5c   :  { %230 = vadd.xlane.f32.xlu0 %v4914_v0  ;;  %v294_v2 = vmul.f32 %v4914_v0, %v4914_v0  ;;  %v295_v3 = vmul.f32 %v4916_v1, %v4916_v1  ;;  %v4924_v4 = vld [vmem:[#allocation2 + $0x28] sm:$0xff]  ;;  %v4926_v5 = vld [vmem:[#allocation2 + $0x38] sm:$0xff]  ;;  %893 = vmatprep.mubr.bf16.mxu0 %v7196_v42 }
  0x5d   :  { %v296_v6 = vmul.f32 %v4924_v4, %v4924_v4  ;;  %v297_v7 = vmul.f32 %v4926_v5, %v4926_v5  ;;  %v4934_v8 = vld [vmem:[#allocation2 + $0x48] sm:$0xff]  ;;  %v4936_v9 = vld [vmem:[#allocation2 + $0x58] sm:$0xff] }
  0x5e   :  { %326 = vadd.xlane.f32.xlu1 %v294_v2  ;;  %v4126_v10 = vld [vmem:[#allocation5 + $0x4] ss:$8 sps:$4 sm:$0xff]   ;;  %v4128_v11 = vld [vmem:[#allocation5] ss:$8 sps:$4 sm:$0xff]   ;;  %v298_v12 = vmul.f32 %v4934_v8, %v4934_v8  ;;  %v4129_v13 = vld [vmem:[#allocation5 + $0x14] ss:$8 sps:$4 sm:$0xff]   ;;  %v299_v14 = vmul.f32 %v4936_v9, %v4936_v9 }
  0x5f   :  { %861 = vmatprep.subr.bf16.mxu0 %v4126_v10  ;;  %v4131_v15 = vld [vmem:[#allocation5 + $0x10] ss:$8 sps:$4 sm:$0xff]   ;;  %v4944_v16 = vld [vmem:[#allocation2 + $0x68] sm:$0xff]  ;;  %v4135_v22 = vld [vmem:[#allocation5 + $0x34] ss:$8 sps:$4 sm:$0xff]  }
  0x60   :  { %232 = vadd.xlane.f32.xlu0 %v4916_v1  ;;  %862 = vmatpush1.bf16.msra.mxu0 %v4128_v11  ;;  %v4946_v17 = vld [vmem:[#allocation2 + $0x78] sm:$0xff]  ;;  %v4132_v18 = vld [vmem:[#allocation5 + $0x24] ss:$8 sps:$4 sm:$0xff]   ;;  %v4134_v19 = vld [vmem:[#allocation5 + $0x20] ss:$8 sps:$4 sm:$0xff]   ;;  %v300_v20 = vmul.f32 %v4944_v16, %v4944_v16 }
  0x61   :  { %863 = vmatprep.subr.bf16.mxu0 %v4129_v13  ;;  %v301_v21 = vmul.f32 %v4946_v17, %v4946_v17  ;;  %v4954_v23 = vld [vmem:[#allocation2 + $0x88] sm:$0xff]  ;;  %v4137_v24 = vld [vmem:[#allocation5 + $0x30] ss:$8 sps:$4 sm:$0xff]   ;;  %v4141_v30 = vld [vmem:[#allocation5 + $0x54] ss:$8 sps:$4 sm:$0xff]  }
  0x62   :  { %328 = vadd.xlane.f32.xlu1 %v295_v3  ;;  %v4956_v25 = vld [vmem:[#allocation2 + $0x98] sm:$0xff]  ;;  %v4138_v26 = vld [vmem:[#allocation5 + $0x44] ss:$8 sps:$4 sm:$0xff]   ;;  %v4140_v27 = vld [vmem:[#allocation5 + $0x40] ss:$8 sps:$4 sm:$0xff]   ;;  %v302_v28 = vmul.f32 %v4954_v23, %v4954_v23 }
  0x63   :  { %v303_v29 = vmul.f32 %v4956_v25, %v4956_v25  ;;  %v4143_v31 = vld [vmem:[#allocation5 + $0x50] ss:$8 sps:$4 sm:$0xff]   ;;  %v4964_v32 = vld [vmem:[#allocation2 + $0xa8] sm:$0xff]  ;;  %v4147_v38 = vld [vmem:[#allocation5 + $0x74] ss:$8 sps:$4 sm:$0xff]  }
  0x64   :  { %234 = vadd.xlane.f32.xlu0 %v4924_v4  ;;  %864 = vmatpush1.bf16.msra.mxu0 %v4131_v15  ;;  %v4144_v33 = vld [vmem:[#allocation5 + $0x64] ss:$8 sps:$4 sm:$0xff]   ;;  %v4966_v34 = vld [vmem:[#allocation2 + $0xb8] sm:$0xff]  ;;  %v4146_v35 = vld [vmem:[#allocation5 + $0x60] ss:$8 sps:$4 sm:$0xff]   ;;  %v304_v36 = vmul.f32 %v4964_v32, %v4964_v32 }
  0x65   :  { %865 = vmatprep.subr.bf16.mxu0 %v4132_v18  ;;  %v305_v37 = vmul.f32 %v4966_v34, %v4966_v34  ;;  %v4974_v39 = vld [vmem:[#allocation2 + $0xc8] sm:$0xff]  ;;  %v4149_v40 = vld [vmem:[#allocation5 + $0x70] ss:$8 sps:$4 sm:$0xff]  }
  0x66   :  { %236 = vadd.xlane.f32.xlu1 %v4926_v5  ;;  %v4976_v41 = vld [vmem:[#allocation2 + $0xd8] sm:$0xff]  ;;  %v306_v43 = vmul.f32 %v4974_v39, %v4974_v39  ;;  %v4985_v45 = vld [vmem:[#allocation2 + $0xe8] sm:$0xff] }
  0x67   :  { %v307_v44 = vmul.f32 %v4976_v41, %v4976_v41  ;;  %v4987_v46 = vld [vmem:[#allocation2 + $0xf8] sm:$0xff]  ;;  %v308_v47 = vmul.f32 %v4985_v45, %v4985_v45  ;;  %v4995_v49 = vld [vmem:[#allocation2 + $0x108] sm:$0xff] }
  0x68   :  { %330 = vadd.xlane.f32.xlu0 %v296_v6  ;;  %866 = vmatpush1.bf16.msra.mxu0 %v4134_v19  ;;  %v309_v48 = vmul.f32 %v4987_v46, %v4987_v46  ;;  %v4997_v50 = vld [vmem:[#allocation2 + $0x118] sm:$0xff]  ;;  %v310_v51 = vmul.f32 %v4995_v49, %v4995_v49  ;;  %v5005_v53 = vld [vmem:[#allocation2 + $0x128] sm:$0xff] }
  0x69   :  { %867 = vmatprep.subr.bf16.mxu0 %v4135_v22  ;;  %v311_v52 = vmul.f32 %v4997_v50, %v4997_v50  ;;  %v5007_v54 = vld [vmem:[#allocation2 + $0x138] sm:$0xff]  ;;  %v312_v55 = vmul.f32 %v5005_v53, %v5005_v53  ;;  %v5015_v57 = vld [vmem:[#allocation2 + $0x148] sm:$0xff] }
  0x6a   :  { %332 = vadd.xlane.f32.xlu1 %v297_v7  ;;  %v313_v56 = vmul.f32 %v5007_v54, %v5007_v54  ;;  %v5017_v58 = vld [vmem:[#allocation2 + $0x158] sm:$0xff]  ;;  %v314_v59 = vmul.f32 %v5015_v57, %v5015_v57  ;;  %v5025_v61 = vld [vmem:[#allocation2 + $0x168] sm:$0xff] }
  0x6b   :  { %v315_v60 = vmul.f32 %v5017_v58, %v5017_v58  ;;  %v5027_v62 = vld [vmem:[#allocation2 + $0x178] sm:$0xff]  ;;  %v316_v63 = vmul.f32 %v5025_v61, %v5025_v61  ;;  %v5035_v3 = vld [vmem:[#allocation2 + $0x188] sm:$0xff] }
  0x6c   :  { %238 = vadd.xlane.f32.xlu0 %v4934_v8  ;;  %868 = vmatpush1.bf16.msra.mxu0 %v4137_v24  ;;  %v317_v2 = vmul.f32 %v5027_v62, %v5027_v62  ;;  %v5037_v6 = vld [vmem:[#allocation2 + $0x198] sm:$0xff]  ;;  %v318_v7 = vmul.f32 %v5035_v3, %v5035_v3  ;;  %v5045_v11 = vld [vmem:[#allocation2 + $0x1a8] sm:$0xff] }
  0x6d   :  { %869 = vmatprep.subr.bf16.mxu0 %v4138_v26  ;;  %v319_v10 = vmul.f32 %v5037_v6, %v5037_v6  ;;  %v320_v13 = vmul.f32 %v5045_v11, %v5045_v11  ;;  %v5055_v15 = vld [vmem:[#allocation2 + $0x1c8] sm:$0xff]  ;;  %v5057_v18 = vld [vmem:[#allocation2 + $0x1d8] sm:$0xff] }
  0x6e   :  { %240 = vadd.xlane.f32.xlu1 %v4936_v9  ;;  %v322_v19 = vmul.f32 %v5055_v15, %v5055_v15  ;;  %v177_v22 = vld [vmem:[#allocation2 + $0x1f8] sm:$0xff] }
  0x6f   :  { %v325_v26 = vmul.f32 %v177_v22, %v177_v22 }
  0x70   :  { %334 = vadd.xlane.f32.xlu0 %v298_v12  ;;  %870 = vmatpush1.bf16.msra.mxu0 %v4140_v27  ;;  %v5047_v12 = vld [vmem:[#allocation2 + $0x1b8] sm:$0xff] }
  0x71   :  { %871 = vmatprep.subr.bf16.mxu0 %v4141_v30 }
  0x72   :  { %336 = vadd.xlane.f32.xlu1 %v299_v14  ;;  %v321_v14 = vmul.f32 %v5047_v12, %v5047_v12 }
  0x74   :  { %242 = vadd.xlane.f32.xlu0 %v4944_v16  ;;  %872 = vmatpush1.bf16.msra.mxu0 %v4143_v31 }
  0x75   :  { %873 = vmatprep.subr.bf16.mxu0 %v4144_v33 }
  0x76   :  { %244 = vadd.xlane.f32.xlu1 %v4946_v17 }
  0x78   :  { %338 = vadd.xlane.f32.xlu0 %v300_v20  ;;  %874 = vmatpush1.bf16.msra.mxu0 %v4146_v35  ;;  %v323_v20 = vmul.f32 %v5057_v18, %v5057_v18 }
  0x79   :  { %875 = vmatprep.subr.bf16.mxu0 %v4147_v38 }
  0x7a   :  { %340 = vadd.xlane.f32.xlu1 %v301_v21  ;;  %v5065_v21 = vld [vmem:[#allocation2 + $0x1e8] sm:$0xff] }
  0x7b   :  { %v324_v24 = vmul.f32 %v5065_v21, %v5065_v21 }
  0x7c   :  { %246 = vadd.xlane.f32.xlu0 %v4954_v23  ;;  %876 = vmatpush1.bf16.msra.mxu0 %v4149_v40 }
  0x7e   :  { %248 = vadd.xlane.f32.xlu1 %v4956_v25 }
  0x80   :  { %342 = vadd.xlane.f32.xlu0 %v302_v28 }
  0x82   :  { %344 = vadd.xlane.f32.xlu1 %v303_v29 }
  0x84   :  { %250 = vadd.xlane.f32.xlu0 %v4964_v32 }
  0x86   :  { %252 = vadd.xlane.f32.xlu1 %v4966_v34 }
  0x88   :  { %346 = vadd.xlane.f32.xlu0 %v304_v36 }
  0x8a   :  { %348 = vadd.xlane.f32.xlu1 %v305_v37 }
  0x8c   :  { %254 = vadd.xlane.f32.xlu0 %v4974_v39 }
  0x8e   :  { %256 = vadd.xlane.f32.xlu1 %v4976_v41 }
  0x90   :  { %350 = vadd.xlane.f32.xlu0 %v306_v43 }
  0x92   :  { %352 = vadd.xlane.f32.xlu1 %v307_v44 }
  0x94   :  { %258 = vadd.xlane.f32.xlu0 %v4985_v45 }
  0x96   :  { %260 = vadd.xlane.f32.xlu1 %v4987_v46 }
  0x98   :  { %354 = vadd.xlane.f32.xlu0 %v308_v47 }
  0x9a   :  { %356 = vadd.xlane.f32.xlu1 %v309_v48 }
  0x9c   :  { %262 = vadd.xlane.f32.xlu0 %v4995_v49 }
  0x9e   :  { %264 = vadd.xlane.f32.xlu1 %v4997_v50 }
  0xa0   :  { %358 = vadd.xlane.f32.xlu0 %v310_v51 }
  0xa2   :  { %360 = vadd.xlane.f32.xlu1 %v311_v52 }
  0xa4   :  { %266 = vadd.xlane.f32.xlu0 %v5005_v53 }
  0xa6   :  { %268 = vadd.xlane.f32.xlu1 %v5007_v54 }
  0xa8   :  { %362 = vadd.xlane.f32.xlu0 %v312_v55 }
  0xaa   :  { %364 = vadd.xlane.f32.xlu1 %v313_v56 }
  0xac   :  { %270 = vadd.xlane.f32.xlu0 %v5015_v57 }
  0xae   :  { %272 = vadd.xlane.f32.xlu1 %v5017_v58 }
  0xb0   :  { %366 = vadd.xlane.f32.xlu0 %v314_v59 }
  0xb2   :  { %368 = vadd.xlane.f32.xlu1 %v315_v60 }
  0xb4   :  { %274 = vadd.xlane.f32.xlu0 %v5025_v61 }
  0xb6   :  { %276 = vadd.xlane.f32.xlu1 %v5027_v62 }
  0xb8   :  { %370 = vadd.xlane.f32.xlu0 %v316_v63 }
  0xba   :  { %372 = vadd.xlane.f32.xlu1 %v317_v2 }
  0xbc   :  { %278 = vadd.xlane.f32.xlu0 %v5035_v3 }
  0xbe   :  { %280 = vadd.xlane.f32.xlu1 %v5037_v6 }
  0xc0   :  { %374 = vadd.xlane.f32.xlu0 %v318_v7 }
  0xc2   :  { %376 = vadd.xlane.f32.xlu1 %v319_v10 }
  0xc4   :  { %282 = vadd.xlane.f32.xlu0 %v5045_v11 }
  0xc6   :  { %284 = vadd.xlane.f32.xlu1 %v5047_v12 }
  0xc8   :  { %378 = vadd.xlane.f32.xlu0 %v320_v13 }
  0xca   :  { %380 = vadd.xlane.f32.xlu1 %v321_v14 }
  0xcc   :  { %286 = vadd.xlane.f32.xlu0 %v5055_v15 }
  0xce   :  { %288 = vadd.xlane.f32.xlu1 %v5057_v18 }
  0xd0   :  { %382 = vadd.xlane.f32.xlu0 %v322_v19 }
  0xd2   :  { %384 = vadd.xlane.f32.xlu1 %v323_v20 }
  0xd4   :  { %290 = vadd.xlane.f32.xlu0 %v5065_v21 }
  0xd6   :  { %292 = vadd.xlane.f32.xlu1 %v177_v22 }
  0xd8   :  { %386 = vadd.xlane.f32.xlu0 %v324_v24 }
  0xda   :  { %388 = vadd.xlane.f32.xlu1 %v325_v26 }
  0xe9   :  { %v231_v27 = vpop.xlane.xlu0 %230 }
  0xea   :  { %v390_v28 = vmul.f32 0.0078125, %v231_v27 }
  0xeb   :  { %v327_v29 = vpop.xlane.xlu1 %326 }
  0xec   :  { %v454_v30 = vmul.f32 %v390_v28, %v390_v28  ;;  %v422_v31 = vmul.f32 0.0078125, %v327_v29 }
  0xed   :  { %v233_v33 = vpop.xlane.xlu0 %232 }
  0xee   :  { %v486_v35 = vsub.f32 %v422_v31, %v454_v30  ;;  %v391_v36 = vmul.f32 0.0078125, %v233_v33  ;;  %v550_v31 = vsub.f32 %v4914_v0, %v390_v28 }
  0xef   :  { %v329_v37 = vpop.xlane.xlu1 %328 }
  0xf0   :  { %v518_v38 = vmax.f32 %v486_v35, 0.0  ;;  %v455_v40 = vmul.f32 %v391_v36, %v391_v36  ;;  %v423_v43 = vmul.f32 0.0078125, %v329_v37  ;;  %v551_v0 = vsub.f32 %v4916_v1, %v391_v36 }
  0xf1   :  { %v235_v44 = vpop.xlane.xlu0 %234 }
  0xf2   :  { %v582_v47 = vadd.f32 1e-05, %v518_v38  ;;  %v487_v48 = vsub.f32 %v423_v43, %v455_v40  ;;  %v5070_v51 = vmul.f32 0.0078125, %v235_v44 }
  0xf3   :  { %v237_v52 = vpop.xlane.xlu1 %236 }
  0xf4   :  { %4206 = vrsqrt.f32 %v582_v47  ;;  %v519_v55 = vmax.f32 %v487_v48, 0.0  ;;  %v456_v56 = vmul.f32 %v5070_v51, %v5070_v51  ;;  %v5074_v59 = vmul.f32 0.0078125, %v237_v52 }
  0xf5   :  { %v331_v60 = vpop.xlane.xlu0 %330 }
  0xf6   :  { %v583_v63 = vadd.f32 1e-05, %v519_v55  ;;  %v424_v2 = vmul.f32 0.0078125, %v331_v60  ;;  %v457_v10 = vmul.f32 %v5074_v59, %v5074_v59  ;;  %v5090_v55 = vld [vmem:[%s7181_s1] ss:$0 sm:$0xff] }
  0xf7   :  { %v333_v7 = vpop.xlane.xlu1 %332 }
  0xf8   :  { %4208 = vrsqrt.f32 %v583_v63  ;;  %v488_v13 = vsub.f32 %v424_v2, %v456_v56  ;;  %v425_v14 = vmul.f32 0.0078125, %v333_v7 }
  0xf9   :  { %v239_v19 = vpop.xlane.xlu0 %238 }
  0xfa   :  { %v520_v20 = vmax.f32 %v488_v13, 0.0  ;;  %v489_v22 = vsub.f32 %v425_v14, %v457_v10  ;;  %v5078_v24 = vmul.f32 0.0078125, %v239_v19 }
  0xfb   :  { %v241_v26 = vpop.xlane.xlu1 %240 }
  0xfc   :  { %v584_v27 = vadd.f32 1e-05, %v520_v20  ;;  %v521_v29 = vmax.f32 %v489_v22, 0.0  ;;  %v458_v30 = vmul.f32 %v5078_v24, %v5078_v24  ;;  %v5083_v33 = vmul.f32 0.0078125, %v241_v26  ;;  %v5101_v22 = vld [vmem:[%s7182_s2] ss:$0 sm:$0xff] }
  0xfd   :  { %v335_v35 = vpop.xlane.xlu0 %334 }
  0xfe   :  { %v4207_v37 = vpop.eup %4206  ;;  %4210 = vrsqrt.f32 %v584_v27  ;;  %v585_v38 = vadd.f32 1e-05, %v521_v29  ;;  %v426_v40 = vmul.f32 0.0078125, %v335_v35  ;;  %v459_v47 = vmul.f32 %v5083_v33, %v5083_v33 }
  0xff   :  { %v337_v43 = vpop.xlane.xlu1 %336  ;;  %v646_v44 = vmul.f32 %v4207_v37, %v550_v31 }
 0x100   :  { %4212 = vrsqrt.f32 %v585_v38  ;;  %v490_v48 = vsub.f32 %v426_v40, %v458_v30  ;;  %v427_v52 = vmul.f32 0.0078125, %v337_v43  ;;  %v552_v30 = vsub.f32 %v4924_v4, %v5070_v51 }
 0x101   :  { %v243_v28 = vpop.xlane.xlu0 %242  ;;  %v684_v13 = vmul.f32 %v5090_v55, %v646_v44 }
 0x102   :  { %v4209_v56 = vpop.eup %4208  ;;  %v522_v60 = vmax.f32 %v490_v48, 0.0  ;;  %v491_v63 = vsub.f32 %v427_v52, %v459_v47  ;;  %v5093_v2 = vmul.f32 0.0078125, %v243_v28  ;;  %v553_v47 = vsub.f32 %v4926_v5, %v5074_v59 }
 0x103   :  { %v245_v7 = vpop.xlane.xlu1 %244  ;;  %v647_v10 = vmul.f32 %v4209_v56, %v551_v0  ;;  %v722_v35 = vadd.f32 %v5101_v22, %v684_v13 }
 0x104   :  { %v586_v14 = vadd.f32 1e-05, %v522_v60  ;;  %v523_v19 = vmax.f32 %v491_v63, 0.0  ;;  %v460_v20 = vmul.f32 %v5093_v2, %v5093_v2  ;;  %v5103_v1 = vmul.f32 0.0078125, %v245_v7 }
 0x105   :  { %v339_v36 = vpop.xlane.xlu0 %338  ;;  %v685_v26 = vmul.f32 %v5090_v55, %v647_v10 }
 0x106   :  { %4214 = vrsqrt.f32 %v586_v14  ;;  %v587_v27 = vadd.f32 1e-05, %v523_v19  ;;  %v428_v29 = vmul.f32 0.0078125, %v339_v36  ;;  %v461_v40 = vmul.f32 %v5103_v1, %v5103_v1 }
 0x107   :  { %v341_v31 = vpop.xlane.xlu1 %340  ;;  %v723_v37 = vadd.f32 %v5101_v22, %v685_v26  ;;  %v554_v26 = vsub.f32 %v4934_v8, %v5078_v24 }
 0x108   :  { %v4211_v38 = vpop.eup %4210  ;;  %4216 = vrsqrt.f32 %v587_v27  ;;  %v492_v43 = vsub.f32 %v428_v29, %v460_v20  ;;  %v429_v44 = vmul.f32 0.0078125, %v341_v31 }
 0x109   :  { %v247_v48 = vpop.xlane.xlu0 %246  ;;  %v754_v52 = vpack.c.bf16 %v723_v37, %v722_v35  ;;  %v648_v0 = vmul.f32 %v4211_v38, %v552_v30 }
 0x10a   :  { %v4213_v28 = vpop.eup %4212  ;;  %v524_v4 = vmax.f32 %v492_v43, 0.0  ;;  %v493_v51 = vsub.f32 %v429_v44, %v461_v40  ;;  %v5114_v56 = vmul.f32 0.0078125, %v247_v48  ;;  %v555_v40 = vsub.f32 %v4936_v9, %v5083_v33 }
 0x10b   :  { %894 = vmatmul.mubr.bf16.vlgmr.msra.gmra.mrb[0].mxu0 %v754_v52  ;;  %v249_v60 = vpop.xlane.xlu1 %248  ;;  %v649_v63 = vmul.f32 %v4213_v28, %v553_v47  ;;  %v686_v7 = vmul.f32 %v5090_v55, %v648_v0 }
 0x10c   :  { %v588_v10 = vadd.f32 1e-05, %v524_v4  ;;  %v525_v13 = vmax.f32 %v493_v51, 0.0  ;;  %v462_v14 = vmul.f32 %v5114_v56, %v5114_v56  ;;  %903 = vmatprep.mubr.bf16.mxu0 %v7196_v42  ;;  %v5120_v5 = vmul.f32 0.0078125, %v249_v60 }
 0x10d   :  { %v343_v59 = vpop.xlane.xlu0 %342  ;;  %v687_v19 = vmul.f32 %v5090_v55, %v649_v63  ;;  %v724_v29 = vadd.f32 %v5101_v22, %v686_v7 }
 0x10e   :  { %4218 = vrsqrt.f32 %v588_v10  ;;  %v589_v20 = vadd.f32 1e-05, %v525_v13  ;;  %v430_v36 = vmul.f32 0.0078125, %v343_v59  ;;  %v463_v35 = vmul.f32 %v5120_v5, %v5120_v5 }
 0x10f   :  { %v345_v27 = vpop.xlane.xlu1 %344  ;;  %v725_v30 = vadd.f32 %v5101_v22, %v687_v19 }
 0x110   :  { %v4215_v31 = vpop.eup %4214  ;;  %4220 = vrsqrt.f32 %v589_v20  ;;  %v494_v37 = vsub.f32 %v430_v36, %v462_v14  ;;  %v431_v38 = vmul.f32 0.0078125, %v345_v27  ;;  %v556_v14 = vsub.f32 %v4944_v16, %v5093_v2 }
 0x111   :  { %v251_v43 = vpop.xlane.xlu0 %250  ;;  %v755_v44 = vpack.c.bf16 %v725_v30, %v724_v29  ;;  %v650_v47 = vmul.f32 %v4215_v31, %v554_v26  ;;  %v557_v30 = vsub.f32 %v4946_v17, %v5103_v1 }
 0x112   :  { %v4217_v48 = vpop.eup %4216  ;;  %v526_v8 = vmax.f32 %v494_v37, 0.0  ;;  %v495_v24 = vsub.f32 %v431_v38, %v463_v35  ;;  %v5131_v52 = vmul.f32 0.0078125, %v251_v43 }
 0x113   :  { %904 = vmatmul.mubr.bf16.gmra.mrb[4].mxu0 %v755_v44  ;;  %v253_v0 = vpop.xlane.xlu1 %252  ;;  %v651_v28 = vmul.f32 %v4217_v48, %v555_v40  ;;  %v688_v4 = vmul.f32 %v5090_v55, %v650_v47 }
 0x114   :  { %v590_v51 = vadd.f32 1e-05, %v526_v8  ;;  %v527_v60 = vmax.f32 %v495_v24, 0.0  ;;  %v464_v63 = vmul.f32 %v5131_v52, %v5131_v52  ;;  %913 = vmatprep.mubr.bf16.mxu0 %v7196_v42  ;;  %v5137_v9 = vmul.f32 0.0078125, %v253_v0 }
 0x115   :  { %v347_v33 = vpop.xlane.xlu0 %346  ;;  %v689_v7 = vmul.f32 %v5090_v55, %v651_v28  ;;  %v726_v19 = vadd.f32 %v5101_v22, %v688_v4 }
 0x116   :  { %4222 = vrsqrt.f32 %v590_v51  ;;  %v591_v10 = vadd.f32 1e-05, %v527_v60  ;;  %v432_v13 = vmul.f32 0.0078125, %v347_v33  ;;  %v465_v26 = vmul.f32 %v5137_v9, %v5137_v9 }
 0x117   :  { %v349_v59 = vpop.xlane.xlu1 %348  ;;  %v727_v20 = vadd.f32 %v5101_v22, %v689_v7  ;;  %v558_v51 = vsub.f32 %v4954_v23, %v5114_v56 }
 0x118   :  { %v4219_v36 = vpop.eup %4218  ;;  %4224 = vrsqrt.f32 %v591_v10  ;;  %v496_v27 = vsub.f32 %v432_v13, %v464_v63  ;;  %v433_v29 = vmul.f32 0.0078125, %v349_v59  ;;  %v559_v59 = vsub.f32 %v4956_v25, %v5120_v5 }
 0x119   :  { %v255_v31 = vpop.xlane.xlu0 %254  ;;  %v756_v35 = vpack.c.bf16 %v727_v20, %v726_v19  ;;  %v652_v37 = vmul.f32 %v4219_v36, %v556_v14 }
 0x11a   :  { %v4221_v38 = vpop.eup %4220  ;;  %v528_v16 = vmax.f32 %v496_v27, 0.0  ;;  %v497_v2 = vsub.f32 %v433_v29, %v465_v26  ;;  %v5148_v40 = vmul.f32 0.0078125, %v255_v31 }
 0x11b   :  { %914 = vmatmul.mubr.bf16.gmra.mrb[8].mxu0 %v756_v35  ;;  %v257_v43 = vpop.xlane.xlu1 %256  ;;  %v653_v44 = vmul.f32 %v4221_v38, %v557_v30  ;;  %v690_v47 = vmul.f32 %v5090_v55, %v652_v37 }
 0x11c   :  { %v592_v48 = vadd.f32 1e-05, %v528_v16  ;;  %v529_v8 = vmax.f32 %v497_v2, 0.0  ;;  %v466_v24 = vmul.f32 %v5148_v40, %v5148_v40  ;;  %923 = vmatprep.mubr.bf16.mxu0 %v7196_v42  ;;  %v5154_v17 = vmul.f32 0.0078125, %v257_v43 }
 0x11d   :  { %v351_v1 = vpop.xlane.xlu0 %350  ;;  %v691_v0 = vmul.f32 %v5090_v55, %v653_v44  ;;  %v728_v63 = vadd.f32 %v5101_v22, %v690_v47  ;;  %v560_v44 = vsub.f32 %v4964_v32, %v5131_v52 }
 0x11e   :  { %4226 = vrsqrt.f32 %v592_v48  ;;  %v593_v28 = vadd.f32 1e-05, %v529_v8  ;;  %v434_v4 = vmul.f32 0.0078125, %v351_v1  ;;  %v467_v10 = vmul.f32 %v5154_v17, %v5154_v17 }
 0x11f   :  { %v353_v60 = vpop.xlane.xlu1 %352  ;;  %v729_v33 = vadd.f32 %v5101_v22, %v691_v0 }
 0x120   :  { %v4223_v7 = vpop.eup %4222  ;;  %4228 = vrsqrt.f32 %v593_v28  ;;  %v498_v13 = vsub.f32 %v434_v4, %v466_v24  ;;  %v435_v14 = vmul.f32 0.0078125, %v353_v60  ;;  %v561_v4 = vsub.f32 %v4966_v34, %v5137_v9 }
 0x121   :  { %v259_v19 = vpop.xlane.xlu0 %258  ;;  %v757_v20 = vpack.c.bf16 %v729_v33, %v728_v63  ;;  %v654_v36 = vmul.f32 %v4223_v7, %v558_v51 }
 0x122   :  { %v4225_v26 = vpop.eup %4224  ;;  %v530_v23 = vmax.f32 %v498_v13, 0.0  ;;  %v499_v56 = vsub.f32 %v435_v14, %v467_v10  ;;  %v5165_v27 = vmul.f32 0.0078125, %v259_v19 }
 0x123   :  { %924 = vmatmul.mubr.bf16.gmra.mrb[12].mxu0 %v757_v20  ;;  %v261_v29 = vpop.xlane.xlu1 %260  ;;  %v655_v30 = vmul.f32 %v4225_v26, %v559_v59  ;;  %v692_v31 = vmul.f32 %v5090_v55, %v654_v36 }
 0x124   :  { %v594_v35 = vadd.f32 1e-05, %v530_v23  ;;  %v531_v37 = vmax.f32 %v499_v56, 0.0  ;;  %v468_v38 = vmul.f32 %v5165_v27, %v5165_v27  ;;  %933 = vmatprep.mubr.bf16.mxu0 %v7196_v42  ;;  %v5171_v25 = vmul.f32 0.0078125, %v261_v29 }
 0x125   :  { %v355_v5 = vpop.xlane.xlu0 %354  ;;  %v693_v16 = vmul.f32 %v5090_v55, %v655_v30  ;;  %v730_v48 = vadd.f32 %v5101_v22, %v692_v31  ;;  %v562_v56 = vsub.f32 %v4974_v39, %v5148_v40 }
 0x126   :  { %4230 = vrsqrt.f32 %v594_v35  ;;  %v595_v2 = vadd.f32 1e-05, %v531_v37  ;;  %v436_v43 = vmul.f32 0.0078125, %v355_v5  ;;  %v469_v1 = vmul.f32 %v5171_v25, %v5171_v25 }
 0x127   :  { %v357_v47 = vpop.xlane.xlu1 %356  ;;  %v731_v8 = vadd.f32 %v5101_v22, %v693_v16  ;;  %v563_v16 = vsub.f32 %v4976_v41, %v5154_v17 }
 0x128   :  { %v4227_v24 = vpop.eup %4226  ;;  %4232 = vrsqrt.f32 %v595_v2  ;;  %v500_v0 = vsub.f32 %v436_v43, %v468_v38  ;;  %v437_v28 = vmul.f32 0.0078125, %v357_v47 }
 0x129   :  { %v263_v51 = vpop.xlane.xlu0 %262  ;;  %v758_v60 = vpack.c.bf16 %v731_v8, %v730_v48  ;;  %v656_v63 = vmul.f32 %v4227_v24, %v560_v44 }
 0x12a   :  { %v4229_v33 = vpop.eup %4228  ;;  %v532_v32 = vmax.f32 %v500_v0, 0.0  ;;  %v501_v52 = vsub.f32 %v437_v28, %v469_v1  ;;  %v5182_v7 = vmul.f32 0.0078125, %v263_v51 }
 0x12b   :  { %934 = vmatmul.mubr.bf16.gmra.mrb[16].mxu0 %v758_v60  ;;  %v265_v10 = vpop.xlane.xlu1 %264  ;;  %v657_v13 = vmul.f32 %v4229_v33, %v561_v4  ;;  %v694_v14 = vmul.f32 %v5090_v55, %v656_v63  ;;  %v564_v33 = vsub.f32 %v4985_v45, %v5165_v27 }
 0x12c   :  { %v596_v59 = vadd.f32 1e-05, %v532_v32  ;;  %v533_v19 = vmax.f32 %v501_v52, 0.0  ;;  %v470_v20 = vmul.f32 %v5182_v7, %v5182_v7  ;;  %943 = vmatprep.mubr.bf16.mxu0 %v7196_v42  ;;  %v5188_v34 = vmul.f32 0.0078125, %v265_v10 }
 0x12d   :  { %v359_v9 = vpop.xlane.xlu0 %358  ;;  %v695_v36 = vmul.f32 %v5090_v55, %v657_v13  ;;  %v732_v30 = vadd.f32 %v5101_v22, %v694_v14 }
 0x12e   :  { %4234 = vrsqrt.f32 %v596_v59  ;;  %v597_v26 = vadd.f32 1e-05, %v533_v19  ;;  %v438_v23 = vmul.f32 0.0078125, %v359_v9  ;;  %v471_v37 = vmul.f32 %v5188_v34, %v5188_v34 }
 0x12f   :  { %v361_v29 = vpop.xlane.xlu1 %360  ;;  %v733_v31 = vadd.f32 %v5101_v22, %v695_v36 }
 0x130   :  { %v4231_v35 = vpop.eup %4230  ;;  %4236 = vrsqrt.f32 %v597_v26  ;;  %v502_v38 = vsub.f32 %v438_v23, %v470_v20  ;;  %v439_v5 = vmul.f32 0.0078125, %v361_v29  ;;  %v565_v20 = vsub.f32 %v4987_v46, %v5171_v25 }
 0x131   :  { %v267_v2 = vpop.xlane.xlu0 %266  ;;  %v759_v43 = vpack.c.bf16 %v733_v31, %v732_v30  ;;  %v658_v44 = vmul.f32 %v4231_v35, %v562_v56 }
 0x132   :  { %v4233_v47 = vpop.eup %4232  ;;  %v534_v39 = vmax.f32 %v502_v38, 0.0  ;;  %v503_v40 = vsub.f32 %v439_v5, %v471_v37  ;;  %v5199_v48 = vmul.f32 0.0078125, %v267_v2 }
 0x133   :  { %944 = vmatmul.mubr.bf16.gmra.mrb[20].mxu0 %v759_v43  ;;  %v269_v8 = vpop.xlane.xlu1 %268  ;;  %v659_v24 = vmul.f32 %v4233_v47, %v563_v16  ;;  %v696_v1 = vmul.f32 %v5090_v55, %v658_v44  ;;  %v566_v43 = vsub.f32 %v4995_v49, %v5182_v7 }
 0x134   :  { %v598_v0 = vadd.f32 1e-05, %v534_v39  ;;  %v535_v28 = vmax.f32 %v503_v40, 0.0  ;;  %v472_v4 = vmul.f32 %v5199_v48, %v5199_v48  ;;  %953 = vmatprep.mubr.bf16.mxu0 %v7196_v42  ;;  %v5205_v41 = vmul.f32 0.0078125, %v269_v8 }
 0x135   :  { %v363_v17 = vpop.xlane.xlu0 %362  ;;  %v697_v51 = vmul.f32 %v5090_v55, %v659_v24  ;;  %v734_v52 = vadd.f32 %v5101_v22, %v696_v1 }
 0x136   :  { %4238 = vrsqrt.f32 %v598_v0  ;;  %v599_v60 = vadd.f32 1e-05, %v535_v28  ;;  %v440_v63 = vmul.f32 0.0078125, %v363_v17  ;;  %v473_v14 = vmul.f32 %v5205_v41, %v5205_v41 }
 0x137   :  { %v365_v32 = vpop.xlane.xlu1 %364  ;;  %v735_v10 = vadd.f32 %v5101_v22, %v697_v51  ;;  %v567_v0 = vsub.f32 %v4997_v50, %v5188_v34 }
 0x138   :  { %v4235_v13 = vpop.eup %4234  ;;  %4240 = vrsqrt.f32 %v599_v60  ;;  %v504_v59 = vsub.f32 %v440_v63, %v472_v4  ;;  %v441_v19 = vmul.f32 0.0078125, %v365_v32 }
 0x139   :  { %v271_v9 = vpop.xlane.xlu0 %270  ;;  %v760_v36 = vpack.c.bf16 %v735_v10, %v734_v52  ;;  %v660_v26 = vmul.f32 %v4235_v13, %v564_v33 }
 0x13a   :  { %v4237_v23 = vpop.eup %4236  ;;  %v536_v45 = vmax.f32 %v504_v59, 0.0  ;;  %v505_v27 = vsub.f32 %v441_v19, %v473_v14  ;;  %v5216_v56 = vmul.f32 0.0078125, %v271_v9 }
 0x13b   :  { %954 = vmatmul.mubr.bf16.gmra.mrb[24].mxu0 %v760_v36  ;;  %v273_v29 = vpop.xlane.xlu1 %272  ;;  %v661_v30 = vmul.f32 %v4237_v23, %v565_v20  ;;  %v698_v31 = vmul.f32 %v5090_v55, %v660_v26  ;;  %v568_v20 = vsub.f32 %v5005_v53, %v5199_v48 }
 0x13c   :  { %v600_v35 = vadd.f32 1e-05, %v536_v45  ;;  %v537_v37 = vmax.f32 %v505_v27, 0.0  ;;  %v474_v38 = vmul.f32 %v5216_v56, %v5216_v56  ;;  %963 = vmatprep.mubr.bf16.mxu0 %v7196_v42  ;;  %v5222_v46 = vmul.f32 0.0078125, %v273_v29 }
 0x13d   :  { %v367_v25 = vpop.xlane.xlu0 %366  ;;  %v699_v5 = vmul.f32 %v5090_v55, %v661_v30  ;;  %v736_v47 = vadd.f32 %v5101_v22, %v698_v31  ;;  %v569_v30 = vsub.f32 %v5007_v54, %v5205_v41 }
 0x13e   :  { %4242 = vrsqrt.f32 %v600_v35  ;;  %v601_v16 = vadd.f32 1e-05, %v537_v37  ;;  %v442_v2 = vmul.f32 0.0078125, %v367_v25  ;;  %v475_v8 = vmul.f32 %v5222_v46, %v5222_v46 }
 0x13f   :  { %v369_v44 = vpop.xlane.xlu1 %368  ;;  %v737_v39 = vadd.f32 %v5101_v22, %v699_v5 }
 0x140   :  { %v4239_v40 = vpop.eup %4238  ;;  %4244 = vrsqrt.f32 %v601_v16  ;;  %v506_v24 = vsub.f32 %v442_v2, %v474_v38  ;;  %v443_v1 = vmul.f32 0.0078125, %v369_v44 }
 0x141   :  { %v275_v28 = vpop.xlane.xlu0 %274  ;;  %v761_v4 = vpack.c.bf16 %v737_v39, %v736_v47  ;;  %v662_v17 = vmul.f32 %v4239_v40, %v566_v43 }
 0x142   :  { %v4241_v51 = vpop.eup %4240  ;;  %v538_v49 = vmax.f32 %v506_v24, 0.0  ;;  %v507_v7 = vsub.f32 %v443_v1, %v475_v8  ;;  %v5233_v60 = vmul.f32 0.0078125, %v275_v28  ;;  %v570_v24 = vsub.f32 %v5015_v57, %v5216_v56 }
 0x143   :  { %964 = vmatmul.mubr.bf16.gmra.mrb[28].mxu0 %v761_v4  ;;  %v277_v63 = vpop.xlane.xlu1 %276  ;;  %v663_v33 = vmul.f32 %v4241_v51, %v567_v0  ;;  %v700_v32 = vmul.f32 %v5090_v55, %v662_v17 }
 0x144   :  { %v602_v52 = vadd.f32 1e-05, %v538_v49  ;;  %v539_v10 = vmax.f32 %v507_v7, 0.0  ;;  %v476_v13 = vmul.f32 %v5233_v60, %v5233_v60  ;;  %973 = vmatprep.mubr.bf16.mxu0 %v7196_v42  ;;  %v5239_v50 = vmul.f32 0.0078125, %v277_v63 }
 0x145   :  { %v371_v34 = vpop.xlane.xlu0 %370  ;;  %v701_v14 = vmul.f32 %v5090_v55, %v663_v33  ;;  %v738_v36 = vadd.f32 %v5101_v22, %v700_v32  ;;  %v571_v7 = vsub.f32 %v5017_v58, %v5222_v46 }
 0x146   :  { %4246 = vrsqrt.f32 %v602_v52  ;;  %v603_v59 = vadd.f32 1e-05, %v539_v10  ;;  %v444_v19 = vmul.f32 0.0078125, %v371_v34  ;;  %v477_v45 = vmul.f32 %v5239_v50, %v5239_v50 }
 0x147   :  { %v373_v9 = vpop.xlane.xlu1 %372  ;;  %v739_v26 = vadd.f32 %v5101_v22, %v701_v14 }
 0x148   :  { %v4243_v23 = vpop.eup %4242  ;;  %4248 = vrsqrt.f32 %v603_v59  ;;  %v508_v27 = vsub.f32 %v444_v19, %v476_v13  ;;  %v445_v29 = vmul.f32 0.0078125, %v373_v9 }
 0x149   :  { %v279_v31 = vpop.xlane.xlu0 %278  ;;  %v762_v35 = vpack.c.bf16 %v739_v26, %v738_v36  ;;  %v664_v37 = vmul.f32 %v4243_v23, %v568_v20  ;;  %v572_v23 = vsub.f32 %v5025_v61, %v5233_v60 }
 0x14a   :  { %v4245_v38 = vpop.eup %4244  ;;  %v540_v53 = vmax.f32 %v508_v27, 0.0  ;;  %v509_v48 = vsub.f32 %v445_v29, %v477_v45  ;;  %v5250_v25 = vmul.f32 0.0078125, %v279_v31 }
 0x14b   :  { %974 = vmatmul.mubr.bf16.gmra.mrb[32].mxu0 %v762_v35  ;;  %v281_v5 = vpop.xlane.xlu1 %280  ;;  %v665_v16 = vmul.f32 %v4245_v38, %v569_v30  ;;  %v702_v2 = vmul.f32 %v5090_v55, %v664_v37  ;;  %v573_v38 = vsub.f32 %v5027_v62, %v5239_v50 }
 0x14c   :  { %v604_v43 = vadd.f32 1e-05, %v540_v53  ;;  %v541_v44 = vmax.f32 %v509_v48, 0.0  ;;  %v478_v47 = vmul.f32 %v5250_v25, %v5250_v25  ;;  %983 = vmatprep.mubr.bf16.mxu0 %v7196_v42  ;;  %v5256_v54 = vmul.f32 0.0078125, %v281_v5 }
 0x14d   :  { %v375_v41 = vpop.xlane.xlu0 %374  ;;  %v703_v39 = vmul.f32 %v5090_v55, %v665_v16  ;;  %v740_v0 = vadd.f32 %v5101_v22, %v702_v2 }
 0x14e   :  { %4250 = vrsqrt.f32 %v604_v43  ;;  %v605_v40 = vadd.f32 1e-05, %v541_v44  ;;  %v446_v8 = vmul.f32 0.0078125, %v375_v41  ;;  %v479_v17 = vmul.f32 %v5256_v54, %v5256_v54 }
 0x14f   :  { %v377_v1 = vpop.xlane.xlu1 %376  ;;  %v741_v28 = vadd.f32 %v5101_v22, %v703_v39 }
 0x150   :  { %v4247_v4 = vpop.eup %4246  ;;  %4252 = vrsqrt.f32 %v605_v40  ;;  %v510_v51 = vsub.f32 %v446_v8, %v478_v47  ;;  %v447_v49 = vmul.f32 0.0078125, %v377_v1 }
 0x151   :  { %v283_v63 = vpop.xlane.xlu0 %282  ;;  %v763_v33 = vpack.c.bf16 %v741_v28, %v740_v0  ;;  %v666_v32 = vmul.f32 %v4247_v4, %v570_v24  ;;  %v574_v0 = vsub.f32 %v5035_v3, %v5250_v25 }
 0x152   :  { %v4249_v52 = vpop.eup %4248  ;;  %v542_v57 = vmax.f32 %v510_v51, 0.0  ;;  %v511_v56 = vsub.f32 %v447_v49, %v479_v17  ;;  %v5267_v10 = vmul.f32 0.0078125, %v283_v63 }
 0x153   :  { %984 = vmatmul.mubr.bf16.gmra.mrb[36].mxu0 %v763_v33  ;;  %v285_v13 = vpop.xlane.xlu1 %284  ;;  %v667_v34 = vmul.f32 %v4249_v52, %v571_v7  ;;  %v704_v14 = vmul.f32 %v5090_v55, %v666_v32  ;;  %v575_v33 = vsub.f32 %v5037_v6, %v5256_v54 }
 0x154   :  { %v606_v59 = vadd.f32 1e-05, %v542_v57  ;;  %v543_v19 = vmax.f32 %v511_v56, 0.0  ;;  %v480_v20 = vmul.f32 %v5267_v10, %v5267_v10  ;;  %993 = vmatprep.mubr.bf16.mxu0 %v7196_v42  ;;  %v5273_v58 = vmul.f32 0.0078125, %v285_v13  ;;  %v4150_v56 = vld [vmem:[#allocation7 + $0x40] sm:$0xff]  }
 0x155   :  { %v379_v46 = vpop.xlane.xlu0 %378  ;;  %v705_v9 = vmul.f32 %v5090_v55, %v667_v34  ;;  %v742_v27 = vadd.f32 %v5101_v22, %v704_v14  ;;  %v4151_v14 = vld [vmem:[#allocation7] sm:$0xff]   ;;  %3889 = vmatprep.subr.bf16.mxu1 %v4150_v56 }
 0x156   :  { %4254 = vrsqrt.f32 %v606_v59  ;;  %v607_v36 = vadd.f32 1e-05, %v543_v19  ;;  %v448_v26 = vmul.f32 0.0078125, %v379_v46  ;;  %v481_v31 = vmul.f32 %v5273_v58, %v5273_v58  ;;  %3890 = vmatpush3.bf16.msra.mxu1 %v4151_v14 }
 0x157   :  { %v381_v45 = vpop.xlane.xlu1 %380  ;;  %v743_v29 = vadd.f32 %v5101_v22, %v705_v9 }
 0x158   :  { %v4251_v30 = vpop.eup %4250  ;;  %4256 = vrsqrt.f32 %v607_v36  ;;  %v512_v35 = vsub.f32 %v448_v26, %v480_v20  ;;  %v449_v37 = vmul.f32 0.0078125, %v381_v45 }
 0x159   :  { %v287_v53 = vpop.xlane.xlu0 %286  ;;  %v764_v48 = vpack.c.bf16 %v743_v29, %v742_v27  ;;  %v668_v5 = vmul.f32 %v4251_v30, %v572_v23  ;;  %v4152_v23 = vld [vmem:[#allocation7 + $0x48] sm:$0xff]   ;;  %v576_v30 = vsub.f32 %v5045_v11, %v5267_v10  ;;  %v4154_v11 = vld [vmem:[#allocation7 + $0x50] sm:$0xff]  }
 0x15a   :  { %v4253_v16 = vpop.eup %4252  ;;  %v544_v61 = vmax.f32 %v512_v35, 0.0  ;;  %v513_v60 = vsub.f32 %v449_v37, %v481_v31  ;;  %v5284_v2 = vmul.f32 0.0078125, %v287_v53  ;;  %v4153_v29 = vld [vmem:[#allocation7 + $0x8] sm:$0xff]   ;;  %3891 = vmatprep.subr.bf16.mxu1 %v4152_v23 }
 0x15b   :  { %994 = vmatmul.mubr.bf16.gmra.mrb[40].mxu0 %v764_v48  ;;  %v289_v43 = vpop.xlane.xlu1 %288  ;;  %v669_v44 = vmul.f32 %v4253_v16, %v573_v38  ;;  %v706_v47 = vmul.f32 %v5090_v55, %v668_v5  ;;  %3892 = vmatpush3.bf16.msra.mxu1 %v4153_v29  ;;  %v577_v16 = vsub.f32 %v5047_v12, %v5273_v58  ;;  %v4156_v12 = vld [vmem:[#allocation7 + $0x58] sm:$0xff]  }
 0x15c   :  { %v608_v41 = vadd.f32 1e-05, %v544_v61  ;;  %v545_v39 = vmax.f32 %v513_v60, 0.0  ;;  %v482_v40 = vmul.f32 %v5284_v2, %v5284_v2  ;;  %1003 = vmatprep.mubr.bf16.mxu0 %v7196_v42  ;;  %v5290_v62 = vmul.f32 0.0078125, %v289_v43  ;;  %3893 = vmatprep.subr.bf16.mxu1 %v4154_v11 }
 0x15d   :  { %v383_v50 = vpop.xlane.xlu0 %382  ;;  %v707_v8 = vmul.f32 %v5090_v55, %v669_v44  ;;  %v744_v4 = vadd.f32 %v5101_v22, %v706_v47  ;;  %v4155_v47 = vld [vmem:[#allocation7 + $0x10] sm:$0xff]  }
 0x15e   :  { %4258 = vrsqrt.f32 %v608_v41  ;;  %v609_v24 = vadd.f32 1e-05, %v545_v39  ;;  %v450_v1 = vmul.f32 0.0078125, %v383_v50  ;;  %v483_v49 = vmul.f32 %v5290_v62, %v5290_v62 }
 0x15f   :  { %v385_v28 = vpop.xlane.xlu1 %384  ;;  %v745_v17 = vadd.f32 %v5101_v22, %v707_v8  ;;  %3894 = vmatpush3.bf16.msra.mxu1 %v4155_v47 }
 0x160   :  { %v4255_v51 = vpop.eup %4254  ;;  %4260 = vrsqrt.f32 %v609_v24  ;;  %v514_v7 = vsub.f32 %v450_v1, %v482_v40  ;;  %v451_v63 = vmul.f32 0.0078125, %v385_v28  ;;  %v4157_v24 = vld [vmem:[#allocation7 + $0x18] sm:$0xff]   ;;  %v578_v1 = vsub.f32 %v5055_v15, %v5284_v2  ;;  %3895 = vmatprep.subr.bf16.mxu1 %v4156_v12 }
 0x161   :  { %v291_v32 = vpop.xlane.xlu0 %290  ;;  %v765_v52 = vpack.c.bf16 %v745_v17, %v744_v4  ;;  %v670_v57 = vmul.f32 %v4255_v51, %v574_v0  ;;  %v579_v17 = vsub.f32 %v5057_v18, %v5290_v62 }
 0x162   :  { %v4257_v3 = vpop.eup %4256  ;;  %v546_v25 = vmax.f32 %v514_v7, 0.0  ;;  %v515_v13 = vsub.f32 %v451_v63, %v483_v49  ;;  %v5301_v34 = vmul.f32 0.0078125, %v291_v32  ;;  %v4158_v7 = vld [vmem:[#allocation7 + $0x60] sm:$0xff]  }
 0x163   :  { %1004 = vmatmul.mubr.bf16.gmra.mrb[44].mxu0 %v765_v52  ;;  %v293_v59 = vpop.xlane.xlu1 %292  ;;  %v671_v19 = vmul.f32 %v4257_v3, %v575_v33  ;;  %v708_v20 = vmul.f32 %v5090_v55, %v670_v57  ;;  %3896 = vmatpush3.bf16.msra.mxu1 %v4157_v24  ;;  %v4159_v33 = vld [vmem:[#allocation7 + $0x20] sm:$0xff]   ;;  %v4160_v52 = vld [vmem:[#allocation7 + $0x68] sm:$0xff]  }
 0x164   :  { %v610_v46 = vadd.f32 1e-05, %v546_v25  ;;  %v547_v9 = vmax.f32 %v515_v13, 0.0  ;;  %v484_v6 = vmul.f32 %v5301_v34, %v5301_v34  ;;  %1013 = vmatprep.mubr.bf16.mxu0 %v7196_v42  ;;  %v5307_v54 = vmul.f32 0.0078125, %v293_v59  ;;  %3897 = vmatprep.subr.bf16.mxu1 %v4158_v7  ;;  %v4161_v57 = vld [vmem:[#allocation7 + $0x28] sm:$0xff]   ;;  %v4590_v25 = vld [vmem:[#allocation2 + $0x1f8] sm:$0xff] }
 0x165   :  { %v387_v36 = vpop.xlane.xlu0 %386  ;;  %v709_v26 = vmul.f32 %v5090_v55, %v671_v19  ;;  %v746_v35 = vadd.f32 %v5101_v22, %v708_v20  ;;  %v580_v18 = vsub.f32 %v5065_v21, %v5301_v34  ;;  %v4162_v19 = vld [vmem:[#allocation7 + $0x70] sm:$0xff]   ;;  %v4164_v34 = vld [vmem:[#allocation7 + $0x78] sm:$0xff]  }
 0x166   :  { %4262 = vrsqrt.f32 %v610_v46  ;;  %v611_v45 = vadd.f32 1e-05, %v547_v9  ;;  %v452_v27 = vmul.f32 0.0078125, %v387_v36  ;;  %v485_v53 = vmul.f32 %v5307_v54, %v5307_v54  ;;  %v4163_v46 = vld [vmem:[#allocation7 + $0x30] sm:$0xff]   ;;  %v4165_v36 = vld [vmem:[#allocation7 + $0x38] sm:$0xff]  }
 0x167   :  { %v389_v31 = vpop.xlane.xlu1 %388  ;;  %v747_v37 = vadd.f32 %v5101_v22, %v709_v26  ;;  %3898 = vmatpush3.bf16.msra.mxu1 %v4159_v33  ;;  %v581_v13 = vsub.f32 %v4590_v25, %v5307_v54 }
 0x168   :  { %v4259_v38 = vpop.eup %4258  ;;  %4264 = vrsqrt.f32 %v611_v45  ;;  %v516_v48 = vsub.f32 %v452_v27, %v484_v6  ;;  %v453_v5 = vmul.f32 0.0078125, %v389_v31  ;;  %3899 = vmatprep.subr.bf16.mxu1 %v4160_v52  ;;  %v771_v45 = vlaneseq }
 0x169   :  { %v766_v61 = vpack.c.bf16 %v747_v37, %v746_v35  ;;  %v672_v60 = vmul.f32 %v4259_v38, %v576_v30 }
 0x16a   :  { %v4261_v10 = vpop.eup %4260  ;;  %v548_v43 = vmax.f32 %v516_v48, 0.0  ;;  %v517_v44 = vsub.f32 %v453_v5, %v485_v53  ;;  %v5341_v27 = vshrl.u32 %v771_v45, 7 }
 0x16b   :  { %1014 = vmatmul.mubr.bf16.gmra.mrb[48].mxu0 %v766_v61  ;;  %v673_v41 = vmul.f32 %v4261_v10, %v577_v16  ;;  %v710_v39 = vmul.f32 %v5090_v55, %v672_v60  ;;  %3900 = vmatpush3.bf16.msra.mxu1 %v4161_v57 }
 0x16c   :  { %v612_v40 = vadd.f32 1e-05, %v548_v43  ;;  %v549_v50 = vmax.f32 %v517_v44, 0.0  ;;  %1023 = vmatprep.mubr.bf16.mxu0 %v7196_v42  ;;  %3901 = vmatprep.subr.bf16.mxu1 %v4162_v19  ;;  %v7195_v29 = vsub.s32 0, %v5341_v27  ;;  %v7194_v30 = vsub.s32 1, %v5341_v27 }
 0x16d   :  { %v711_v8 = vmul.f32 %v5090_v55, %v673_v41  ;;  %v748_v0 = vadd.f32 %v5101_v22, %v710_v39 }
 0x16e   :  { %4266 = vrsqrt.f32 %v612_v40  ;;  %v613_v58 = vadd.f32 1e-05, %v549_v50 }
 0x16f   :  { %v749_v28 = vadd.f32 %v5101_v22, %v711_v8  ;;  %3902 = vmatpush3.bf16.msra.mxu1 %v4163_v46 }
 0x170   :  { %v4263_v4 = vpop.eup %4262  ;;  %4268 = vrsqrt.f32 %v613_v58  ;;  %3903 = vmatprep.subr.bf16.mxu1 %v4164_v34 }
 0x171   :  { %v767_v51 = vpack.c.bf16 %v749_v28, %v748_v0  ;;  %v674_v49 = vmul.f32 %v4263_v4, %v578_v1 }
 0x172   :  { %v4265_v63 = vpop.eup %4264 }
 0x173   :  { %1024 = vmatmul.mubr.bf16.gmra.mrb[52].mxu0 %v767_v51  ;;  %v675_v32 = vmul.f32 %v4265_v63, %v579_v17  ;;  %v712_v15 = vmul.f32 %v5090_v55, %v674_v49  ;;  %3904 = vmatpush3.bf16.msra.mxu1 %v4165_v36 }
 0x174   :  { %1033 = vmatprep.mubr.bf16.mxu0 %v7196_v42 }
 0x175   :  { %v713_v2 = vmul.f32 %v5090_v55, %v675_v32  ;;  %v750_v62 = vadd.f32 %v5101_v22, %v712_v15 }
 0x177   :  { %v751_v56 = vadd.f32 %v5101_v22, %v713_v2 }
 0x178   :  { %v4267_v3 = vpop.eup %4266 }
 0x179   :  { %v768_v14 = vpack.c.bf16 %v751_v56, %v750_v62  ;;  %v676_v59 = vmul.f32 %v4267_v3, %v580_v18 }
 0x17a   :  { %v4269_v20 = vpop.eup %4268 }
 0x17b   :  { %1034 = vmatmul.mubr.bf16.gmra.mrb[56].mxu0 %v768_v14  ;;  %v677_v9 = vmul.f32 %v4269_v20, %v581_v13  ;;  %v714_v6 = vmul.f32 %v5090_v55, %v676_v59 }
 0x17c   :  { %1043 = vmatprep.mubr.bf16.mxu0 %v7196_v42 }
 0x17d   :  { %v715_v21 = vmul.f32 %v5090_v55, %v677_v9  ;;  %v752_v26 = vadd.f32 %v5101_v22, %v714_v6  ;;  %v196_v55 = vld [vmem:[%s7184_s4] sm:$0x3] }
 0x17e   :  { %v5354_v31 = vrot.slane %v196_v55, %v7194_v30 }
 0x17f   :  { %v753_v54 = vadd.f32 %v5101_v22, %v715_v21  ;;  %v5350_v22 = vrot.slane %v196_v55, %v7195_v29 }
 0x181   :  { %v769_v23 = vpack.c.bf16 %v753_v54, %v752_v26 }
 0x183   :  { %1044 = vmatmul.mubr.bf16.gmra.mrb[60].mxu0 %v769_v23 }
 0x184   :  { %2672 = vmatprep.mubr.bf16.mxu0 %v7196_v42 }
 0x1de   :  { %v895_v35 = vpop.f32.mrb[0].mxu0 }
 0x1df   :  { %v5357_v37 = vadd.f32 %v895_v35, %v5350_v22  ;;  %v897_v38 = vpop.f32.mrb[1].mxu0 }
 0x1e0   :  { %v5360_v53 = vadd.f32 %v897_v38, %v5354_v31  ;;  %v899_v48 = vpop.f32.mrb[2].mxu0 }
 0x1e1   :  { %v1054_v5 = vmul.f32 %v5357_v37, %v5357_v37  ;;  %v5365_v16 = vadd.f32 %v899_v48, %v5350_v22  ;;  %v901_v61 = vpop.f32.mrb[3].mxu0 }
 0x1e2   :  { %v1055_v60 = vmul.f32 %v5360_v53, %v5360_v53  ;;  %v5370_v11 = vadd.f32 %v901_v61, %v5354_v31 }
 0x1e3   :  { %v1118_v10 = vmul.f32 %v1054_v5, %v5357_v37  ;;  %v1056_v43 = vmul.f32 %v5365_v16, %v5365_v16 }
 0x1e4   :  { %v1119_v44 = vmul.f32 %v1055_v60, %v5360_v53  ;;  %v1057_v47 = vmul.f32 %v5370_v11, %v5370_v11 }
 0x1e5   :  { %v1182_v41 = vmul.f32 0.044715, %v1118_v10  ;;  %v1120_v39 = vmul.f32 %v1056_v43, %v5365_v16 }
 0x1e6   :  { %v1183_v40 = vmul.f32 0.044715, %v1119_v44  ;;  %v1121_v50 = vmul.f32 %v1057_v47, %v5370_v11  ;;  %v905_v8 = vpop.f32.mrb[4].mxu0 }
 0x1e7   :  { %v1246_v12 = vadd.f32 %v1182_v41, %v5357_v37  ;;  %v1184_v58 = vmul.f32 0.044715, %v1120_v39  ;;  %v5382_v24 = vadd.f32 %v905_v8, %v5350_v22  ;;  %v907_v1 = vpop.f32.mrb[5].mxu0 }
 0x1e8   :  { %v1185_v0 = vmul.f32 0.044715, %v1121_v50  ;;  %v5385_v28 = vadd.f32 %v907_v1, %v5354_v31  ;;  %v909_v4 = vpop.f32.mrb[6].mxu0  ;;  %v1247_v17 = vadd.f32 %v1183_v40, %v5360_v53 }
 0x1e9   :  { %v1310_v51 = vmul.f32 0.7978846, %v1246_v12  ;;  %v1248_v49 = vadd.f32 %v1184_v58, %v5365_v16  ;;  %v1058_v7 = vmul.f32 %v5382_v24, %v5382_v24  ;;  %v5392_v63 = vadd.f32 %v909_v4, %v5350_v22  ;;  %v911_v33 = vpop.f32.mrb[7].mxu0 }
 0x1ea   :  { %v1059_v32 = vmul.f32 %v5385_v28, %v5385_v28  ;;  %v5397_v15 = vadd.f32 %v911_v33, %v5354_v31  ;;  %v1249_v2 = vadd.f32 %v1185_v0, %v5370_v11  ;;  %v1311_v52 = vmul.f32 0.7978846, %v1247_v17 }
 0x1eb   :  { %4270 = vtanh.f32 %v1310_v51  ;;  %v1312_v57 = vmul.f32 0.7978846, %v1248_v49  ;;  %v1122_v18 = vmul.f32 %v1058_v7, %v5382_v24  ;;  %v1060_v62 = vmul.f32 %v5392_v63, %v5392_v63 }
 0x1ec   :  { %v1123_v56 = vmul.f32 %v1059_v32, %v5385_v28  ;;  %v1061_v3 = vmul.f32 %v5397_v15, %v5397_v15  ;;  %v1313_v25 = vmul.f32 0.7978846, %v1249_v2  ;;  %4272 = vtanh.f32 %v1311_v52 }
 0x1ed   :  { %4274 = vtanh.f32 %v1312_v57  ;;  %v1186_v13 = vmul.f32 0.044715, %v1122_v18  ;;  %v1124_v14 = vmul.f32 %v1060_v62, %v5392_v63 }
 0x1ee   :  { %v1187_v59 = vmul.f32 0.044715, %v1123_v56  ;;  %v1125_v19 = vmul.f32 %v1061_v3, %v5397_v15  ;;  %v915_v20 = vpop.f32.mrb[8].mxu0  ;;  %4276 = vtanh.f32 %v1313_v25 }
 0x1ef   :  { %v1250_v46 = vadd.f32 %v1186_v13, %v5382_v24  ;;  %v1188_v9 = vmul.f32 0.044715, %v1124_v14  ;;  %v5410_v6 = vadd.f32 %v915_v20, %v5350_v22  ;;  %v917_v21 = vpop.f32.mrb[9].mxu0 }
 0x1f0   :  { %v1251_v34 = vadd.f32 %v1187_v59, %v5385_v28  ;;  %v1189_v36 = vmul.f32 0.044715, %v1125_v19  ;;  %v5414_v26 = vadd.f32 %v917_v21, %v5354_v31  ;;  %v919_v54 = vpop.f32.mrb[10].mxu0 }
 0x1f1   :  { %v1314_v23 = vmul.f32 0.7978846, %v1250_v46  ;;  %v1252_v45 = vadd.f32 %v1188_v9, %v5392_v63  ;;  %v1062_v55 = vmul.f32 %v5410_v6, %v5410_v6  ;;  %v5420_v35 = vadd.f32 %v919_v54, %v5350_v22  ;;  %v921_v38 = vpop.f32.mrb[11].mxu0 }
 0x1f2   :  { %v1315_v48 = vmul.f32 0.7978846, %v1251_v34  ;;  %v1253_v5 = vadd.f32 %v1189_v36, %v5397_v15  ;;  %v1063_v61 = vmul.f32 %v5414_v26, %v5414_v26  ;;  %v5426_v60 = vadd.f32 %v921_v38, %v5354_v31 }
 0x1f3   :  { %4278 = vtanh.f32 %v1314_v23  ;;  %v1316_v10 = vmul.f32 0.7978846, %v1252_v45  ;;  %v1126_v43 = vmul.f32 %v1062_v55, %v5410_v6  ;;  %v1064_v44 = vmul.f32 %v5420_v35, %v5420_v35 }
 0x1f4   :  { %4280 = vtanh.f32 %v1315_v48  ;;  %v1317_v47 = vmul.f32 0.7978846, %v1253_v5  ;;  %v1127_v41 = vmul.f32 %v1063_v61, %v5414_v26  ;;  %v1065_v39 = vmul.f32 %v5426_v60, %v5426_v60 }
 0x1f5   :  { %v4271_v40 = vpop.eup %4270  ;;  %4282 = vtanh.f32 %v1316_v10  ;;  %v1190_v50 = vmul.f32 0.044715, %v1126_v43  ;;  %v1128_v8 = vmul.f32 %v1064_v44, %v5420_v35 }
 0x1f6   :  { %v4273_v12 = vpop.eup %4272  ;;  %4284 = vtanh.f32 %v1317_v47  ;;  %v1191_v58 = vmul.f32 0.044715, %v1127_v41  ;;  %v1129_v1 = vmul.f32 %v1065_v39, %v5426_v60  ;;  %v925_v0 = vpop.f32.mrb[12].mxu0  ;;  %v5436_v4 = vadd.f32 1.0, %v4271_v40 }
 0x1f7   :  { %v4275_v17 = vpop.eup %4274  ;;  %v1254_v51 = vadd.f32 %v1190_v50, %v5410_v6  ;;  %v1192_v49 = vmul.f32 0.044715, %v1128_v8  ;;  %v5440_v7 = vadd.f32 %v925_v0, %v5350_v22  ;;  %v927_v33 = vpop.f32.mrb[13].mxu0  ;;  %v1439_v32 = vadd.f32 1.0, %v4273_v12 }
 0x1f8   :  { %v1255_v2 = vadd.f32 %v1191_v58, %v5414_v26  ;;  %v1193_v52 = vmul.f32 0.044715, %v1129_v1  ;;  %v5444_v57 = vadd.f32 %v927_v33, %v5354_v31  ;;  %v929_v18 = vpop.f32.mrb[14].mxu0  ;;  %v5446_v62 = vadd.f32 1.0, %v4275_v17  ;;  %v4277_v59 = vpop.eup %4276 }
 0x1f9   :  { %v1318_v56 = vmul.f32 0.7978846, %v1254_v51  ;;  %v1256_v3 = vadd.f32 %v1192_v49, %v5420_v35  ;;  %v1066_v25 = vmul.f32 %v5440_v7, %v5440_v7  ;;  %v5452_v13 = vadd.f32 %v929_v18, %v5350_v22  ;;  %v931_v14 = vpop.f32.mrb[15].mxu0 }
 0x1fa   :  { %v1319_v19 = vmul.f32 0.7978846, %v1255_v2  ;;  %v1257_v20 = vadd.f32 %v1193_v52, %v5426_v60  ;;  %v1067_v46 = vmul.f32 %v5444_v57, %v5444_v57  ;;  %v5458_v9 = vadd.f32 %v931_v14, %v5354_v31 }
 0x1fb   :  { %4286 = vtanh.f32 %v1318_v56  ;;  %v1320_v21 = vmul.f32 0.7978846, %v1256_v3  ;;  %v1130_v34 = vmul.f32 %v1066_v25, %v5440_v7  ;;  %v1068_v36 = vmul.f32 %v5452_v13, %v5452_v13 }
 0x1fc   :  { %4288 = vtanh.f32 %v1319_v19  ;;  %v1321_v54 = vmul.f32 0.7978846, %v1257_v20  ;;  %v1131_v23 = vmul.f32 %v1067_v46, %v5444_v57  ;;  %v1069_v45 = vmul.f32 %v5458_v9, %v5458_v9 }
 0x1fd   :  { %v5466_v55 = vpop.eup %4278  ;;  %4290 = vtanh.f32 %v1320_v21  ;;  %v1194_v38 = vmul.f32 0.044715, %v1130_v34  ;;  %v1132_v48 = vmul.f32 %v1068_v36, %v5452_v13  ;;  %v1441_v5 = vadd.f32 1.0, %v4277_v59 }
 0x1fe   :  { %v5469_v61 = vpop.eup %4280  ;;  %4292 = vtanh.f32 %v1321_v54  ;;  %v1195_v10 = vmul.f32 0.044715, %v1131_v23  ;;  %v1133_v43 = vmul.f32 %v1069_v45, %v5458_v9  ;;  %v935_v44 = vpop.f32.mrb[16].mxu0  ;;  %v1503_v47 = vmul.f32 0.5, %v1439_v32 }
 0x1ff   :  { %v5472_v41 = vpop.eup %4282  ;;  %v1258_v39 = vadd.f32 %v1194_v38, %v5440_v7  ;;  %v1196_v40 = vmul.f32 0.044715, %v1132_v48  ;;  %v5476_v50 = vadd.f32 %v935_v44, %v5350_v22  ;;  %v937_v8 = vpop.f32.mrb[17].mxu0  ;;  %v1505_v12 = vmul.f32 0.5, %v1441_v5 }
 0x200   :  { %v5478_v58 = vpop.eup %4284  ;;  %v1259_v1 = vadd.f32 %v1195_v10, %v5444_v57  ;;  %v1197_v0 = vmul.f32 0.044715, %v1133_v43  ;;  %v5482_v17 = vadd.f32 %v937_v8, %v5354_v31  ;;  %v939_v51 = vpop.f32.mrb[18].mxu0  ;;  %v1567_v49 = vmul.f32 %v1503_v47, %v5360_v53 }
 0x201   :  { %v1322_v33 = vmul.f32 0.7978846, %v1258_v39  ;;  %v1260_v32 = vadd.f32 %v1196_v40, %v5452_v13  ;;  %v1070_v2 = vmul.f32 %v5476_v50, %v5476_v50  ;;  %v5489_v52 = vadd.f32 %v939_v51, %v5350_v22  ;;  %v941_v18 = vpop.f32.mrb[19].mxu0 }
 0x202   :  { %v1323_v56 = vmul.f32 0.7978846, %v1259_v1  ;;  %v1261_v3 = vadd.f32 %v1197_v0, %v5458_v9  ;;  %v1071_v25 = vmul.f32 %v5482_v17, %v5482_v17  ;;  %v5495_v14 = vadd.f32 %v941_v18, %v5354_v31 }
 0x203   :  { %4294 = vtanh.f32 %v1322_v33  ;;  %v1324_v53 = vmul.f32 0.7978846, %v1260_v32  ;;  %v1134_v59 = vmul.f32 %v1070_v2, %v5476_v50  ;;  %v1072_v19 = vmul.f32 %v5489_v52, %v5489_v52 }
 0x204   :  { %4296 = vtanh.f32 %v1323_v56  ;;  %v1325_v20 = vmul.f32 0.7978846, %v1261_v3  ;;  %v1135_v46 = vmul.f32 %v1071_v25, %v5482_v17  ;;  %v1073_v21 = vmul.f32 %v5495_v14, %v5495_v14 }
 0x205   :  { %v5503_v34 = vpop.eup %4286  ;;  %4298 = vtanh.f32 %v1324_v53  ;;  %v1198_v36 = vmul.f32 0.044715, %v1134_v59  ;;  %v1136_v54 = vmul.f32 %v1072_v19, %v5489_v52  ;;  %v1569_v23 = vmul.f32 %v1505_v12, %v5370_v11 }
 0x206   :  { %v5507_v45 = vpop.eup %4288  ;;  %4300 = vtanh.f32 %v1325_v20  ;;  %v1199_v38 = vmul.f32 0.044715, %v1135_v46  ;;  %v1137_v48 = vmul.f32 %v1073_v21, %v5495_v14  ;;  %v1502_v5 = vmul.f32 0.5, %v5436_v4  ;;  %v945_v10 = vpop.f32.mrb[20].mxu0 }
 0x207   :  { %v5511_v43 = vpop.eup %4290  ;;  %v1262_v44 = vadd.f32 %v1198_v36, %v5476_v50  ;;  %v1200_v47 = vmul.f32 0.044715, %v1136_v54  ;;  %v1631_v39 = vpack.c.bf16 %v1569_v23, %v1567_v49  ;;  %v1504_v40 = vmul.f32 0.5, %v5446_v62  ;;  %v947_v8 = vpop.f32.mrb[21].mxu0 }
 0x208   :  { %v5515_v1 = vpop.eup %4292  ;;  %v1263_v11 = vadd.f32 %v1199_v38, %v5482_v17  ;;  %v1201_v12 = vmul.f32 0.044715, %v1137_v48  ;;  %v1566_v0 = vmul.f32 %v1502_v5, %v5357_v37  ;;  %v5520_v51 = vadd.f32 %v945_v10, %v5350_v22  ;;  %v949_v4 = vpop.f32.mrb[22].mxu0 }
 0x209   :  { %v1326_v33 = vmul.f32 0.7978846, %v1262_v44  ;;  %v1264_v32 = vadd.f32 %v1200_v47, %v5489_v52  ;;  %1796 = vmatprep.mubr.bf16.mxu1 %v1631_v39  ;;  %v1568_v49 = vmul.f32 %v1504_v40, %v5365_v16  ;;  %v5525_v62 = vadd.f32 %v947_v8, %v5354_v31  ;;  %v951_v2 = vpop.f32.mrb[23].mxu0 }
 0x20a   :  { %v1327_v18 = vmul.f32 0.7978846, %v1263_v11  ;;  %v1265_v56 = vadd.f32 %v1201_v12, %v5495_v14  ;;  %v1074_v37 = vmul.f32 %v5520_v51, %v5520_v51  ;;  %v5531_v3 = vadd.f32 %v949_v4, %v5350_v22 }
 0x20b   :  { %4302 = vtanh.f32 %v1326_v33  ;;  %v1328_v25 = vmul.f32 0.7978846, %v1264_v32  ;;  %v1630_v53 = vpack.c.bf16 %v1568_v49, %v1566_v0  ;;  %v1075_v59 = vmul.f32 %v5525_v62, %v5525_v62 }
 0x20c   :  { %4304 = vtanh.f32 %v1327_v18  ;;  %v1329_v16 = vmul.f32 0.7978846, %v1265_v56  ;;  %v1138_v19 = vmul.f32 %v1074_v37, %v5520_v51  ;;  %v1076_v20 = vmul.f32 %v5531_v3, %v5531_v3 }
 0x20d   :  { %v5538_v46 = vpop.eup %4294  ;;  %4306 = vtanh.f32 %v1328_v25  ;;  %1797 = vmatmul.mubr.bf16.vlgmr.msra.gmra.mrb[0].mxu1 %v1630_v53  ;;  %v1139_v21 = vmul.f32 %v1075_v59, %v5525_v62  ;;  %v5542_v36 = vadd.f32 %v951_v2, %v5354_v31  ;;  %v1443_v54 = vadd.f32 1.0, %v5469_v61 }
 0x20e   :  { %v5545_v23 = vpop.eup %4296  ;;  %4308 = vtanh.f32 %v1329_v16  ;;  %v1202_v38 = vmul.f32 0.044715, %v1138_v19  ;;  %v1140_v48 = vmul.f32 %v1076_v20, %v5531_v3  ;;  %v1445_v5 = vadd.f32 1.0, %v5478_v58  ;;  %v955_v10 = vpop.f32.mrb[24].mxu0 }
 0x20f   :  { %v5549_v44 = vpop.eup %4298  ;;  %v1203_v47 = vmul.f32 0.044715, %v1139_v21  ;;  %v1077_v39 = vmul.f32 %v5542_v36, %v5542_v36  ;;  %v1507_v40 = vmul.f32 0.5, %v1443_v54  ;;  %v1442_v8 = vadd.f32 1.0, %v5466_v55  ;;  %v957_v11 = vpop.f32.mrb[25].mxu0 }
 0x210   :  { %v5554_v61 = vpop.eup %4300  ;;  %v1266_v12 = vadd.f32 %v1202_v38, %v5520_v51  ;;  %v1204_v0 = vmul.f32 0.044715, %v1140_v48  ;;  %v1509_v4 = vmul.f32 0.5, %v1445_v5  ;;  %v1444_v33 = vadd.f32 1.0, %v5472_v41  ;;  %v959_v58 = vpop.f32.mrb[26].mxu0 }
 0x211   :  { %v1267_v32 = vadd.f32 %v1203_v47, %v5525_v62  ;;  %v1141_v49 = vmul.f32 %v1077_v39, %v5542_v36  ;;  %v1571_v2 = vmul.f32 %v1507_v40, %v5385_v28  ;;  %v1506_v18 = vmul.f32 0.5, %v1442_v8  ;;  %v961_v56 = vpop.f32.mrb[27].mxu0 }
 0x212   :  { %v1330_v37 = vmul.f32 0.7978846, %v1266_v12  ;;  %v1268_v55 = vadd.f32 %v1204_v0, %v5531_v3  ;;  %v1573_v25 = vmul.f32 %v1509_v4, %v5397_v15  ;;  %v1508_v53 = vmul.f32 0.5, %v1444_v33 }
 0x213   :  { %v1331_v59 = vmul.f32 0.7978846, %v1267_v32  ;;  %v1205_v16 = vmul.f32 0.044715, %v1141_v49  ;;  %v1570_v19 = vmul.f32 %v1506_v18, %v5382_v24  ;;  %v5565_v41 = vadd.f32 %v955_v10, %v5350_v22 }
 0x214   :  { %4310 = vtanh.f32 %v1330_v37  ;;  %v1332_v20 = vmul.f32 0.7978846, %v1268_v55  ;;  %v1633_v21 = vpack.c.bf16 %v1573_v25, %v1571_v2  ;;  %v1572_v28 = vmul.f32 %v1508_v53, %v5392_v63 }
 0x215   :  { %v5568_v54 = vpop.eup %4302  ;;  %4312 = vtanh.f32 %v1331_v59  ;;  %v1269_v38 = vadd.f32 %v1205_v16, %v5542_v36  ;;  %v1078_v15 = vmul.f32 %v5565_v41, %v5565_v41  ;;  %v5574_v48 = vadd.f32 %v957_v11, %v5354_v31 }
 0x216   :  { %v5576_v24 = vpop.eup %4304  ;;  %4314 = vtanh.f32 %v1332_v20  ;;  %1804 = vmatprep.mubr.bf16.mxu1 %v1633_v21  ;;  %v1632_v5 = vpack.c.bf16 %v1572_v28, %v1570_v19  ;;  %v5579_v10 = vadd.f32 %v959_v58, %v5350_v22  ;;  %v5582_v63 = vadd.f32 %v961_v56, %v5354_v31  ;;  %v965_v47 = vpop.f32.mrb[28].mxu0 }
 0x217   :  { %v5584_v39 = vpop.eup %4306  ;;  %v1333_v40 = vmul.f32 0.7978846, %v1269_v38  ;;  %v1142_v8 = vmul.f32 %v1078_v15, %v5565_v41  ;;  %v1079_v11 = vmul.f32 %v5574_v48, %v5574_v48  ;;  %v1447_v12 = vadd.f32 1.0, %v5507_v45  ;;  %v967_v0 = vpop.f32.mrb[29].mxu0 }
 0x218   :  { %v5590_v4 = vpop.eup %4308  ;;  %1805 = vmatmul.mubr.bf16.gmra.mrb[4].mxu1 %v1632_v5  ;;  %v1080_v33 = vmul.f32 %v5579_v10, %v5579_v10  ;;  %v1081_v58 = vmul.f32 %v5582_v63, %v5582_v63  ;;  %v1449_v32 = vadd.f32 1.0, %v5515_v1  ;;  %v1446_v49 = vadd.f32 1.0, %v5503_v34  ;;  %v969_v2 = vpop.f32.mrb[30].mxu0 }
 0x219   :  { %4316 = vtanh.f32 %v1333_v40  ;;  %v1206_v18 = vmul.f32 0.044715, %v1142_v8  ;;  %v1143_v56 = vmul.f32 %v1079_v11, %v5574_v48  ;;  %v1511_v45 = vmul.f32 0.5, %v1447_v12  ;;  %v971_v37 = vpop.f32.mrb[31].mxu0 }
 0x21a   :  { %v1144_v55 = vmul.f32 %v1080_v33, %v5579_v10  ;;  %v1145_v25 = vmul.f32 %v1081_v58, %v5582_v63  ;;  %v1513_v53 = vmul.f32 0.5, %v1449_v32  ;;  %v1448_v59 = vadd.f32 1.0, %v5511_v43 }
 0x21b   :  { %v1270_v16 = vadd.f32 %v1206_v18, %v5565_v41  ;;  %v1207_v19 = vmul.f32 0.044715, %v1143_v56  ;;  %v1575_v1 = vmul.f32 %v1511_v45, %v5414_v26  ;;  %v1510_v34 = vmul.f32 0.5, %v1446_v49 }
 0x21c   :  { %v1208_v20 = vmul.f32 0.044715, %v1144_v55  ;;  %v1209_v21 = vmul.f32 0.044715, %v1145_v25  ;;  %v1577_v28 = vmul.f32 %v1513_v53, %v5426_v60  ;;  %v1512_v38 = vmul.f32 0.5, %v1448_v59 }
 0x21d   :  { %v1334_v15 = vmul.f32 0.7978846, %v1270_v16  ;;  %v1271_v5 = vadd.f32 %v1207_v19, %v5574_v48  ;;  %v1574_v40 = vmul.f32 %v1510_v34, %v5410_v6  ;;  %v5608_v8 = vadd.f32 %v965_v47, %v5350_v22 }
 0x21e   :  { %v5610_v43 = vpop.eup %4310  ;;  %v1272_v11 = vadd.f32 %v1208_v20, %v5579_v10  ;;  %v1273_v26 = vadd.f32 %v1209_v21, %v5582_v63  ;;  %v1635_v12 = vpack.c.bf16 %v1577_v28, %v1575_v1  ;;  %v1576_v33 = vmul.f32 %v1512_v38, %v5420_v35  ;;  %v975_v58 = vpop.f32.mrb[32].mxu0 }
 0x21f   :  { %v5615_v60 = vpop.eup %4312  ;;  %4318 = vtanh.f32 %v1334_v15  ;;  %v1335_v32 = vmul.f32 0.7978846, %v1271_v5  ;;  %v1082_v6 = vmul.f32 %v5608_v8, %v5608_v8  ;;  %v5620_v47 = vadd.f32 %v967_v0, %v5354_v31  ;;  %v977_v49 = vpop.f32.mrb[33].mxu0 }
 0x220   :  { %v5622_v18 = vpop.eup %4314  ;;  %v1336_v56 = vmul.f32 0.7978846, %v1272_v11  ;;  %v1337_v45 = vmul.f32 0.7978846, %v1273_v26  ;;  %1812 = vmatprep.mubr.bf16.mxu1 %v1635_v12  ;;  %v1634_v55 = vpack.c.bf16 %v1576_v33, %v1574_v40  ;;  %v5625_v35 = vadd.f32 %v969_v2, %v5350_v22  ;;  %v979_v25 = vpop.f32.mrb[34].mxu0 }
 0x221   :  { %4320 = vtanh.f32 %v1335_v32  ;;  %v1146_v53 = vmul.f32 %v1082_v6, %v5608_v8  ;;  %v1083_v59 = vmul.f32 %v5620_v47, %v5620_v47  ;;  %v5631_v0 = vadd.f32 %v971_v37, %v5354_v31  ;;  %v981_v16 = vpop.f32.mrb[35].mxu0 }
 0x222   :  { %4322 = vtanh.f32 %v1336_v56  ;;  %1813 = vmatmul.mubr.bf16.gmra.mrb[8].mxu1 %v1634_v55  ;;  %v1084_v19 = vmul.f32 %v5625_v35, %v5625_v35  ;;  %v1451_v1 = vadd.f32 1.0, %v5545_v23  ;;  %v1453_v2 = vadd.f32 1.0, %v5554_v61 }
 0x223   :  { %v5637_v34 = vpop.eup %4316  ;;  %4324 = vtanh.f32 %v1337_v45  ;;  %v1210_v20 = vmul.f32 0.044715, %v1146_v53  ;;  %v1147_v21 = vmul.f32 %v1083_v59, %v5620_v47  ;;  %v1085_v37 = vmul.f32 %v5631_v0, %v5631_v0 }
 0x224   :  { %v1148_v28 = vmul.f32 %v1084_v19, %v5625_v35  ;;  %v1515_v38 = vmul.f32 0.5, %v1451_v1  ;;  %v1517_v15 = vmul.f32 0.5, %v1453_v2  ;;  %v1450_v5 = vadd.f32 1.0, %v5538_v46 }
 0x225   :  { %v1274_v40 = vadd.f32 %v1210_v20, %v5608_v8  ;;  %v1211_v23 = vmul.f32 0.044715, %v1147_v21  ;;  %v1149_v61 = vmul.f32 %v1085_v37, %v5631_v0  ;;  %v1452_v11 = vadd.f32 1.0, %v5549_v44 }
 0x226   :  { %v1212_v26 = vmul.f32 0.044715, %v1148_v28  ;;  %v1579_v12 = vmul.f32 %v1515_v38, %v5444_v57  ;;  %v1581_v33 = vmul.f32 %v1517_v15, %v5458_v9  ;;  %v1514_v32 = vmul.f32 0.5, %v1450_v5  ;;  %v5649_v6 = vpop.f32.mrb[36].mxu0 }
 0x227   :  { %v1338_v56 = vmul.f32 0.7978846, %v1274_v40  ;;  %v1275_v45 = vadd.f32 %v1211_v23, %v5620_v47  ;;  %v1213_v55 = vmul.f32 0.044715, %v1149_v61  ;;  %v1516_v46 = vmul.f32 0.5, %v1452_v11  ;;  %v5652_v53 = vpop.f32.mrb[37].mxu0 }
 0x228   :  { %v1276_v59 = vadd.f32 %v1212_v26, %v5625_v35  ;;  %v1637_v19 = vpack.c.bf16 %v1581_v33, %v1579_v12  ;;  %v1578_v44 = vmul.f32 %v1514_v32, %v5440_v7  ;;  %v5657_v1 = vadd.f32 %v975_v58, %v5350_v22  ;;  %v5659_v57 = vpop.f32.mrb[38].mxu0 }
 0x229   :  { %v5661_v9 = vpop.eup %4318  ;;  %4326 = vtanh.f32 %v1338_v56  ;;  %v1339_v2 = vmul.f32 0.7978846, %v1275_v45  ;;  %v1277_v20 = vadd.f32 %v1213_v55, %v5631_v0  ;;  %v1580_v21 = vmul.f32 %v1516_v46, %v5452_v13  ;;  %v5665_v37 = vpop.f32.mrb[39].mxu0 }
 0x22a   :  { %v1340_v28 = vmul.f32 0.7978846, %v1276_v59  ;;  %1820 = vmatprep.mubr.bf16.mxu1 %v1637_v19  ;;  %v1086_v7 = vmul.f32 %v5657_v1, %v5657_v1  ;;  %v5670_v58 = vadd.f32 %v977_v49, %v5354_v31  ;;  %v5673_v38 = vadd.f32 %v979_v25, %v5350_v22 }
 0x22b   :  { %v5675_v15 = vpop.eup %4320  ;;  %4328 = vtanh.f32 %v1339_v2  ;;  %v1341_v5 = vmul.f32 0.7978846, %v1277_v20  ;;  %v1636_v40 = vpack.c.bf16 %v1580_v21, %v1578_v44  ;;  %v5678_v13 = vadd.f32 %v981_v16, %v5354_v31 }
 0x22c   :  { %v5680_v23 = vpop.eup %4322  ;;  %4330 = vtanh.f32 %v1340_v28  ;;  %v1150_v61 = vmul.f32 %v1086_v7, %v5657_v1  ;;  %v1087_v49 = vmul.f32 %v5670_v58, %v5670_v58  ;;  %v1088_v25 = vmul.f32 %v5673_v38, %v5673_v38 }
 0x22d   :  { %v5687_v11 = vpop.eup %4324  ;;  %4332 = vtanh.f32 %v1341_v5  ;;  %1821 = vmatmul.mubr.bf16.gmra.mrb[12].mxu1 %v1636_v40  ;;  %v1089_v26 = vmul.f32 %v5678_v13, %v5678_v13  ;;  %v1455_v16 = vadd.f32 1.0, %v5576_v24  ;;  %v1457_v12 = vadd.f32 1.0, %v5590_v4 }
 0x22e   :  { %v1214_v33 = vmul.f32 0.044715, %v1150_v61  ;;  %v1151_v32 = vmul.f32 %v1087_v49, %v5670_v58  ;;  %v1152_v56 = vmul.f32 %v1088_v25, %v5673_v38  ;;  %v1454_v45 = vadd.f32 1.0, %v5568_v54  ;;  %v5696_v55 = vpop.f32.mrb[40].mxu0 }
 0x22f   :  { %v1153_v46 = vmul.f32 %v1089_v26, %v5678_v13  ;;  %v1519_v59 = vmul.f32 0.5, %v1455_v16  ;;  %v1521_v19 = vmul.f32 0.5, %v1457_v12  ;;  %v1456_v44 = vadd.f32 1.0, %v5584_v39  ;;  %v5700_v2 = vpop.f32.mrb[41].mxu0 }
 0x230   :  { %v1278_v24 = vadd.f32 %v1214_v33, %v5657_v1  ;;  %v1215_v4 = vmul.f32 0.044715, %v1151_v32  ;;  %v1216_v20 = vmul.f32 0.044715, %v1152_v56  ;;  %v1518_v21 = vmul.f32 0.5, %v1454_v45  ;;  %v5703_v28 = vpop.f32.mrb[42].mxu0 }
 0x231   :  { %v1217_v7 = vmul.f32 0.044715, %v1153_v46  ;;  %v1583_v54 = vmul.f32 %v1519_v59, %v5482_v17  ;;  %v1585_v5 = vmul.f32 %v1521_v19, %v5495_v14  ;;  %v1520_v40 = vmul.f32 0.5, %v1456_v44  ;;  %v5707_v61 = vpop.f32.mrb[43].mxu0 }
 0x232   :  { %v1342_v49 = vmul.f32 0.7978846, %v1278_v24  ;;  %v1279_v39 = vadd.f32 %v1215_v4, %v5670_v58  ;;  %v1280_v25 = vadd.f32 %v1216_v20, %v5673_v38  ;;  %v1582_v26 = vmul.f32 %v1518_v21, %v5476_v50 }
 0x233   :  { %v5712_v16 = vpop.eup %4326  ;;  %v1281_v12 = vadd.f32 %v1217_v7, %v5678_v13  ;;  %v1639_v33 = vpack.c.bf16 %v1585_v5, %v1583_v54  ;;  %v1584_v32 = vmul.f32 %v1520_v40, %v5489_v52  ;;  %v5718_v17 = vadd.f32 %v5649_v6, %v5350_v22 }
 0x234   :  { %4334 = vtanh.f32 %v1342_v49  ;;  %v1343_v14 = vmul.f32 0.7978846, %v1279_v39  ;;  %v1344_v56 = vmul.f32 0.7978846, %v1280_v25  ;;  %v5722_v45 = vadd.f32 %v5652_v53, %v5354_v31 }
 0x235   :  { %v5724_v46 = vpop.eup %4328  ;;  %v1345_v50 = vmul.f32 0.7978846, %v1281_v12  ;;  %1828 = vmatprep.mubr.bf16.mxu1 %v1639_v33  ;;  %v1638_v59 = vpack.c.bf16 %v1584_v32, %v1582_v26  ;;  %v1090_v19 = vmul.f32 %v5718_v17, %v5718_v17  ;;  %v5730_v52 = vadd.f32 %v5659_v57, %v5350_v22 }
 0x236   :  { %v5732_v6 = vpop.eup %4330  ;;  %4336 = vtanh.f32 %v1343_v14  ;;  %v1091_v44 = vmul.f32 %v5722_v45, %v5722_v45  ;;  %v5738_v53 = vadd.f32 %v5665_v37, %v5354_v31  ;;  %v1459_v24 = vadd.f32 1.0, %v5615_v60  ;;  %v5741_v4 = vpop.f32.mrb[44].mxu0 }
 0x237   :  { %v5743_v20 = vpop.eup %4332  ;;  %4338 = vtanh.f32 %v1344_v56  ;;  %1829 = vmatmul.mubr.bf16.gmra.mrb[16].mxu1 %v1638_v59  ;;  %v1154_v57 = vmul.f32 %v1090_v19, %v5718_v17  ;;  %v1092_v21 = vmul.f32 %v5730_v52, %v5730_v52  ;;  %v1461_v7 = vadd.f32 1.0, %v5637_v34  ;;  %v5749_v54 = vpop.f32.mrb[45].mxu0 }
 0x238   :  { %4340 = vtanh.f32 %v1345_v50  ;;  %v1155_v37 = vmul.f32 %v1091_v44, %v5722_v45  ;;  %v1093_v60 = vmul.f32 %v5738_v53, %v5738_v53  ;;  %v1523_v5 = vmul.f32 0.5, %v1459_v24  ;;  %v5754_v40 = vpop.f32.mrb[46].mxu0 }
 0x239   :  { %v1218_v49 = vmul.f32 0.044715, %v1154_v57  ;;  %v1156_v39 = vmul.f32 %v1092_v21, %v5730_v52  ;;  %v1525_v25 = vmul.f32 0.5, %v1461_v7  ;;  %v1458_v26 = vadd.f32 1.0, %v5610_v43  ;;  %v5758_v12 = vpop.f32.mrb[47].mxu0 }
 0x23a   :  { %v1219_v34 = vmul.f32 0.044715, %v1155_v37  ;;  %v1157_v33 = vmul.f32 %v1093_v60, %v5738_v53  ;;  %v1587_v32 = vmul.f32 %v1523_v5, %v5525_v62  ;;  %v1460_v14 = vadd.f32 1.0, %v5622_v18 }
 0x23b   :  { %v1282_v56 = vadd.f32 %v1218_v49, %v5718_v17  ;;  %v1220_v50 = vmul.f32 0.044715, %v1156_v39  ;;  %v1589_v59 = vmul.f32 %v1525_v25, %v5542_v36  ;;  %v1522_v19 = vmul.f32 0.5, %v1458_v26 }
 0x23c   :  { %v1283_v44 = vadd.f32 %v1219_v34, %v5722_v45  ;;  %v1221_v24 = vmul.f32 0.044715, %v1157_v33  ;;  %v1524_v57 = vmul.f32 0.5, %v1460_v14  ;;  %v5768_v43 = vadd.f32 %v5696_v55, %v5350_v22 }
 0x23d   :  { %v1346_v21 = vmul.f32 0.7978846, %v1282_v56  ;;  %v1284_v7 = vadd.f32 %v1220_v50, %v5730_v52  ;;  %v1641_v62 = vpack.c.bf16 %v1589_v59, %v1587_v32  ;;  %v1586_v18 = vmul.f32 %v1522_v19, %v5520_v51 }
 0x23e   :  { %v5772_v37 = vpop.eup %4334  ;;  %v1347_v60 = vmul.f32 0.7978846, %v1283_v44  ;;  %v1285_v36 = vadd.f32 %v1221_v24, %v5738_v53  ;;  %v1588_v5 = vmul.f32 %v1524_v57, %v5531_v3  ;;  %v1094_v49 = vmul.f32 %v5768_v43, %v5768_v43  ;;  %v5778_v39 = vpop.f32.mrb[48].mxu0 }
 0x23f   :  { %4342 = vtanh.f32 %v1346_v21  ;;  %v1348_v55 = vmul.f32 0.7978846, %v1284_v7  ;;  %1836 = vmatprep.mubr.bf16.mxu1 %v1641_v62  ;;  %v5782_v25 = vadd.f32 %v5700_v2, %v5354_v31  ;;  %v5786_v51 = vadd.f32 %v5703_v28, %v5350_v22  ;;  %v5788_v26 = vpop.f32.mrb[49].mxu0 }
 0x240   :  { %v5790_v34 = vpop.eup %4336  ;;  %4344 = vtanh.f32 %v1347_v60  ;;  %v1349_v3 = vmul.f32 0.7978846, %v1285_v36  ;;  %v1640_v33 = vpack.c.bf16 %v1588_v5, %v1586_v18  ;;  %v1158_v32 = vmul.f32 %v1094_v49, %v5768_v43  ;;  %v5793_v14 = vpop.f32.mrb[50].mxu0 }
 0x241   :  { %v5795_v56 = vpop.eup %4338  ;;  %4346 = vtanh.f32 %v1348_v55  ;;  %v1095_v2 = vmul.f32 %v5782_v25, %v5782_v25  ;;  %v1096_v28 = vmul.f32 %v5786_v51, %v5786_v51  ;;  %v5803_v50 = vadd.f32 %v5707_v61, %v5354_v31  ;;  %v5805_v59 = vpop.f32.mrb[51].mxu0 }
 0x242   :  { %v5807_v19 = vpop.eup %4340  ;;  %4348 = vtanh.f32 %v1349_v3  ;;  %1837 = vmatmul.mubr.bf16.gmra.mrb[20].mxu1 %v1640_v33  ;;  %v1222_v44 = vmul.f32 0.044715, %v1158_v32  ;;  %v1463_v24 = vadd.f32 1.0, %v5675_v15  ;;  %v1465_v57 = vadd.f32 1.0, %v5687_v11 }
 0x243   :  { %v1159_v21 = vmul.f32 %v1095_v2, %v5782_v25  ;;  %v1160_v7 = vmul.f32 %v1096_v28, %v5786_v51  ;;  %v1097_v62 = vmul.f32 %v5803_v50, %v5803_v50  ;;  %v1462_v61 = vadd.f32 1.0, %v5661_v9 }
 0x244   :  { %v1286_v18 = vadd.f32 %v1222_v44, %v5768_v43  ;;  %v1527_v60 = vmul.f32 0.5, %v1463_v24  ;;  %v1529_v36 = vmul.f32 0.5, %v1465_v57  ;;  %v1464_v5 = vadd.f32 1.0, %v5680_v23 }
 0x245   :  { %v1223_v49 = vmul.f32 0.044715, %v1159_v21  ;;  %v1224_v55 = vmul.f32 0.044715, %v1160_v7  ;;  %v1161_v15 = vmul.f32 %v1097_v62, %v5803_v50  ;;  %v1526_v11 = vmul.f32 0.5, %v1462_v61 }
 0x246   :  { %v1350_v3 = vmul.f32 0.7978846, %v1286_v18  ;;  %v1591_v33 = vmul.f32 %v1527_v60, %v5574_v48  ;;  %v1593_v32 = vmul.f32 %v1529_v36, %v5582_v63  ;;  %v1528_v2 = vmul.f32 0.5, %v1464_v5  ;;  %v5821_v28 = vpop.f32.mrb[52].mxu0 }
 0x247   :  { %v1287_v9 = vadd.f32 %v1223_v49, %v5782_v25  ;;  %v1288_v44 = vadd.f32 %v1224_v55, %v5786_v51  ;;  %v1225_v24 = vmul.f32 0.044715, %v1161_v15  ;;  %v1590_v23 = vmul.f32 %v1526_v11, %v5565_v41  ;;  %v5826_v57 = vpop.f32.mrb[53].mxu0 }
 0x248   :  { %4350 = vtanh.f32 %v1350_v3  ;;  %v1643_v21 = vpack.c.bf16 %v1593_v32, %v1591_v33  ;;  %v1592_v7 = vmul.f32 %v1528_v2, %v5579_v10  ;;  %v5831_v48 = vadd.f32 %v5741_v4, %v5350_v22  ;;  %v5833_v63 = vpop.f32.mrb[54].mxu0 }
 0x249   :  { %v5835_v62 = vpop.eup %4342  ;;  %v1351_v61 = vmul.f32 0.7978846, %v1287_v9  ;;  %v1352_v18 = vmul.f32 0.7978846, %v1288_v44  ;;  %v1289_v60 = vadd.f32 %v1225_v24, %v5803_v50  ;;  %v5840_v41 = vadd.f32 %v5749_v54, %v5354_v31  ;;  %v5842_v36 = vpop.f32.mrb[55].mxu0 }
 0x24a   :  { %v5844_v5 = vpop.eup %4344  ;;  %1844 = vmatprep.mubr.bf16.mxu1 %v1643_v21  ;;  %v1642_v10 = vpack.c.bf16 %v1592_v7, %v1590_v23  ;;  %v1098_v4 = vmul.f32 %v5831_v48, %v5831_v48  ;;  %v5850_v49 = vadd.f32 %v5754_v40, %v5350_v22  ;;  %v5854_v55 = vadd.f32 %v5758_v12, %v5354_v31 }
 0x24b   :  { %v5856_v15 = vpop.eup %4346  ;;  %4352 = vtanh.f32 %v1351_v61  ;;  %v1353_v54 = vmul.f32 0.7978846, %v1289_v60  ;;  %v1099_v11 = vmul.f32 %v5840_v41, %v5840_v41  ;;  %v1467_v3 = vadd.f32 1.0, %v5724_v46 }
 0x24c   :  { %v5861_v33 = vpop.eup %4348  ;;  %4354 = vtanh.f32 %v1352_v18  ;;  %1845 = vmatmul.mubr.bf16.gmra.mrb[24].mxu1 %v1642_v10  ;;  %v1162_v40 = vmul.f32 %v1098_v4, %v5831_v48  ;;  %v1100_v32 = vmul.f32 %v5850_v49, %v5850_v49  ;;  %v1101_v12 = vmul.f32 %v5854_v55, %v5854_v55 }
 0x24d   :  { %4356 = vtanh.f32 %v1353_v54  ;;  %v1163_v2 = vmul.f32 %v1099_v11, %v5840_v41  ;;  %v1469_v9 = vadd.f32 1.0, %v5743_v20  ;;  %v1531_v44 = vmul.f32 0.5, %v1467_v3 }
 0x24e   :  { %v1226_v24 = vmul.f32 0.044715, %v1162_v40  ;;  %v1164_v46 = vmul.f32 %v1100_v32, %v5850_v49  ;;  %v1165_v23 = vmul.f32 %v1101_v12, %v5854_v55  ;;  %v1466_v21 = vadd.f32 1.0, %v5712_v16  ;;  %v5873_v7 = vpop.f32.mrb[56].mxu0 }
 0x24f   :  { %v1227_v61 = vmul.f32 0.044715, %v1163_v2  ;;  %v1533_v18 = vmul.f32 0.5, %v1469_v9  ;;  %v1595_v60 = vmul.f32 %v1531_v44, %v5620_v47  ;;  %v1468_v10 = vadd.f32 1.0, %v5732_v6  ;;  %v5877_v4 = vpop.f32.mrb[57].mxu0 }
 0x250   :  { %v1290_v20 = vadd.f32 %v1226_v24, %v5831_v48  ;;  %v1228_v54 = vmul.f32 0.044715, %v1164_v46  ;;  %v1229_v11 = vmul.f32 0.044715, %v1165_v23  ;;  %v1530_v3 = vmul.f32 0.5, %v1466_v21  ;;  %v5880_v40 = vpop.f32.mrb[58].mxu0 }
 0x251   :  { %v1291_v32 = vadd.f32 %v1227_v61, %v5840_v41  ;;  %v1597_v16 = vmul.f32 %v1533_v18, %v5631_v0  ;;  %v1532_v12 = vmul.f32 0.5, %v1468_v10  ;;  %v5886_v2 = vadd.f32 %v5778_v39, %v5350_v22  ;;  %v5888_v47 = vpop.f32.mrb[59].mxu0 }
 0x252   :  { %v5890_v6 = vpop.eup %4350  ;;  %v1354_v9 = vmul.f32 0.7978846, %v1290_v20  ;;  %v1292_v44 = vadd.f32 %v1228_v54, %v5850_v49  ;;  %v1293_v24 = vadd.f32 %v1229_v11, %v5854_v55  ;;  %v1594_v46 = vmul.f32 %v1530_v3, %v5608_v8 }
 0x253   :  { %v1355_v23 = vmul.f32 0.7978846, %v1291_v32  ;;  %v1645_v21 = vpack.c.bf16 %v1597_v16, %v1595_v60  ;;  %v1596_v0 = vmul.f32 %v1532_v12, %v5625_v35  ;;  %v1102_v61 = vmul.f32 %v5886_v2, %v5886_v2 }
 0x254   :  { %4358 = vtanh.f32 %v1354_v9  ;;  %v1356_v39 = vmul.f32 0.7978846, %v1292_v44  ;;  %v1357_v18 = vmul.f32 0.7978846, %v1293_v24  ;;  %v5900_v10 = vadd.f32 %v5788_v26, %v5354_v31 }
 0x255   :  { %v5902_v20 = vpop.eup %4352  ;;  %4360 = vtanh.f32 %v1355_v23  ;;  %1852 = vmatprep.mubr.bf16.mxu1 %v1645_v21  ;;  %v1644_v54 = vpack.c.bf16 %v1596_v0, %v1594_v46  ;;  %v1166_v8 = vmul.f32 %v1102_v61, %v5886_v2  ;;  %v5907_v35 = vadd.f32 %v5793_v14, %v5350_v22 }
 0x256   :  { %v5909_v60 = vpop.eup %4354  ;;  %4362 = vtanh.f32 %v1356_v39  ;;  %v1103_v11 = vmul.f32 %v5900_v10, %v5900_v10  ;;  %v5915_v26 = vadd.f32 %v5805_v59, %v5354_v31  ;;  %v1471_v3 = vadd.f32 1.0, %v5790_v34  ;;  %v5918_v32 = vpop.f32.mrb[60].mxu0 }
 0x257   :  { %v5920_v16 = vpop.eup %4356  ;;  %4364 = vtanh.f32 %v1357_v18  ;;  %1853 = vmatmul.mubr.bf16.gmra.mrb[28].mxu1 %v1644_v54  ;;  %v1230_v14 = vmul.f32 0.044715, %v1166_v8  ;;  %v1104_v12 = vmul.f32 %v5907_v35, %v5907_v35  ;;  %v1473_v9 = vadd.f32 1.0, %v5807_v19  ;;  %v5925_v44 = vpop.f32.mrb[61].mxu0 }
 0x258   :  { %v1167_v24 = vmul.f32 %v1103_v11, %v5900_v10  ;;  %v1105_v59 = vmul.f32 %v5915_v26, %v5915_v26  ;;  %v1535_v34 = vmul.f32 0.5, %v1471_v3  ;;  %v1470_v46 = vadd.f32 1.0, %v5772_v37  ;;  %v5931_v23 = vpop.f32.mrb[62].mxu0 }
 0x259   :  { %v1294_v21 = vadd.f32 %v1230_v14, %v5886_v2  ;;  %v1168_v0 = vmul.f32 %v1104_v12, %v5907_v35  ;;  %v1537_v61 = vmul.f32 0.5, %v1473_v9  ;;  %v1472_v39 = vadd.f32 1.0, %v5795_v56  ;;  %v5936_v19 = vpop.f32.mrb[63].mxu0 }
 0x25a   :  { %v1231_v18 = vmul.f32 0.044715, %v1167_v24  ;;  %v1169_v54 = vmul.f32 %v1105_v59, %v5915_v26  ;;  %v1599_v8 = vmul.f32 %v1535_v34, %v5670_v58  ;;  %v1534_v11 = vmul.f32 0.5, %v1470_v46 }
 0x25b   :  { %v1358_v3 = vmul.f32 0.7978846, %v1294_v21  ;;  %v1232_v30 = vmul.f32 0.044715, %v1168_v0  ;;  %v1601_v37 = vmul.f32 %v1537_v61, %v5678_v13  ;;  %v1536_v29 = vmul.f32 0.5, %v1472_v39 }
 0x25c   :  { %v1295_v14 = vadd.f32 %v1231_v18, %v5900_v10  ;;  %v1233_v42 = vmul.f32 0.044715, %v1169_v54  ;;  %v1598_v12 = vmul.f32 %v1534_v11, %v5657_v1  ;;  %v5945_v56 = vadd.f32 %v5821_v28, %v5350_v22 }
 0x25d   :  { %4366 = vtanh.f32 %v1358_v3  ;;  %v1296_v9 = vadd.f32 %v1232_v30, %v5907_v35  ;;  %v1647_v24 = vpack.c.bf16 %v1601_v37, %v1599_v8  ;;  %v1600_v58 = vmul.f32 %v1536_v29, %v5673_v38 }
 0x25e   :  { %v5949_v59 = vpop.eup %4358  ;;  %v1359_v34 = vmul.f32 0.7978846, %v1295_v14  ;;  %v1297_v13 = vadd.f32 %v1233_v42, %v5915_v26  ;;  %v1106_v46 = vmul.f32 %v5945_v56, %v5945_v56  ;;  %v5956_v1 = vadd.f32 %v5826_v57, %v5354_v31 }
 0x25f   :  { %v5958_v28 = vpop.eup %4360  ;;  %v1360_v21 = vmul.f32 0.7978846, %v1296_v9  ;;  %1860 = vmatprep.mubr.bf16.mxu1 %v1647_v24  ;;  %v1646_v30 = vpack.c.bf16 %v1600_v58, %v1598_v12  ;;  %v5962_v29 = vadd.f32 %v5833_v63, %v5350_v22  ;;  %v5966_v38 = vadd.f32 %v5842_v36, %v5354_v31 }
 0x260   :  { %v5968_v42 = vpop.eup %4362  ;;  %4368 = vtanh.f32 %v1359_v34  ;;  %v1361_v0 = vmul.f32 0.7978846, %v1297_v13  ;;  %v1170_v57 = vmul.f32 %v1106_v46, %v5945_v56  ;;  %v1107_v61 = vmul.f32 %v5956_v1, %v5956_v1 }
 0x261   :  { %v5973_v39 = vpop.eup %4364  ;;  %4370 = vtanh.f32 %v1360_v21  ;;  %1861 = vmatmul.mubr.bf16.gmra.mrb[32].mxu1 %v1646_v30  ;;  %v1108_v63 = vmul.f32 %v5962_v29, %v5962_v29  ;;  %v1109_v36 = vmul.f32 %v5966_v38, %v5966_v38  ;;  %v1475_v18 = vadd.f32 1.0, %v5844_v5 }
 0x262   :  { %4372 = vtanh.f32 %v1361_v0  ;;  %v1234_v54 = vmul.f32 0.044715, %v1170_v57  ;;  %v1171_v8 = vmul.f32 %v1107_v61, %v5956_v1  ;;  %v1477_v11 = vadd.f32 1.0, %v5861_v33 }
 0x263   :  { %v1172_v3 = vmul.f32 %v1108_v63, %v5962_v29  ;;  %v1173_v37 = vmul.f32 %v1109_v36, %v5966_v38  ;;  %v1539_v14 = vmul.f32 0.5, %v1475_v18  ;;  %v1474_v12 = vadd.f32 1.0, %v5835_v62 }
 0x264   :  { %v1298_v9 = vadd.f32 %v1234_v54, %v5945_v56  ;;  %v1235_v24 = vmul.f32 0.044715, %v1171_v8  ;;  %v1541_v58 = vmul.f32 0.5, %v1477_v11  ;;  %v1476_v34 = vadd.f32 1.0, %v5856_v15 }
 0x265   :  { %v1236_v5 = vmul.f32 0.044715, %v1172_v3  ;;  %v1237_v13 = vmul.f32 0.044715, %v1173_v37  ;;  %v1603_v46 = vmul.f32 %v1539_v14, %v5722_v45  ;;  %v1538_v21 = vmul.f32 0.5, %v1474_v12 }
 0x266   :  { %v1362_v30 = vmul.f32 0.7978846, %v1298_v9  ;;  %v1299_v33 = vadd.f32 %v1235_v24, %v5956_v1  ;;  %v1605_v0 = vmul.f32 %v1541_v58, %v5738_v53  ;;  %v1540_v57 = vmul.f32 0.5, %v1476_v34 }
 0x267   :  { %v5990_v61 = vpop.eup %4366  ;;  %v1300_v62 = vadd.f32 %v1236_v5, %v5962_v29  ;;  %v1301_v63 = vadd.f32 %v1237_v13, %v5966_v38  ;;  %v1602_v36 = vmul.f32 %v1538_v21, %v5718_v17  ;;  %v5997_v15 = vadd.f32 %v5873_v7, %v5350_v22 }
 0x268   :  { %4374 = vtanh.f32 %v1362_v30  ;;  %v1363_v45 = vmul.f32 0.7978846, %v1299_v33  ;;  %v1649_v18 = vpack.c.bf16 %v1605_v0, %v1603_v46  ;;  %v1604_v54 = vmul.f32 %v1540_v57, %v5730_v52 }
 0x269   :  { %v1364_v8 = vmul.f32 0.7978846, %v1300_v62  ;;  %v1365_v53 = vmul.f32 0.7978846, %v1301_v63  ;;  %v1110_v11 = vmul.f32 %v5997_v15, %v5997_v15  ;;  %v6004_v3 = vadd.f32 %v5877_v4, %v5354_v31 }
 0x26a   :  { %v6006_v37 = vpop.eup %4368  ;;  %4376 = vtanh.f32 %v1363_v45  ;;  %1868 = vmatprep.mubr.bf16.mxu1 %v1649_v18  ;;  %v1648_v17 = vpack.c.bf16 %v1604_v54, %v1602_v36  ;;  %v6010_v7 = vadd.f32 %v5880_v40, %v5350_v22  ;;  %v6014_v52 = vadd.f32 %v5888_v47, %v5354_v31 }
 0x26b   :  { %v6016_v14 = vpop.eup %4370  ;;  %4378 = vtanh.f32 %v1364_v8  ;;  %v1174_v12 = vmul.f32 %v1110_v11, %v5997_v15  ;;  %v1111_v4 = vmul.f32 %v6004_v3, %v6004_v3  ;;  %v1479_v9 = vadd.f32 1.0, %v5902_v20 }
 0x26c   :  { %v6022_v24 = vpop.eup %4372  ;;  %4380 = vtanh.f32 %v1365_v53  ;;  %1869 = vmatmul.mubr.bf16.gmra.mrb[36].mxu1 %v1648_v17  ;;  %v1112_v40 = vmul.f32 %v6010_v7, %v6010_v7  ;;  %v1113_v47 = vmul.f32 %v6014_v52, %v6014_v52  ;;  %v1481_v58 = vadd.f32 1.0, %v5920_v16 }
 0x26d   :  { %v1238_v34 = vmul.f32 0.044715, %v1174_v12  ;;  %v1175_v5 = vmul.f32 %v1111_v4, %v6004_v3  ;;  %v1543_v13 = vmul.f32 0.5, %v1479_v9  ;;  %v1478_v46 = vadd.f32 1.0, %v5890_v6 }
 0x26e   :  { %v1176_v20 = vmul.f32 %v1112_v40, %v6010_v7  ;;  %v1177_v21 = vmul.f32 %v1113_v47, %v6014_v52  ;;  %v1545_v30 = vmul.f32 0.5, %v1481_v58  ;;  %v1480_v33 = vadd.f32 1.0, %v5909_v60 }
 0x26f   :  { %v1302_v0 = vadd.f32 %v1238_v34, %v5997_v15  ;;  %v1239_v57 = vmul.f32 0.044715, %v1175_v5  ;;  %v1607_v62 = vmul.f32 %v1543_v13, %v5782_v25  ;;  %v1542_v63 = vmul.f32 0.5, %v1478_v46 }
 0x270   :  { %v1240_v16 = vmul.f32 0.044715, %v1176_v20  ;;  %v1241_v36 = vmul.f32 0.044715, %v1177_v21  ;;  %v1609_v45 = vmul.f32 %v1545_v30, %v5803_v50  ;;  %v1544_v18 = vmul.f32 0.5, %v1480_v33 }
 0x271   :  { %v1366_v54 = vmul.f32 0.7978846, %v1302_v0  ;;  %v1303_v6 = vadd.f32 %v1239_v57, %v6004_v3  ;;  %v1606_v8 = vmul.f32 %v1542_v63, %v5768_v43  ;;  %v6041_v53 = vadd.f32 %v5918_v32, %v5350_v22 }
 0x272   :  { %v6043_v60 = vpop.eup %4374  ;;  %v1304_v11 = vadd.f32 %v1240_v16, %v6010_v7  ;;  %v1305_v25 = vadd.f32 %v1241_v36, %v6014_v52  ;;  %v1651_v17 = vpack.c.bf16 %v1609_v45, %v1607_v62  ;;  %v1608_v12 = vmul.f32 %v1544_v18, %v5786_v51 }
 0x273   :  { %4382 = vtanh.f32 %v1366_v54  ;;  %v1367_v50 = vmul.f32 0.7978846, %v1303_v6  ;;  %v1114_v4 = vmul.f32 %v6041_v53, %v6041_v53  ;;  %v6052_v43 = vadd.f32 %v5925_v44, %v5354_v31 }
 0x274   :  { %v6054_v32 = vpop.eup %4376  ;;  %v1368_v9 = vmul.f32 0.7978846, %v1304_v11  ;;  %v1369_v40 = vmul.f32 0.7978846, %v1305_v25  ;;  %1876 = vmatprep.mubr.bf16.mxu1 %v1651_v17  ;;  %v1650_v47 = vpack.c.bf16 %v1608_v12, %v1606_v8  ;;  %v6058_v58 = vadd.f32 %v5931_v23, %v5350_v22 }
 0x275   :  { %v6060_v51 = vpop.eup %4378  ;;  %4384 = vtanh.f32 %v1367_v50  ;;  %v1178_v34 = vmul.f32 %v1114_v4, %v6041_v53  ;;  %v1115_v5 = vmul.f32 %v6052_v43, %v6052_v43  ;;  %v6067_v44 = vadd.f32 %v5936_v19, %v5354_v31 }
 0x276   :  { %v4381_v13 = vpop.eup %4380  ;;  %4386 = vtanh.f32 %v1368_v9  ;;  %1877 = vmatmul.mubr.bf16.gmra.mrb[40].mxu1 %v1650_v47  ;;  %v1116_v46 = vmul.f32 %v6058_v58, %v6058_v58  ;;  %v1483_v22 = vadd.f32 1.0, %v5958_v28  ;;  %v1485_v23 = vadd.f32 1.0, %v5973_v39 }
 0x277   :  { %4388 = vtanh.f32 %v1369_v40  ;;  %v1242_v20 = vmul.f32 0.044715, %v1178_v34  ;;  %v1179_v21 = vmul.f32 %v1115_v5, %v6052_v43  ;;  %v1117_v30 = vmul.f32 %v6067_v44, %v6067_v44 }
 0x278   :  { %v1180_v31 = vmul.f32 %v1116_v46, %v6058_v58  ;;  %v1547_v19 = vmul.f32 0.5, %v1483_v22  ;;  %v1549_v33 = vmul.f32 0.5, %v1485_v23  ;;  %v1482_v0 = vadd.f32 1.0, %v5949_v59 }
 0x279   :  { %v1306_v57 = vadd.f32 %v1242_v20, %v6041_v53  ;;  %v1243_v62 = vmul.f32 0.044715, %v1179_v21  ;;  %v1181_v28 = vmul.f32 %v1117_v30, %v6067_v44  ;;  %v1484_v39 = vadd.f32 1.0, %v5968_v42 }
 0x27a   :  { %v1244_v63 = vmul.f32 0.044715, %v1180_v31  ;;  %v1611_v16 = vmul.f32 %v1547_v19, %v5840_v41  ;;  %v1613_v36 = vmul.f32 %v1549_v33, %v5854_v55  ;;  %v1546_v45 = vmul.f32 0.5, %v1482_v0 }
 0x27b   :  { %v1370_v18 = vmul.f32 0.7978846, %v1306_v57  ;;  %v1307_v54 = vadd.f32 %v1243_v62, %v6052_v43  ;;  %v1245_v6 = vmul.f32 0.044715, %v1181_v28  ;;  %v1548_v8 = vmul.f32 0.5, %v1484_v39 }
 0x27c   :  { %v1308_v59 = vadd.f32 %v1244_v63, %v6058_v58  ;;  %v1653_v11 = vpack.c.bf16 %v1613_v36, %v1611_v16  ;;  %v1610_v25 = vmul.f32 %v1546_v45, %v5831_v48  ;;  %v1487_v17 = vadd.f32 1.0, %v6006_v37 }
 0x27d   :  { %v4383_v12 = vpop.eup %4382  ;;  %4390 = vtanh.f32 %v1370_v18  ;;  %v1371_v42 = vmul.f32 0.7978846, %v1307_v54  ;;  %v1309_v41 = vadd.f32 %v1245_v6, %v6067_v44  ;;  %v1612_v55 = vmul.f32 %v1548_v8, %v5850_v49 }
 0x27e   :  { %v1372_v50 = vmul.f32 0.7978846, %v1308_v59  ;;  %1884 = vmatprep.mubr.bf16.mxu1 %v1653_v11  ;;  %v1489_v4 = vadd.f32 1.0, %v6022_v24  ;;  %v1551_v9 = vmul.f32 0.5, %v1487_v17  ;;  %v1486_v40 = vadd.f32 1.0, %v5990_v61 }
 0x27f   :  { %v4385_v47 = vpop.eup %4384  ;;  %4392 = vtanh.f32 %v1371_v42  ;;  %v1373_v34 = vmul.f32 0.7978846, %v1309_v41  ;;  %v1652_v48 = vpack.c.bf16 %v1612_v55, %v1610_v25  ;;  %v1488_v37 = vadd.f32 1.0, %v6016_v14 }
 0x280   :  { %v4387_v5 = vpop.eup %4386  ;;  %4394 = vtanh.f32 %v1372_v50  ;;  %v1553_v46 = vmul.f32 0.5, %v1489_v4  ;;  %v1615_v22 = vmul.f32 %v1551_v9, %v5900_v10  ;;  %v1550_v23 = vmul.f32 0.5, %v1486_v40 }
 0x281   :  { %v4389_v49 = vpop.eup %4388  ;;  %4396 = vtanh.f32 %v1373_v34  ;;  %1885 = vmatmul.mubr.bf16.gmra.mrb[44].mxu1 %v1652_v48  ;;  %v1552_v20 = vmul.f32 0.5, %v1488_v37  ;;  %v1491_v24 = vadd.f32 1.0, %v6054_v32  ;;  %v1493_v21 = vadd.f32 1.0, %v4381_v13  ;;  %v4168_v37 = vld [vmem:[#allocation8 + $0x4] ss:$8 sps:$4 sm:$0xff]  }
 0x282   :  { %v1617_v61 = vmul.f32 %v1553_v46, %v5915_v26  ;;  %v1614_v30 = vmul.f32 %v1550_v23, %v5886_v2  ;;  %v1490_v31 = vadd.f32 1.0, %v6043_v60  ;;  %v1492_v14 = vadd.f32 1.0, %v6060_v51  ;;  %2640 = vmatprep.subr.bf16.mxu0 %v4168_v37  ;;  %v4171_v46 = vld [vmem:[#allocation8 + $0x14] ss:$8 sps:$4 sm:$0xff]  }
 0x283   :  { %v1616_v19 = vmul.f32 %v1552_v20, %v5907_v35  ;;  %v1555_v33 = vmul.f32 0.5, %v1491_v24  ;;  %v1557_v10 = vmul.f32 0.5, %v1493_v21  ;;  %v1495_v0 = vadd.f32 1.0, %v4385_v47  ;;  %v114_v20 = vld [vmem:[#allocation2] sm:$0xff] }
 0x284   :  { %v1655_v57 = vpack.c.bf16 %v1617_v61, %v1615_v22  ;;  %v1554_v62 = vmul.f32 0.5, %v1490_v31  ;;  %v1556_v28 = vmul.f32 0.5, %v1492_v14  ;;  %v1497_v39 = vadd.f32 1.0, %v4389_v49 }
 0x285   :  { %v1654_v63 = vpack.c.bf16 %v1616_v19, %v1614_v30  ;;  %v1619_v32 = vmul.f32 %v1555_v33, %v5956_v1  ;;  %v1621_v26 = vmul.f32 %v1557_v10, %v5966_v38  ;;  %v1559_v13 = vmul.f32 0.5, %v1495_v0  ;;  %v116_v30 = vld [vmem:[#allocation2 + $0x10] sm:$0xff] }
 0x286   :  { %1892 = vmatprep.mubr.bf16.mxu1 %v1655_v57  ;;  %v1618_v2 = vmul.f32 %v1554_v62, %v5945_v56  ;;  %v1620_v60 = vmul.f32 %v1556_v28, %v5962_v29  ;;  %v1561_v51 = vmul.f32 0.5, %v1497_v39  ;;  %v1494_v35 = vadd.f32 1.0, %v4383_v12  ;;  %v4175_v19 = vld [vmem:[#allocation8 + $0x30] ss:$8 sps:$4 sm:$0xff]   ;;  %v4177_v33 = vld [vmem:[#allocation8 + $0x34] ss:$8 sps:$4 sm:$0xff]  }
 0x287   :  { %v4391_v16 = vpop.eup %4390  ;;  %v1657_v36 = vpack.c.bf16 %v1621_v26, %v1619_v32  ;;  %v1623_v45 = vmul.f32 %v1559_v13, %v6004_v3  ;;  %v1496_v18 = vadd.f32 1.0, %v4387_v5  ;;  %v4169_v5 = vld [vmem:[#allocation8 + $0x10] ss:$8 sps:$4 sm:$0xff]   ;;  %v118_v32 = vld [vmem:[#allocation2 + $0x20] sm:$0xff] }
 0x288   :  { %v1656_v54 = vpack.c.bf16 %v1620_v60, %v1618_v2  ;;  %v1625_v6 = vmul.f32 %v1561_v51, %v6014_v52  ;;  %v1558_v8 = vmul.f32 0.5, %v1494_v35  ;;  %v1498_v1 = vadd.f32 1.0, %v4391_v16  ;;  %v120_v60 = vld [vmem:[#allocation2 + $0x30] sm:$0xff] }
 0x289   :  { %v4393_v59 = vpop.eup %4392  ;;  %1893 = vmatmul.mubr.bf16.gmra.mrb[48].mxu1 %v1654_v63  ;;  %v1560_v38 = vmul.f32 0.5, %v1496_v18 }
 0x28a   :  { %v4395_v11 = vpop.eup %4394  ;;  %1900 = vmatprep.mubr.bf16.mxu1 %v1657_v36  ;;  %v1659_v56 = vpack.c.bf16 %v1625_v6, %v1623_v45  ;;  %v1499_v25 = vadd.f32 1.0, %v4393_v59  ;;  %v1622_v17 = vmul.f32 %v1558_v8, %v5997_v15  ;;  %v1562_v3 = vmul.f32 0.5, %v1498_v1  ;;  %v4180_v6 = vld [vmem:[#allocation8 + $0x44] ss:$8 sps:$4 sm:$0xff]  }
 0x28b   :  { %v4397_v29 = vpop.eup %4396  ;;  %v1624_v12 = vmul.f32 %v1560_v38, %v6010_v7  ;;  %v1500_v42 = vadd.f32 1.0, %v4395_v11  ;;  %v4166_v7 = vld [vmem:[#allocation8] ss:$8 sps:$4 sm:$0xff]  }
 0x28c   :  { %v1501_v41 = vadd.f32 1.0, %v4397_v29  ;;  %v1563_v55 = vmul.f32 0.5, %v1499_v25  ;;  %v1626_v9 = vmul.f32 %v1562_v3, %v6041_v53  ;;  %2641 = vmatpush1.bf16.msra.mxu0 %v4166_v7  ;;  %v4172_v53 = vld [vmem:[#allocation8 + $0x20] ss:$8 sps:$4 sm:$0xff]   ;;  %v124_v29 = vld [vmem:[#allocation2 + $0x50] sm:$0xff] }
 0x28d   :  { %v1658_v50 = vpack.c.bf16 %v1624_v12, %v1622_v17  ;;  %v1564_v52 = vmul.f32 0.5, %v1500_v42  ;;  %2642 = vmatprep.subr.bf16.mxu0 %v4171_v46  ;;  %v122_v38 = vld [vmem:[#allocation2 + $0x40] sm:$0xff] }
 0x28e   :  { %v1565_v4 = vmul.f32 0.5, %v1501_v41  ;;  %v1627_v47 = vmul.f32 %v1563_v55, %v6052_v43  ;;  %v4181_v55 = vld [vmem:[#allocation8 + $0x50] ss:$8 sps:$4 sm:$0xff]  }
 0x28f   :  { %v1628_v40 = vmul.f32 %v1564_v52, %v6058_v58  ;;  %v4174_v58 = vld [vmem:[#allocation8 + $0x24] ss:$8 sps:$4 sm:$0xff]  }
 0x290   :  { %v1629_v34 = vmul.f32 %v1565_v4, %v6067_v44  ;;  %2643 = vmatpush1.bf16.msra.mxu0 %v4169_v5  ;;  %v6114_v44 = vld [vmem:[%s7186_s6] ss:$0 sm:$0xff]  ;;  %v128_v5 = vld [vmem:[#allocation2 + $0x70] sm:$0xff] }
 0x291   :  { %1901 = vmatmul.mubr.bf16.gmra.mrb[52].mxu1 %v1656_v54  ;;  %v1660_v48 = vpack.c.bf16 %v1628_v40, %v1626_v9  ;;  %2644 = vmatprep.subr.bf16.mxu0 %v4174_v58  ;;  %v4178_v54 = vld [vmem:[#allocation8 + $0x40] ss:$8 sps:$4 sm:$0xff]  }
 0x292   :  { %1908 = vmatprep.mubr.bf16.mxu1 %v1659_v56  ;;  %v1661_v15 = vpack.c.bf16 %v1629_v34, %v1627_v47  ;;  %v4186_v47 = vld [vmem:[#allocation8 + $0x64] ss:$8 sps:$4 sm:$0xff]  }
 0x293   :  { %v126_v34 = vld [vmem:[#allocation2 + $0x60] sm:$0xff] }
 0x294   :  { %2645 = vmatpush1.bf16.msra.mxu0 %v4172_v53 }
 0x295   :  { %2646 = vmatprep.subr.bf16.mxu0 %v4177_v33  ;;  %v4187_v33 = vld [vmem:[#allocation8 + $0x70] ss:$8 sps:$4 sm:$0xff]  }
 0x298   :  { %2647 = vmatpush1.bf16.msra.mxu0 %v4175_v19  ;;  %v132_v19 = vld [vmem:[#allocation2 + $0x90] sm:$0xff] }
 0x299   :  { %1909 = vmatmul.mubr.bf16.gmra.mrb[56].mxu1 %v1658_v50  ;;  %2648 = vmatprep.subr.bf16.mxu0 %v4180_v6  ;;  %v4183_v50 = vld [vmem:[#allocation8 + $0x54] ss:$8 sps:$4 sm:$0xff]  }
 0x29a   :  { %1916 = vmatprep.mubr.bf16.mxu1 %v1661_v15  ;;  %v4184_v15 = vld [vmem:[#allocation8 + $0x60] ss:$8 sps:$4 sm:$0xff]  }
 0x29c   :  { %2649 = vmatpush1.bf16.msra.mxu0 %v4178_v54 }
 0x29d   :  { %2650 = vmatprep.subr.bf16.mxu0 %v4183_v50 }
 0x2a0   :  { %2651 = vmatpush1.bf16.msra.mxu0 %v4181_v55  ;;  %v140_v55 = vld [vmem:[#allocation2 + $0xd0] sm:$0xff] }
 0x2a1   :  { %1917 = vmatmul.mubr.bf16.gmra.mrb[60].mxu1 %v1660_v48  ;;  %2652 = vmatprep.subr.bf16.mxu0 %v4186_v47 }
 0x2a4   :  { %2653 = vmatpush1.bf16.msra.mxu0 %v4184_v15 }
 0x2e0   :  { %v3905_v43 = vpop.f32.mrb[0].mxu1 }
 0x2e1   :  { %v3906_v22 = vpop.f32.mrb[1].mxu1 }
 0x2e2   :  { %v3907_v23 = vadd.f32 %v3906_v22, %v3905_v43  ;;  %v3908_v49 = vpop.f32.mrb[2].mxu1 }
 0x2e3   :  { %v3909_v24 = vpop.f32.mrb[3].mxu1 }
 0x2e4   :  { %v1799_v21 = vadd.f32 %v3907_v23, %v6114_v44  ;;  %v3910_v61 = vadd.f32 %v3909_v24, %v3908_v49 }
 0x2e6   :  { %v6117_v31 = vadd.f32 %v1799_v21, %v114_v20  ;;  %v1802_v14 = vadd.f32 %v3910_v61, %v6114_v44  ;;  %v130_v21 = vld [vmem:[#allocation2 + $0x80] sm:$0xff] }
 0x2e8   :  { %3736 = vst [vmem:[#allocation11] sm:$0xff] %v6117_v31  ;;  %v6121_v10 = vadd.f32 %v1802_v14, %v116_v30  ;;  %2009 = vadd.xlane.f32.xlu0 %v6117_v31  ;;  %v2073_v0 = vmul.f32 %v6117_v31, %v6117_v31 }
 0x2ea   :  { %3737 = vst [vmem:[#allocation11 + $0x10] sm:$0xff] %v6121_v10  ;;  %2011 = vadd.xlane.f32.xlu1 %v6121_v10  ;;  %v2074_v28 = vmul.f32 %v6121_v10, %v6121_v10 }
 0x2eb   :  { %v3911_v57 = vpop.f32.mrb[4].mxu1 }
 0x2ec   :  { %v3912_v62 = vpop.f32.mrb[5].mxu1  ;;  %2105 = vadd.xlane.f32.xlu0 %v2073_v0  ;;  %v4189_v0 = vld [vmem:[#allocation8 + $0x74] ss:$8 sps:$4 sm:$0xff]  }
 0x2ed   :  { %v3913_v39 = vadd.f32 %v3912_v62, %v3911_v57  ;;  %v3914_v63 = vpop.f32.mrb[6].mxu1  ;;  %2654 = vmatprep.subr.bf16.mxu0 %v4189_v0 }
 0x2ee   :  { %v3915_v26 = vpop.f32.mrb[7].mxu1  ;;  %2107 = vadd.xlane.f32.xlu1 %v2074_v28  ;;  %2655 = vmatpush1.bf16.msra.mxu0 %v4187_v33 }
 0x2ef   :  { %v1807_v13 = vadd.f32 %v3913_v39, %v6114_v44  ;;  %v3916_v2 = vadd.f32 %v3915_v26, %v3914_v63 }
 0x2f1   :  { %v6131_v51 = vadd.f32 %v1807_v13, %v118_v32  ;;  %v1810_v35 = vadd.f32 %v3916_v2, %v6114_v44 }
 0x2f3   :  { %3738 = vst [vmem:[#allocation11 + $0x20] sm:$0xff] %v6131_v51  ;;  %v6135_v16 = vadd.f32 %v1810_v35, %v120_v60  ;;  %2013 = vadd.xlane.f32.xlu0 %v6131_v51  ;;  %v2075_v45 = vmul.f32 %v6131_v51, %v6131_v51  ;;  %v134_v60 = vld [vmem:[#allocation2 + $0xa0] sm:$0xff] }
 0x2f5   :  { %3739 = vst [vmem:[#allocation11 + $0x30] sm:$0xff] %v6135_v16  ;;  %v3917_v36 = vpop.f32.mrb[8].mxu1  ;;  %2015 = vadd.xlane.f32.xlu1 %v6135_v16  ;;  %v2076_v59 = vmul.f32 %v6135_v16, %v6135_v16 }
 0x2f6   :  { %v3918_v18 = vpop.f32.mrb[9].mxu1 }
 0x2f7   :  { %v3919_v8 = vadd.f32 %v3918_v18, %v3917_v36  ;;  %v3920_v1 = vpop.f32.mrb[10].mxu1  ;;  %2109 = vadd.xlane.f32.xlu0 %v2075_v45  ;;  %v136_v18 = vld [vmem:[#allocation2 + $0xb0] sm:$0xff] }
 0x2f8   :  { %v3921_v11 = vpop.f32.mrb[11].mxu1 }
 0x2f9   :  { %v1815_v56 = vadd.f32 %v3919_v8, %v6114_v44  ;;  %v3922_v25 = vadd.f32 %v3921_v11, %v3920_v1  ;;  %2111 = vadd.xlane.f32.xlu1 %v2076_v59 }
 0x2fb   :  { %v6145_v17 = vadd.f32 %v1815_v56, %v122_v38  ;;  %v1818_v12 = vadd.f32 %v3922_v25, %v6114_v44 }
 0x2fd   :  { %3740 = vst [vmem:[#allocation11 + $0x40] sm:$0xff] %v6145_v17  ;;  %v6149_v42 = vadd.f32 %v1818_v12, %v124_v29  ;;  %2017 = vadd.xlane.f32.xlu0 %v6145_v17  ;;  %v2077_v3 = vmul.f32 %v6145_v17, %v6145_v17  ;;  %v138_v29 = vld [vmem:[#allocation2 + $0xc0] sm:$0xff] }
 0x2ff   :  { %3741 = vst [vmem:[#allocation11 + $0x50] sm:$0xff] %v6149_v42  ;;  %2019 = vadd.xlane.f32.xlu1 %v6149_v42  ;;  %v2078_v4 = vmul.f32 %v6149_v42, %v6149_v42 }
 0x300   :  { %v3923_v41 = vpop.f32.mrb[12].mxu1 }
 0x301   :  { %v3924_v52 = vpop.f32.mrb[13].mxu1  ;;  %2113 = vadd.xlane.f32.xlu0 %v2077_v3 }
 0x302   :  { %v3925_v9 = vadd.f32 %v3924_v52, %v3923_v41  ;;  %v3926_v40 = vpop.f32.mrb[14].mxu1 }
 0x303   :  { %v3927_v48 = vpop.f32.mrb[15].mxu1  ;;  %2115 = vadd.xlane.f32.xlu1 %v2078_v4 }
 0x304   :  { %v1823_v7 = vadd.f32 %v3925_v9, %v6114_v44  ;;  %v3928_v37 = vadd.f32 %v3927_v48, %v3926_v40 }
 0x306   :  { %v6159_v46 = vadd.f32 %v1823_v7, %v126_v34  ;;  %v1826_v53 = vadd.f32 %v3928_v37, %v6114_v44  ;;  %v142_v7 = vld [vmem:[#allocation2 + $0xe0] sm:$0xff] }
 0x308   :  { %3742 = vst [vmem:[#allocation11 + $0x60] sm:$0xff] %v6159_v46  ;;  %v6163_v58 = vadd.f32 %v1826_v53, %v128_v5  ;;  %2021 = vadd.xlane.f32.xlu0 %v6159_v46  ;;  %v2079_v22 = vmul.f32 %v6159_v46, %v6159_v46 }
 0x30a   :  { %3743 = vst [vmem:[#allocation11 + $0x70] sm:$0xff] %v6163_v58  ;;  %v3929_v43 = vpop.f32.mrb[16].mxu1  ;;  %2023 = vadd.xlane.f32.xlu1 %v6163_v58  ;;  %v2080_v24 = vmul.f32 %v6163_v58, %v6163_v58 }
 0x30b   :  { %v3930_v23 = vpop.f32.mrb[17].mxu1 }
 0x30c   :  { %v3931_v49 = vadd.f32 %v3930_v23, %v3929_v43  ;;  %v3932_v20 = vpop.f32.mrb[18].mxu1  ;;  %2117 = vadd.xlane.f32.xlu0 %v2079_v22  ;;  %v144_v43 = vld [vmem:[#allocation2 + $0xf0] sm:$0xff] }
 0x30d   :  { %v3933_v61 = vpop.f32.mrb[19].mxu1 }
 0x30e   :  { %v1831_v30 = vadd.f32 %v3931_v49, %v6114_v44  ;;  %v3934_v14 = vadd.f32 %v3933_v61, %v3932_v20  ;;  %2119 = vadd.xlane.f32.xlu1 %v2080_v24 }
 0x310   :  { %v6173_v57 = vadd.f32 %v1831_v30, %v130_v21  ;;  %v1834_v62 = vadd.f32 %v3934_v14, %v6114_v44 }
 0x312   :  { %3744 = vst [vmem:[#allocation11 + $0x80] sm:$0xff] %v6173_v57  ;;  %v6177_v28 = vadd.f32 %v1834_v62, %v132_v19  ;;  %2025 = vadd.xlane.f32.xlu0 %v6173_v57  ;;  %v2081_v39 = vmul.f32 %v6173_v57, %v6173_v57  ;;  %v146_v19 = vld [vmem:[#allocation2 + $0x100] sm:$0xff] }
 0x314   :  { %3745 = vst [vmem:[#allocation11 + $0x90] sm:$0xff] %v6177_v28  ;;  %2027 = vadd.xlane.f32.xlu1 %v6177_v28  ;;  %v2082_v26 = vmul.f32 %v6177_v28, %v6177_v28 }
 0x315   :  { %v3935_v63 = vpop.f32.mrb[20].mxu1 }
 0x316   :  { %v3936_v32 = vpop.f32.mrb[21].mxu1  ;;  %2121 = vadd.xlane.f32.xlu0 %v2081_v39  ;;  %v148_v39 = vld [vmem:[#allocation2 + $0x110] sm:$0xff] }
 0x317   :  { %v3937_v13 = vadd.f32 %v3936_v32, %v3935_v63  ;;  %v3938_v2 = vpop.f32.mrb[22].mxu1 }
 0x318   :  { %v3939_v35 = vpop.f32.mrb[23].mxu1  ;;  %2123 = vadd.xlane.f32.xlu1 %v2082_v26 }
 0x319   :  { %v1839_v36 = vadd.f32 %v3937_v13, %v6114_v44  ;;  %v3940_v45 = vadd.f32 %v3939_v35, %v3938_v2 }
 0x31b   :  { %v6187_v54 = vadd.f32 %v1839_v36, %v134_v60  ;;  %v1842_v6 = vadd.f32 %v3940_v45, %v6114_v44 }
 0x31d   :  { %3746 = vst [vmem:[#allocation11 + $0xa0] sm:$0xff] %v6187_v54  ;;  %v6191_v8 = vadd.f32 %v1842_v6, %v136_v18  ;;  %2029 = vadd.xlane.f32.xlu0 %v6187_v54  ;;  %v2083_v59 = vmul.f32 %v6187_v54, %v6187_v54  ;;  %v150_v18 = vld [vmem:[#allocation2 + $0x120] sm:$0xff] }
 0x31f   :  { %3747 = vst [vmem:[#allocation11 + $0xb0] sm:$0xff] %v6191_v8  ;;  %v3941_v1 = vpop.f32.mrb[24].mxu1  ;;  %2031 = vadd.xlane.f32.xlu1 %v6191_v8  ;;  %v2084_v25 = vmul.f32 %v6191_v8, %v6191_v8 }
 0x320   :  { %v3942_v38 = vpop.f32.mrb[25].mxu1 }
 0x321   :  { %v3943_v11 = vadd.f32 %v3942_v38, %v3941_v1  ;;  %v3944_v56 = vpop.f32.mrb[26].mxu1  ;;  %2125 = vadd.xlane.f32.xlu0 %v2083_v59  ;;  %v152_v38 = vld [vmem:[#allocation2 + $0x130] sm:$0xff] }
 0x322   :  { %v3945_v12 = vpop.f32.mrb[27].mxu1 }
 0x323   :  { %v1847_v3 = vadd.f32 %v3943_v11, %v6114_v44  ;;  %v3946_v41 = vadd.f32 %v3945_v12, %v3944_v56  ;;  %2127 = vadd.xlane.f32.xlu1 %v2084_v25 }
 0x325   :  { %v6201_v50 = vadd.f32 %v1847_v3, %v138_v29  ;;  %v1850_v52 = vadd.f32 %v3946_v41, %v6114_v44 }
 0x327   :  { %3748 = vst [vmem:[#allocation11 + $0xc0] sm:$0xff] %v6201_v50  ;;  %v6205_v4 = vadd.f32 %v1850_v52, %v140_v55  ;;  %2033 = vadd.xlane.f32.xlu0 %v6201_v50  ;;  %v2085_v9 = vmul.f32 %v6201_v50, %v6201_v50 }
 0x329   :  { %3749 = vst [vmem:[#allocation11 + $0xd0] sm:$0xff] %v6205_v4  ;;  %2035 = vadd.xlane.f32.xlu1 %v6205_v4  ;;  %v2086_v34 = vmul.f32 %v6205_v4, %v6205_v4 }
 0x32a   :  { %v3947_v40 = vpop.f32.mrb[28].mxu1 }
 0x32b   :  { %v3948_v47 = vpop.f32.mrb[29].mxu1  ;;  %2129 = vadd.xlane.f32.xlu0 %v2085_v9  ;;  %v154_v9 = vld [vmem:[#allocation2 + $0x140] sm:$0xff] }
 0x32c   :  { %v3949_v48 = vadd.f32 %v3948_v47, %v3947_v40  ;;  %v3950_v15 = vpop.f32.mrb[30].mxu1 }
 0x32d   :  { %v3951_v37 = vpop.f32.mrb[31].mxu1  ;;  %2131 = vadd.xlane.f32.xlu1 %v2086_v34 }
 0x32e   :  { %v1855_v5 = vadd.f32 %v3949_v48, %v6114_v44  ;;  %v3952_v53 = vadd.f32 %v3951_v37, %v3950_v15  ;;  %v156_v48 = vld [vmem:[#allocation2 + $0x150] sm:$0xff] }
 0x330   :  { %v6215_v22 = vadd.f32 %v1855_v5, %v142_v7  ;;  %v1858_v23 = vadd.f32 %v3952_v53, %v6114_v44 }
 0x332   :  { %3750 = vst [vmem:[#allocation11 + $0xe0] sm:$0xff] %v6215_v22  ;;  %v6219_v49 = vadd.f32 %v1858_v23, %v144_v43  ;;  %2037 = vadd.xlane.f32.xlu0 %v6215_v22  ;;  %v2087_v24 = vmul.f32 %v6215_v22, %v6215_v22 }
 0x334   :  { %3751 = vst [vmem:[#allocation11 + $0xf0] sm:$0xff] %v6219_v49  ;;  %v3953_v20 = vpop.f32.mrb[32].mxu1  ;;  %2039 = vadd.xlane.f32.xlu1 %v6219_v49  ;;  %v2088_v14 = vmul.f32 %v6219_v49, %v6219_v49 }
 0x335   :  { %v3954_v21 = vpop.f32.mrb[33].mxu1 }
 0x336   :  { %v3955_v61 = vadd.f32 %v3954_v21, %v3953_v20  ;;  %v3956_v30 = vpop.f32.mrb[34].mxu1  ;;  %2133 = vadd.xlane.f32.xlu0 %v2087_v24  ;;  %v158_v21 = vld [vmem:[#allocation2 + $0x160] sm:$0xff] }
 0x337   :  { %v3957_v33 = vpop.f32.mrb[35].mxu1 }
 0x338   :  { %v1863_v0 = vadd.f32 %v3955_v61, %v6114_v44  ;;  %v3958_v62 = vadd.f32 %v3957_v33, %v3956_v30  ;;  %2135 = vadd.xlane.f32.xlu1 %v2088_v14 }
 0x33a   :  { %v6229_v63 = vadd.f32 %v1863_v0, %v146_v19  ;;  %v1866_v32 = vadd.f32 %v3958_v62, %v6114_v44  ;;  %v160_v19 = vld [vmem:[#allocation2 + $0x170] sm:$0xff] }
 0x33c   :  { %3752 = vst [vmem:[#allocation11 + $0x100] sm:$0xff] %v6229_v63  ;;  %v6233_v26 = vadd.f32 %v1866_v32, %v148_v39  ;;  %2041 = vadd.xlane.f32.xlu0 %v6229_v63  ;;  %v2089_v13 = vmul.f32 %v6229_v63, %v6229_v63 }
 0x33e   :  { %3753 = vst [vmem:[#allocation11 + $0x110] sm:$0xff] %v6233_v26  ;;  %2043 = vadd.xlane.f32.xlu1 %v6233_v26  ;;  %v2090_v35 = vmul.f32 %v6233_v26, %v6233_v26 }
 0x33f   :  { %v3959_v2 = vpop.f32.mrb[36].mxu1 }
 0x340   :  { %v3960_v60 = vpop.f32.mrb[37].mxu1  ;;  %2137 = vadd.xlane.f32.xlu0 %v2089_v13 }
 0x341   :  { %v3961_v36 = vadd.f32 %v3960_v60, %v3959_v2  ;;  %v3962_v45 = vpop.f32.mrb[38].mxu1 }
 0x342   :  { %v3963_v6 = vpop.f32.mrb[39].mxu1  ;;  %2139 = vadd.xlane.f32.xlu1 %v2090_v35  ;;  %v162_v35 = vld [vmem:[#allocation2 + $0x180] sm:$0xff] }
 0x343   :  { %v1871_v1 = vadd.f32 %v3961_v36, %v6114_v44  ;;  %v3964_v59 = vadd.f32 %v3963_v6, %v3962_v45 }
 0x345   :  { %v6243_v11 = vadd.f32 %v1871_v1, %v150_v18  ;;  %v1874_v56 = vadd.f32 %v3964_v59, %v6114_v44  ;;  %v164_v1 = vld [vmem:[#allocation2 + $0x190] sm:$0xff] }
 0x347   :  { %3754 = vst [vmem:[#allocation11 + $0x120] sm:$0xff] %v6243_v11  ;;  %v6247_v25 = vadd.f32 %v1874_v56, %v152_v38  ;;  %2045 = vadd.xlane.f32.xlu0 %v6243_v11  ;;  %v2091_v12 = vmul.f32 %v6243_v11, %v6243_v11 }
 0x349   :  { %3755 = vst [vmem:[#allocation11 + $0x130] sm:$0xff] %v6247_v25  ;;  %v3965_v29 = vpop.f32.mrb[40].mxu1  ;;  %2047 = vadd.xlane.f32.xlu1 %v6247_v25  ;;  %v2092_v52 = vmul.f32 %v6247_v25, %v6247_v25 }
 0x34a   :  { %v3966_v3 = vpop.f32.mrb[41].mxu1 }
 0x34b   :  { %v3967_v41 = vadd.f32 %v3966_v3, %v3965_v29  ;;  %v3968_v55 = vpop.f32.mrb[42].mxu1  ;;  %2141 = vadd.xlane.f32.xlu0 %v2091_v12 }
 0x34c   :  { %v3969_v40 = vpop.f32.mrb[43].mxu1 }
 0x34d   :  { %v1879_v47 = vadd.f32 %v3967_v41, %v6114_v44  ;;  %v3970_v34 = vadd.f32 %v3969_v40, %v3968_v55  ;;  %2143 = vadd.xlane.f32.xlu1 %v2092_v52  ;;  %v166_v52 = vld [vmem:[#allocation2 + $0x1a0] sm:$0xff] }
 0x34f   :  { %v6257_v15 = vadd.f32 %v1879_v47, %v154_v9  ;;  %v1882_v7 = vadd.f32 %v3970_v34, %v6114_v44 }
 0x351   :  { %3756 = vst [vmem:[#allocation11 + $0x140] sm:$0xff] %v6257_v15  ;;  %v6261_v37 = vadd.f32 %v1882_v7, %v156_v48  ;;  %2049 = vadd.xlane.f32.xlu0 %v6257_v15  ;;  %v2093_v5 = vmul.f32 %v6257_v15, %v6257_v15  ;;  %v168_v48 = vld [vmem:[#allocation2 + $0x1b0] sm:$0xff] }
 0x353   :  { %3757 = vst [vmem:[#allocation11 + $0x150] sm:$0xff] %v6261_v37  ;;  %2051 = vadd.xlane.f32.xlu1 %v6261_v37  ;;  %v2094_v23 = vmul.f32 %v6261_v37, %v6261_v37 }
 0x354   :  { %v3971_v53 = vpop.f32.mrb[44].mxu1 }
 0x355   :  { %v3972_v43 = vpop.f32.mrb[45].mxu1  ;;  %2145 = vadd.xlane.f32.xlu0 %v2093_v5 }
 0x356   :  { %v3973_v20 = vadd.f32 %v3972_v43, %v3971_v53  ;;  %v3974_v24 = vpop.f32.mrb[46].mxu1 }
 0x357   :  { %v3975_v61 = vpop.f32.mrb[47].mxu1  ;;  %2147 = vadd.xlane.f32.xlu1 %v2094_v23 }
 0x358   :  { %v1887_v30 = vadd.f32 %v3973_v20, %v6114_v44  ;;  %v3976_v14 = vadd.f32 %v3975_v61, %v3974_v24  ;;  %v170_v61 = vld [vmem:[#allocation2 + $0x1c0] sm:$0xff] }
 0x35a   :  { %v6271_v33 = vadd.f32 %v1887_v30, %v158_v21  ;;  %v1890_v0 = vadd.f32 %v3976_v14, %v6114_v44 }
 0x35c   :  { %3758 = vst [vmem:[#allocation11 + $0x160] sm:$0xff] %v6271_v33  ;;  %v6275_v62 = vadd.f32 %v1890_v0, %v160_v19  ;;  %v3977_v39 = vpop.f32.mrb[48].mxu1  ;;  %2053 = vadd.xlane.f32.xlu0 %v6271_v33  ;;  %v2095_v60 = vmul.f32 %v6271_v33, %v6271_v33 }
 0x35d   :  { %v3978_v32 = vpop.f32.mrb[49].mxu1 }
 0x35e   :  { %3759 = vst [vmem:[#allocation11 + $0x170] sm:$0xff] %v6275_v62  ;;  %v3979_v13 = vadd.f32 %v3978_v32, %v3977_v39  ;;  %2055 = vadd.xlane.f32.xlu1 %v6275_v62  ;;  %v3980_v2 = vpop.f32.mrb[50].mxu1  ;;  %v2096_v6 = vmul.f32 %v6275_v62, %v6275_v62  ;;  %v172_v39 = vld [vmem:[#allocation2 + $0x1d0] sm:$0xff] }
 0x35f   :  { %v3981_v36 = vpop.f32.mrb[51].mxu1 }
 0x360   :  { %v1895_v45 = vadd.f32 %v3979_v13, %v6114_v44  ;;  %v3982_v18 = vadd.f32 %v3981_v36, %v3980_v2  ;;  %2149 = vadd.xlane.f32.xlu0 %v2095_v60 }
 0x362   :  { %v6285_v59 = vadd.f32 %v1895_v45, %v162_v35  ;;  %v1898_v38 = vadd.f32 %v3982_v18, %v6114_v44  ;;  %2151 = vadd.xlane.f32.xlu1 %v2096_v6 }
 0x364   :  { %3760 = vst [vmem:[#allocation11 + $0x180] sm:$0xff] %v6285_v59  ;;  %v6289_v56 = vadd.f32 %v1898_v38, %v164_v1  ;;  %v3983_v29 = vpop.f32.mrb[52].mxu1  ;;  %2057 = vadd.xlane.f32.xlu0 %v6285_v59  ;;  %v2097_v55 = vmul.f32 %v6285_v59, %v6285_v59  ;;  %v174_v38 = vld [vmem:[#allocation2 + $0x1e0] sm:$0xff] }
 0x365   :  { %v3984_v12 = vpop.f32.mrb[53].mxu1 }
 0x366   :  { %3761 = vst [vmem:[#allocation11 + $0x190] sm:$0xff] %v6289_v56  ;;  %v3985_v3 = vadd.f32 %v3984_v12, %v3983_v29  ;;  %2059 = vadd.xlane.f32.xlu1 %v6289_v56  ;;  %v3986_v41 = vpop.f32.mrb[54].mxu1  ;;  %v2098_v34 = vmul.f32 %v6289_v56, %v6289_v56 }
 0x367   :  { %v3987_v9 = vpop.f32.mrb[55].mxu1 }
 0x368   :  { %v1903_v40 = vadd.f32 %v3985_v3, %v6114_v44  ;;  %v3988_v47 = vadd.f32 %v3987_v9, %v3986_v41  ;;  %2153 = vadd.xlane.f32.xlu0 %v2097_v55 }
 0x36a   :  { %v1951_v7 = vadd.f32 %v1903_v40, %v166_v52  ;;  %v1906_v5 = vadd.f32 %v3988_v47, %v6114_v44  ;;  %2155 = vadd.xlane.f32.xlu1 %v2098_v34  ;;  %v176_v52 = vld [vmem:[#allocation2 + $0x1f0] sm:$0xff] }
 0x36c   :  { %3762 = vst [vmem:[#allocation11 + $0x1a0] sm:$0xff] %v1951_v7  ;;  %v1952_v53 = vadd.f32 %v1906_v5, %v168_v48  ;;  %v3989_v43 = vpop.f32.mrb[56].mxu1  ;;  %2061 = vadd.xlane.f32.xlu0 %v1951_v7  ;;  %v2099_v21 = vmul.f32 %v1951_v7, %v1951_v7 }
 0x36d   :  { %v3990_v23 = vpop.f32.mrb[57].mxu1 }
 0x36e   :  { %3763 = vst [vmem:[#allocation11 + $0x1b0] sm:$0xff] %v1952_v53  ;;  %v3991_v20 = vadd.f32 %v3990_v23, %v3989_v43  ;;  %2063 = vadd.xlane.f32.xlu1 %v1952_v53  ;;  %v3992_v24 = vpop.f32.mrb[58].mxu1  ;;  %v2100_v0 = vmul.f32 %v1952_v53, %v1952_v53 }
 0x36f   :  { %v3993_v30 = vpop.f32.mrb[59].mxu1 }
 0x370   :  { %v1911_v14 = vadd.f32 %v3991_v20, %v6114_v44  ;;  %v3994_v19 = vadd.f32 %v3993_v30, %v3992_v24  ;;  %2157 = vadd.xlane.f32.xlu0 %v2099_v21 }
 0x372   :  { %v1953_v32 = vadd.f32 %v1911_v14, %v170_v61  ;;  %v1914_v13 = vadd.f32 %v3994_v19, %v6114_v44  ;;  %2159 = vadd.xlane.f32.xlu1 %v2100_v0 }
 0x374   :  { %3764 = vst [vmem:[#allocation11 + $0x1c0] sm:$0xff] %v1953_v32  ;;  %v1954_v2 = vadd.f32 %v1914_v13, %v172_v39  ;;  %v3995_v60 = vpop.f32.mrb[60].mxu1  ;;  %2065 = vadd.xlane.f32.xlu0 %v1953_v32  ;;  %v2101_v6 = vmul.f32 %v1953_v32, %v1953_v32 }
 0x375   :  { %v3996_v35 = vpop.f32.mrb[61].mxu1  ;;  %v2010_v36 = vpop.xlane.xlu0 %2009 }
 0x376   :  { %3765 = vst [vmem:[#allocation11 + $0x1d0] sm:$0xff] %v1954_v2  ;;  %v3997_v45 = vadd.f32 %v3996_v35, %v3995_v60  ;;  %2067 = vadd.xlane.f32.xlu1 %v1954_v2  ;;  %v3998_v18 = vpop.f32.mrb[62].mxu1  ;;  %v2169_v1 = vmul.f32 0.0078125, %v2010_v36  ;;  %v2102_v55 = vmul.f32 %v1954_v2, %v1954_v2 }
 0x377   :  { %v3999_v29 = vpop.f32.mrb[63].mxu1  ;;  %v2012_v12 = vpop.xlane.xlu1 %2011 }
 0x378   :  { %v1919_v3 = vadd.f32 %v3997_v45, %v6114_v44  ;;  %v4000_v41 = vadd.f32 %v3999_v29, %v3998_v18  ;;  %2161 = vadd.xlane.f32.xlu0 %v2101_v6  ;;  %v2170_v9 = vmul.f32 0.0078125, %v2012_v12  ;;  %v2233_v48 = vmul.f32 %v2169_v1, %v2169_v1 }
 0x379   :  { %v2106_v40 = vpop.xlane.xlu0 %2105 }
 0x37a   :  { %v1955_v47 = vadd.f32 %v1919_v3, %v174_v38  ;;  %v1922_v34 = vadd.f32 %v4000_v41, %v6114_v44  ;;  %2163 = vadd.xlane.f32.xlu1 %v2102_v55  ;;  %v2201_v7 = vmul.f32 0.0078125, %v2106_v40  ;;  %v2234_v43 = vmul.f32 %v2170_v9, %v2170_v9 }
 0x37b   :  { %v2108_v5 = vpop.xlane.xlu1 %2107  ;;  %v2329_v3 = vsub.f32 %v6117_v31, %v2169_v1 }
 0x37c   :  { %3766 = vst [vmem:[#allocation11 + $0x1e0] sm:$0xff] %v1955_v47  ;;  %v6304_v53 = vadd.f32 %v1922_v34, %v176_v52  ;;  %2069 = vadd.xlane.f32.xlu0 %v1955_v47  ;;  %v2265_v23 = vsub.f32 %v2201_v7, %v2233_v48  ;;  %v2202_v20 = vmul.f32 0.0078125, %v2108_v5  ;;  %v2103_v24 = vmul.f32 %v1955_v47, %v1955_v47  ;;  %v6316_v34 = vld [vmem:[%s7187_s7] ss:$0 sm:$0xff] }
 0x37d   :  { %v2330_v48 = vsub.f32 %v6121_v10, %v2170_v9  ;;  %v6327_v10 = vld [vmem:[%s7188_s8] ss:$0 sm:$0xff] }
 0x37e   :  { %3767 = vst [vmem:[#allocation11 + $0x1f0] sm:$0xff] %v6304_v53  ;;  %2071 = vadd.xlane.f32.xlu1 %v6304_v53  ;;  %v2297_v21 = vmax.f32 %v2265_v23, 0.0  ;;  %v2266_v61 = vsub.f32 %v2202_v20, %v2234_v43  ;;  %v2104_v44 = vmul.f32 %v6304_v53, %v6304_v53 }
 0x380   :  { %2165 = vadd.xlane.f32.xlu0 %v2103_v24  ;;  %v2361_v30 = vadd.f32 1e-05, %v2297_v21  ;;  %v2298_v14 = vmax.f32 %v2266_v61, 0.0  ;;  %v2014_v19 = vpop.xlane.xlu0 %2013 }
 0x381   :  { %v2171_v0 = vmul.f32 0.0078125, %v2014_v19 }
 0x382   :  { %2167 = vadd.xlane.f32.xlu1 %v2104_v44  ;;  %4398 = vrsqrt.f32 %v2361_v30  ;;  %v2362_v39 = vadd.f32 1e-05, %v2298_v14  ;;  %v2016_v32 = vpop.xlane.xlu1 %2015 }
 0x383   :  { %v2172_v13 = vmul.f32 0.0078125, %v2016_v32  ;;  %v2235_v60 = vmul.f32 %v2171_v0, %v2171_v0 }
 0x384   :  { %4400 = vrsqrt.f32 %v2362_v39  ;;  %v2110_v2 = vpop.xlane.xlu0 %2109 }
 0x385   :  { %v2203_v35 = vmul.f32 0.0078125, %v2110_v2  ;;  %v2236_v45 = vmul.f32 %v2172_v13, %v2172_v13 }
 0x386   :  { %v2112_v36 = vpop.xlane.xlu1 %2111 }
 0x387   :  { %v2267_v18 = vsub.f32 %v2203_v35, %v2235_v60  ;;  %v2204_v6 = vmul.f32 0.0078125, %v2112_v36 }
 0x389   :  { %v2299_v38 = vmax.f32 %v2267_v18, 0.0  ;;  %v2268_v29 = vsub.f32 %v2204_v6, %v2236_v45  ;;  %v2331_v18 = vsub.f32 %v6131_v51, %v2171_v0 }
 0x38a   :  { %v2018_v12 = vpop.xlane.xlu0 %2017 }
 0x38b   :  { %v2363_v41 = vadd.f32 1e-05, %v2299_v38  ;;  %v2300_v55 = vmax.f32 %v2268_v29, 0.0  ;;  %v6311_v52 = vmul.f32 0.0078125, %v2018_v12 }
 0x38c   :  { %v4399_v40 = vpop.eup %4398  ;;  %v2020_v47 = vpop.xlane.xlu1 %2019 }
 0x38d   :  { %v2425_v7 = vmul.f32 %v4399_v40, %v2329_v3  ;;  %4402 = vrsqrt.f32 %v2363_v41  ;;  %v2364_v5 = vadd.f32 1e-05, %v2300_v55  ;;  %v2237_v31 = vmul.f32 %v6311_v52, %v6311_v52 }
 0x38e   :  { %v4401_v43 = vpop.eup %4400  ;;  %v6321_v1 = vmul.f32 0.0078125, %v2020_v47  ;;  %v2114_v23 = vpop.xlane.xlu0 %2113  ;;  %v2332_v3 = vsub.f32 %v6135_v16, %v2172_v13  ;;  %v7198_v55 = vmov 0  }
 0x38f   :  { %v2426_v20 = vmul.f32 %v4401_v43, %v2330_v48  ;;  %4404 = vrsqrt.f32 %v2364_v5  ;;  %v2205_v24 = vmul.f32 0.0078125, %v2114_v23  ;;  %v2463_v21 = vmul.f32 %v6316_v34, %v2425_v7 }
 0x390   :  { %v2116_v61 = vpop.xlane.xlu1 %2115  ;;  %v2238_v9 = vmul.f32 %v6321_v1, %v6321_v1 }
 0x391   :  { %v2269_v44 = vsub.f32 %v2205_v24, %v2237_v31  ;;  %v2206_v30 = vmul.f32 0.0078125, %v2116_v61  ;;  %v2464_v14 = vmul.f32 %v6316_v34, %v2426_v20  ;;  %v2501_v32 = vadd.f32 %v6327_v10, %v2463_v21 }
 0x393   :  { %v2301_v19 = vmax.f32 %v2269_v44, 0.0  ;;  %v2270_v39 = vsub.f32 %v2206_v30, %v2238_v9  ;;  %v2502_v2 = vadd.f32 %v6327_v10, %v2464_v14 }
 0x395   :  { %v2365_v60 = vadd.f32 1e-05, %v2301_v19  ;;  %v2302_v35 = vmax.f32 %v2270_v39, 0.0  ;;  %v2022_v36 = vpop.xlane.xlu0 %2021  ;;  %v2533_v45 = vpack.c.bf16 %v2502_v2, %v2501_v32  ;;  %v2333_v32 = vsub.f32 %v6145_v17, %v6311_v52 }
 0x396   :  { %v6335_v6 = vmul.f32 0.0078125, %v2022_v36 }
 0x397   :  { %v4403_v38 = vpop.eup %4402  ;;  %4406 = vrsqrt.f32 %v2365_v60  ;;  %v2366_v29 = vadd.f32 1e-05, %v2302_v35  ;;  %v2024_v12 = vpop.xlane.xlu1 %2023  ;;  %2673 = vmatmul.mubr.bf16.vlgmr.msra.gmra.mrb[64].mxu0 %v2533_v45  ;;  %v2334_v60 = vsub.f32 %v6149_v42, %v6321_v1 }
 0x398   :  { %v6338_v41 = vmul.f32 0.0078125, %v2024_v12  ;;  %2682 = vmatprep.mubr.bf16.mxu0 %v7198_v55  ;;  %v2427_v40 = vmul.f32 %v4403_v38, %v2331_v18  ;;  %v2239_v51 = vmul.f32 %v6335_v6, %v6335_v6 }
 0x399   :  { %v4405_v47 = vpop.eup %4404  ;;  %4408 = vrsqrt.f32 %v2366_v29  ;;  %v2118_v48 = vpop.xlane.xlu0 %2117  ;;  %v4190_v29 = vld [vmem:[#allocation10 + $0x40] sm:$0xff]  }
 0x39a   :  { %v2207_v0 = vmul.f32 0.0078125, %v2118_v48  ;;  %v2428_v7 = vmul.f32 %v4405_v47, %v2332_v3  ;;  %v2465_v43 = vmul.f32 %v6316_v34, %v2427_v40  ;;  %v2240_v31 = vmul.f32 %v6338_v41, %v6338_v41  ;;  %v4191_v3 = vld [vmem:[#allocation10] sm:$0xff]   ;;  %4001 = vmatprep.subr.bf16.mxu1 %v4190_v29 }
 0x39b   :  { %v2120_v5 = vpop.xlane.xlu1 %2119  ;;  %4002 = vmatpush3.bf16.msra.mxu1 %v4191_v3  ;;  %v4197_v3 = vld [vmem:[#allocation10 + $0x18] sm:$0xff]  }
 0x39c   :  { %v2271_v16 = vsub.f32 %v2207_v0, %v2239_v51  ;;  %v2208_v13 = vmul.f32 0.0078125, %v2120_v5  ;;  %v2466_v23 = vmul.f32 %v6316_v34, %v2428_v7  ;;  %v2503_v21 = vadd.f32 %v6327_v10, %v2465_v43 }
 0x39e   :  { %v2303_v20 = vmax.f32 %v2271_v16, 0.0  ;;  %v2272_v24 = vsub.f32 %v2208_v13, %v2240_v31  ;;  %v2504_v61 = vadd.f32 %v6327_v10, %v2466_v23 }
 0x39f   :  { %v2026_v9 = vpop.xlane.xlu0 %2025 }
 0x3a0   :  { %v2367_v44 = vadd.f32 1e-05, %v2303_v20  ;;  %v2304_v30 = vmax.f32 %v2272_v24, 0.0  ;;  %v6349_v14 = vmul.f32 0.0078125, %v2026_v9  ;;  %v2534_v19 = vpack.c.bf16 %v2504_v61, %v2503_v21  ;;  %v4192_v21 = vld [vmem:[#allocation10 + $0x48] sm:$0xff]   ;;  %v4194_v9 = vld [vmem:[#allocation10 + $0x50] sm:$0xff]  }
 0x3a1   :  { %v4407_v39 = vpop.eup %4406  ;;  %v2028_v2 = vpop.xlane.xlu1 %2027  ;;  %v2335_v20 = vsub.f32 %v6159_v46, %v6335_v6  ;;  %v4193_v61 = vld [vmem:[#allocation10 + $0x8] sm:$0xff]   ;;  %4003 = vmatprep.subr.bf16.mxu1 %v4192_v21 }
 0x3a2   :  { %4410 = vrsqrt.f32 %v2367_v44  ;;  %v2368_v35 = vadd.f32 1e-05, %v2304_v30  ;;  %2683 = vmatmul.mubr.bf16.gmra.mrb[68].mxu0 %v2534_v19  ;;  %v6355_v45 = vmul.f32 0.0078125, %v2028_v2  ;;  %v2429_v38 = vmul.f32 %v4407_v39, %v2333_v32  ;;  %4004 = vmatpush3.bf16.msra.mxu1 %v4193_v61  ;;  %v4200_v61 = vld [vmem:[#allocation10 + $0x68] sm:$0xff]  }
 0x3a3   :  { %v4409_v36 = vpop.eup %4408  ;;  %v2122_v18 = vpop.xlane.xlu0 %2121  ;;  %2692 = vmatprep.mubr.bf16.mxu0 %v7198_v55  ;;  %v2241_v12 = vmul.f32 %v6349_v14, %v6349_v14  ;;  %v2336_v39 = vsub.f32 %v6163_v58, %v6338_v41  ;;  %4005 = vmatprep.subr.bf16.mxu1 %v4194_v9 }
 0x3a4   :  { %4412 = vrsqrt.f32 %v2368_v35  ;;  %v2209_v17 = vmul.f32 0.0078125, %v2122_v18  ;;  %v2430_v52 = vmul.f32 %v4409_v36, %v2334_v60  ;;  %v2467_v42 = vmul.f32 %v6316_v34, %v2429_v38  ;;  %v4195_v60 = vld [vmem:[#allocation10 + $0x10] sm:$0xff]   ;;  %v4196_v38 = vld [vmem:[#allocation10 + $0x58] sm:$0xff]  }
 0x3a5   :  { %v2124_v40 = vpop.xlane.xlu1 %2123  ;;  %v2242_v1 = vmul.f32 %v6355_v45, %v6355_v45 }
 0x3a6   :  { %v2273_v47 = vsub.f32 %v2209_v17, %v2241_v12  ;;  %v2210_v48 = vmul.f32 0.0078125, %v2124_v40  ;;  %v2468_v51 = vmul.f32 %v6316_v34, %v2430_v52  ;;  %v2505_v5 = vadd.f32 %v6327_v10, %v2467_v42  ;;  %4006 = vmatpush3.bf16.msra.mxu1 %v4195_v60 }
 0x3a7   :  { %4007 = vmatprep.subr.bf16.mxu1 %v4196_v38 }
 0x3a8   :  { %v2305_v0 = vmax.f32 %v2273_v47, 0.0  ;;  %v2274_v7 = vsub.f32 %v2210_v48, %v2242_v1  ;;  %v2506_v43 = vadd.f32 %v6327_v10, %v2468_v51  ;;  %v4198_v48 = vld [vmem:[#allocation10 + $0x60] sm:$0xff]  }
 0x3aa   :  { %v2369_v31 = vadd.f32 1e-05, %v2305_v0  ;;  %v2306_v16 = vmax.f32 %v2274_v7, 0.0  ;;  %v2030_v13 = vpop.xlane.xlu0 %2029  ;;  %v2535_v23 = vpack.c.bf16 %v2506_v43, %v2505_v5  ;;  %4008 = vmatpush3.bf16.msra.mxu1 %v4197_v3 }
 0x3ab   :  { %v6368_v24 = vmul.f32 0.0078125, %v2030_v13  ;;  %4009 = vmatprep.subr.bf16.mxu1 %v4198_v48 }
 0x3ac   :  { %v4411_v44 = vpop.eup %4410  ;;  %4414 = vrsqrt.f32 %v2369_v31  ;;  %v2370_v30 = vadd.f32 1e-05, %v2306_v16  ;;  %v2032_v19 = vpop.xlane.xlu1 %2031  ;;  %2693 = vmatmul.mubr.bf16.gmra.mrb[72].mxu0 %v2535_v23  ;;  %v2337_v16 = vsub.f32 %v6173_v57, %v6349_v14  ;;  %v4199_v23 = vld [vmem:[#allocation10 + $0x20] sm:$0xff]  }
 0x3ad   :  { %v6372_v32 = vmul.f32 0.0078125, %v2032_v19  ;;  %2702 = vmatprep.mubr.bf16.mxu0 %v7198_v55  ;;  %v2431_v2 = vmul.f32 %v4411_v44, %v2335_v20  ;;  %v2243_v35 = vmul.f32 %v6368_v24, %v6368_v24  ;;  %v2338_v20 = vsub.f32 %v6177_v28, %v6355_v45  ;;  %v4201_v45 = vld [vmem:[#allocation10 + $0x28] sm:$0xff]  }
 0x3ae   :  { %v4413_v46 = vpop.eup %4412  ;;  %4416 = vrsqrt.f32 %v2370_v30  ;;  %v2126_v6 = vpop.xlane.xlu0 %2125  ;;  %4010 = vmatpush3.bf16.msra.mxu1 %v4199_v23 }
 0x3af   :  { %v2211_v36 = vmul.f32 0.0078125, %v2126_v6  ;;  %v2432_v18 = vmul.f32 %v4413_v46, %v2336_v39  ;;  %v2469_v58 = vmul.f32 %v6316_v34, %v2431_v2  ;;  %v2244_v41 = vmul.f32 %v6372_v32, %v6372_v32  ;;  %4011 = vmatprep.subr.bf16.mxu1 %v4200_v61 }
 0x3b0   :  { %v2128_v29 = vpop.xlane.xlu1 %2127 }
 0x3b1   :  { %v2275_v12 = vsub.f32 %v2211_v36, %v2243_v35  ;;  %v2212_v17 = vmul.f32 0.0078125, %v2128_v29  ;;  %v2470_v52 = vmul.f32 %v6316_v34, %v2432_v18  ;;  %v2507_v1 = vadd.f32 %v6327_v10, %v2469_v58 }
 0x3b2   :  { %4012 = vmatpush3.bf16.msra.mxu1 %v4201_v45 }
 0x3b3   :  { %v2307_v40 = vmax.f32 %v2275_v12, 0.0  ;;  %v2276_v42 = vsub.f32 %v2212_v17, %v2244_v41  ;;  %v2508_v47 = vadd.f32 %v6327_v10, %v2470_v52  ;;  %v2339_v52 = vsub.f32 %v6187_v54, %v6368_v24 }
 0x3b4   :  { %v2034_v51 = vpop.xlane.xlu0 %2033 }
 0x3b5   :  { %v2371_v0 = vadd.f32 1e-05, %v2307_v40  ;;  %v2308_v7 = vmax.f32 %v2276_v42, 0.0  ;;  %v6383_v5 = vmul.f32 0.0078125, %v2034_v51  ;;  %v2536_v43 = vpack.c.bf16 %v2508_v47, %v2507_v1 }
 0x3b6   :  { %v4415_v31 = vpop.eup %4414  ;;  %v2036_v13 = vpop.xlane.xlu1 %2035  ;;  %v2340_v47 = vsub.f32 %v6191_v8, %v6372_v32 }
 0x3b7   :  { %4418 = vrsqrt.f32 %v2371_v0  ;;  %v2372_v21 = vadd.f32 1e-05, %v2308_v7  ;;  %2703 = vmatmul.mubr.bf16.gmra.mrb[76].mxu0 %v2536_v43  ;;  %v6389_v44 = vmul.f32 0.0078125, %v2036_v13  ;;  %v2433_v19 = vmul.f32 %v4415_v31, %v2337_v16 }
 0x3b8   :  { %v4417_v9 = vpop.eup %4416  ;;  %v2130_v30 = vpop.xlane.xlu0 %2129  ;;  %2712 = vmatprep.mubr.bf16.mxu0 %v7198_v55  ;;  %v2245_v57 = vmul.f32 %v6383_v5, %v6383_v5 }
 0x3b9   :  { %4420 = vrsqrt.f32 %v2372_v21  ;;  %v2213_v14 = vmul.f32 0.0078125, %v2130_v30  ;;  %v2434_v39 = vmul.f32 %v4417_v9, %v2338_v20  ;;  %v2471_v28 = vmul.f32 %v6316_v34, %v2433_v19 }
 0x3ba   :  { %v2132_v2 = vpop.xlane.xlu1 %2131  ;;  %v2246_v46 = vmul.f32 %v6389_v44, %v6389_v44 }
 0x3bb   :  { %v2277_v6 = vsub.f32 %v2213_v14, %v2245_v57  ;;  %v2214_v60 = vmul.f32 0.0078125, %v2132_v2  ;;  %v2472_v35 = vmul.f32 %v6316_v34, %v2434_v39  ;;  %v2509_v38 = vadd.f32 %v6327_v10, %v2471_v28 }
 0x3bc   :  { %v2341_v28 = vsub.f32 %v6201_v50, %v6383_v5 }
 0x3bd   :  { %v2309_v36 = vmax.f32 %v2277_v6, 0.0  ;;  %v2278_v18 = vsub.f32 %v2214_v60, %v2246_v46  ;;  %v2510_v29 = vadd.f32 %v6327_v10, %v2472_v35  ;;  %v2342_v46 = vsub.f32 %v6205_v4, %v6389_v44 }
 0x3bf   :  { %v2373_v58 = vadd.f32 1e-05, %v2309_v36  ;;  %v2310_v41 = vmax.f32 %v2278_v18, 0.0  ;;  %v2038_v12 = vpop.xlane.xlu0 %2037  ;;  %v2537_v17 = vpack.c.bf16 %v2510_v29, %v2509_v38 }
 0x3c0   :  { %v6402_v3 = vmul.f32 0.0078125, %v2038_v12 }
 0x3c1   :  { %v4419_v40 = vpop.eup %4418  ;;  %4422 = vrsqrt.f32 %v2373_v58  ;;  %v2374_v42 = vadd.f32 1e-05, %v2310_v41  ;;  %v2040_v1 = vpop.xlane.xlu1 %2039  ;;  %2713 = vmatmul.mubr.bf16.gmra.mrb[80].mxu0 %v2537_v17 }
 0x3c2   :  { %v6406_v48 = vmul.f32 0.0078125, %v2040_v1  ;;  %2722 = vmatprep.mubr.bf16.mxu0 %v7198_v55  ;;  %v2435_v51 = vmul.f32 %v4419_v40, %v2339_v52  ;;  %v2247_v54 = vmul.f32 %v6402_v3, %v6402_v3 }
 0x3c3   :  { %v4421_v0 = vpop.eup %4420  ;;  %4424 = vrsqrt.f32 %v2374_v42  ;;  %v2134_v7 = vpop.xlane.xlu0 %2133 }
 0x3c4   :  { %v2215_v24 = vmul.f32 0.0078125, %v2134_v7  ;;  %v2436_v43 = vmul.f32 %v4421_v0, %v2340_v47  ;;  %v2473_v16 = vmul.f32 %v6316_v34, %v2435_v51  ;;  %v2248_v13 = vmul.f32 %v6406_v48, %v6406_v48 }
 0x3c5   :  { %v2136_v31 = vpop.xlane.xlu1 %2135  ;;  %v2343_v7 = vsub.f32 %v6215_v22, %v6402_v3 }
 0x3c6   :  { %v2279_v8 = vsub.f32 %v2215_v24, %v2247_v54  ;;  %v2216_v32 = vmul.f32 0.0078125, %v2136_v31  ;;  %v2474_v23 = vmul.f32 %v6316_v34, %v2436_v43  ;;  %v2511_v61 = vadd.f32 %v6327_v10, %v2473_v16 }
 0x3c7   :  { %v2344_v16 = vsub.f32 %v6219_v49, %v6406_v48 }
 0x3c8   :  { %v2311_v20 = vmax.f32 %v2279_v8, 0.0  ;;  %v2280_v21 = vsub.f32 %v2216_v32, %v2248_v13  ;;  %v2512_v9 = vadd.f32 %v6327_v10, %v2474_v23 }
 0x3c9   :  { %v2042_v30 = vpop.xlane.xlu0 %2041 }
 0x3ca   :  { %v2375_v19 = vadd.f32 1e-05, %v2311_v20  ;;  %v2312_v57 = vmax.f32 %v2280_v21, 0.0  ;;  %v6417_v14 = vmul.f32 0.0078125, %v2042_v30  ;;  %v2538_v39 = vpack.c.bf16 %v2512_v9, %v2511_v61 }
 0x3cb   :  { %v4423_v2 = vpop.eup %4422  ;;  %v2044_v45 = vpop.xlane.xlu1 %2043 }
 0x3cc   :  { %4426 = vrsqrt.f32 %v2375_v19  ;;  %v2376_v6 = vadd.f32 1e-05, %v2312_v57  ;;  %2723 = vmatmul.mubr.bf16.gmra.mrb[84].mxu0 %v2538_v39  ;;  %v6423_v35 = vmul.f32 0.0078125, %v2044_v45  ;;  %v2437_v18 = vmul.f32 %v4423_v2, %v2341_v28 }
 0x3cd   :  { %v4425_v60 = vpop.eup %4424  ;;  %v2138_v36 = vpop.xlane.xlu0 %2137  ;;  %2732 = vmatprep.mubr.bf16.mxu0 %v7198_v55  ;;  %v2249_v38 = vmul.f32 %v6417_v14, %v6417_v14 }
 0x3ce   :  { %4428 = vrsqrt.f32 %v2376_v6  ;;  %v2217_v29 = vmul.f32 0.0078125, %v2138_v36  ;;  %v2438_v50 = vmul.f32 %v4425_v60, %v2342_v46  ;;  %v2475_v58 = vmul.f32 %v6316_v34, %v2437_v18 }
 0x3cf   :  { %v2140_v5 = vpop.xlane.xlu1 %2139  ;;  %v2250_v4 = vmul.f32 %v6423_v35, %v6423_v35  ;;  %v2345_v18 = vsub.f32 %v6229_v63, %v6417_v14 }
 0x3d0   :  { %v2281_v44 = vsub.f32 %v2217_v29, %v2249_v38  ;;  %v2218_v41 = vmul.f32 0.0078125, %v2140_v5  ;;  %v2476_v12 = vmul.f32 %v6316_v34, %v2438_v50  ;;  %v2513_v40 = vadd.f32 %v6327_v10, %v2475_v58 }
 0x3d1   :  { %v2346_v29 = vsub.f32 %v6233_v26, %v6423_v35 }
 0x3d2   :  { %v2313_v17 = vmax.f32 %v2281_v44, 0.0  ;;  %v2282_v52 = vsub.f32 %v2218_v41, %v2250_v4  ;;  %v2514_v42 = vadd.f32 %v6327_v10, %v2476_v12 }
 0x3d4   :  { %v2377_v1 = vadd.f32 1e-05, %v2313_v17  ;;  %v2314_v47 = vmax.f32 %v2282_v52, 0.0  ;;  %v2046_v51 = vpop.xlane.xlu0 %2045  ;;  %v2539_v0 = vpack.c.bf16 %v2514_v42, %v2513_v40 }
 0x3d5   :  { %v6436_v54 = vmul.f32 0.0078125, %v2046_v51 }
 0x3d6   :  { %v4427_v24 = vpop.eup %4426  ;;  %4430 = vrsqrt.f32 %v2377_v1  ;;  %v2378_v43 = vadd.f32 1e-05, %v2314_v47  ;;  %v2048_v31 = vpop.xlane.xlu1 %2047  ;;  %2733 = vmatmul.mubr.bf16.gmra.mrb[88].mxu0 %v2539_v0 }
 0x3d7   :  { %v6440_v13 = vmul.f32 0.0078125, %v2048_v31  ;;  %2742 = vmatprep.mubr.bf16.mxu0 %v7198_v55  ;;  %v2439_v8 = vmul.f32 %v4427_v24, %v2343_v7  ;;  %v2251_v22 = vmul.f32 %v6436_v54, %v6436_v54  ;;  %v2347_v31 = vsub.f32 %v6243_v11, %v6436_v54 }
 0x3d8   :  { %v4429_v32 = vpop.eup %4428  ;;  %4432 = vrsqrt.f32 %v2378_v43  ;;  %v2142_v23 = vpop.xlane.xlu0 %2141 }
 0x3d9   :  { %v2219_v3 = vmul.f32 0.0078125, %v2142_v23  ;;  %v2440_v20 = vmul.f32 %v4429_v32, %v2344_v16  ;;  %v2477_v61 = vmul.f32 %v6316_v34, %v2439_v8  ;;  %v2252_v9 = vmul.f32 %v6440_v13, %v6440_v13 }
 0x3da   :  { %v2144_v21 = vpop.xlane.xlu1 %2143 }
 0x3db   :  { %v2283_v49 = vsub.f32 %v2219_v3, %v2251_v22  ;;  %v2220_v48 = vmul.f32 0.0078125, %v2144_v21  ;;  %v2478_v30 = vmul.f32 %v6316_v34, %v2440_v20  ;;  %v2515_v39 = vadd.f32 %v6327_v10, %v2477_v61 }
 0x3dc   :  { %v2348_v22 = vsub.f32 %v6247_v25, %v6440_v13 }
 0x3dd   :  { %v2315_v19 = vmax.f32 %v2283_v49, 0.0  ;;  %v2284_v57 = vsub.f32 %v2220_v48, %v2252_v9  ;;  %v2516_v2 = vadd.f32 %v6327_v10, %v2478_v30 }
 0x3de   :  { %v2050_v28 = vpop.xlane.xlu0 %2049 }
 0x3df   :  { %v2379_v45 = vadd.f32 1e-05, %v2315_v19  ;;  %v2316_v46 = vmax.f32 %v2284_v57, 0.0  ;;  %v6451_v6 = vmul.f32 0.0078125, %v2050_v28  ;;  %v2540_v60 = vpack.c.bf16 %v2516_v2, %v2515_v39 }
 0x3e0   :  { %v4431_v36 = vpop.eup %4430  ;;  %v2052_v38 = vpop.xlane.xlu1 %2051 }
 0x3e1   :  { %4434 = vrsqrt.f32 %v2379_v45  ;;  %v2380_v50 = vadd.f32 1e-05, %v2316_v46  ;;  %2743 = vmatmul.mubr.bf16.gmra.mrb[92].mxu0 %v2540_v60  ;;  %v6457_v58 = vmul.f32 0.0078125, %v2052_v38  ;;  %v2441_v44 = vmul.f32 %v4431_v36, %v2345_v18 }
 0x3e2   :  { %v4433_v5 = vpop.eup %4432  ;;  %v2146_v4 = vpop.xlane.xlu0 %2145  ;;  %2752 = vmatprep.mubr.bf16.mxu0 %v7198_v55  ;;  %v2253_v41 = vmul.f32 %v6451_v6, %v6451_v6  ;;  %v2349_v36 = vsub.f32 %v6257_v15, %v6451_v6 }
 0x3e3   :  { %4436 = vrsqrt.f32 %v2380_v50  ;;  %v2221_v12 = vmul.f32 0.0078125, %v2146_v4  ;;  %v2442_v63 = vmul.f32 %v4433_v5, %v2346_v29  ;;  %v2479_v17 = vmul.f32 %v6316_v34, %v2441_v44 }
 0x3e4   :  { %v2148_v14 = vpop.xlane.xlu1 %2147  ;;  %v2254_v26 = vmul.f32 %v6457_v58, %v6457_v58  ;;  %v2350_v50 = vsub.f32 %v6261_v37, %v6457_v58 }
 0x3e5   :  { %v2285_v35 = vsub.f32 %v2221_v12, %v2253_v41  ;;  %v2222_v52 = vmul.f32 0.0078125, %v2148_v14  ;;  %v2480_v40 = vmul.f32 %v6316_v34, %v2442_v63  ;;  %v2517_v47 = vadd.f32 %v6327_v10, %v2479_v17 }
 0x3e7   :  { %v2317_v42 = vmax.f32 %v2285_v35, 0.0  ;;  %v2286_v1 = vsub.f32 %v2222_v52, %v2254_v26  ;;  %v2518_v51 = vadd.f32 %v6327_v10, %v2480_v40 }
 0x3e9   :  { %v2381_v0 = vadd.f32 1e-05, %v2317_v42  ;;  %v2318_v7 = vmax.f32 %v2286_v1, 0.0  ;;  %v2054_v24 = vpop.xlane.xlu0 %2053  ;;  %v2541_v43 = vpack.c.bf16 %v2518_v51, %v2517_v47 }
 0x3ea   :  { %v6470_v16 = vmul.f32 0.0078125, %v2054_v24 }
 0x3eb   :  { %v4435_v8 = vpop.eup %4434  ;;  %4438 = vrsqrt.f32 %v2381_v0  ;;  %v2382_v32 = vadd.f32 1e-05, %v2318_v7  ;;  %v2056_v23 = vpop.xlane.xlu1 %2055  ;;  %2753 = vmatmul.mubr.bf16.gmra.mrb[96].mxu0 %v2541_v43 }
 0x3ec   :  { %v6474_v3 = vmul.f32 0.0078125, %v2056_v23  ;;  %2762 = vmatprep.mubr.bf16.mxu0 %v7198_v55  ;;  %v2443_v20 = vmul.f32 %v4435_v8, %v2347_v31  ;;  %v2255_v11 = vmul.f32 %v6470_v16, %v6470_v16 }
 0x3ed   :  { %v4437_v21 = vpop.eup %4436  ;;  %4440 = vrsqrt.f32 %v2382_v32  ;;  %v2150_v61 = vpop.xlane.xlu0 %2149 }
 0x3ee   :  { %v2223_v54 = vmul.f32 0.0078125, %v2150_v61  ;;  %v2444_v9 = vmul.f32 %v4437_v21, %v2348_v22  ;;  %v2481_v48 = vmul.f32 %v6316_v34, %v2443_v20  ;;  %v2256_v30 = vmul.f32 %v6474_v3, %v6474_v3 }
 0x3ef   :  { %v2152_v49 = vpop.xlane.xlu1 %2151  ;;  %v2351_v20 = vsub.f32 %v6271_v33, %v6470_v16 }
 0x3f0   :  { %v2287_v25 = vsub.f32 %v2223_v54, %v2255_v11  ;;  %v2224_v13 = vmul.f32 0.0078125, %v2152_v49  ;;  %v2482_v19 = vmul.f32 %v6316_v34, %v2444_v9  ;;  %v2519_v60 = vadd.f32 %v6327_v10, %v2481_v48 }
 0x3f1   :  { %v2058_v57 = vpop.xlane.xlu0 %2057  ;;  %v2352_v48 = vsub.f32 %v6275_v62, %v6474_v3 }
 0x3f2   :  { %v2319_v39 = vmax.f32 %v2287_v25, 0.0  ;;  %v2288_v2 = vsub.f32 %v2224_v13, %v2256_v30  ;;  %v6483_v28 = vmul.f32 0.0078125, %v2058_v57  ;;  %v2520_v45 = vadd.f32 %v6327_v10, %v2482_v19 }
 0x3f3   :  { %v2060_v46 = vpop.xlane.xlu1 %2059 }
 0x3f4   :  { %v2383_v18 = vadd.f32 1e-05, %v2319_v39  ;;  %v2320_v38 = vmax.f32 %v2288_v2, 0.0  ;;  %v2257_v5 = vmul.f32 %v6483_v28, %v6483_v28  ;;  %v6493_v4 = vmul.f32 0.0078125, %v2060_v46 }
 0x3f5   :  { %v4439_v29 = vpop.eup %4438  ;;  %v2154_v44 = vpop.xlane.xlu0 %2153  ;;  %v2542_v41 = vpack.c.bf16 %v2520_v45, %v2519_v60 }
 0x3f6   :  { %4442 = vrsqrt.f32 %v2383_v18  ;;  %v2384_v12 = vadd.f32 1e-05, %v2320_v38  ;;  %v2225_v63 = vmul.f32 0.0078125, %v2154_v44  ;;  %v2445_v14 = vmul.f32 %v4439_v29, %v2349_v36 }
 0x3f7   :  { %v4441_v17 = vpop.eup %4440  ;;  %v2258_v15 = vmul.f32 %v6493_v4, %v6493_v4  ;;  %v2156_v6 = vpop.xlane.xlu1 %2155  ;;  %2763 = vmatmul.mubr.bf16.gmra.mrb[100].mxu0 %v2542_v41  ;;  %v2353_v29 = vsub.f32 %v6285_v59, %v6483_v28 }
 0x3f8   :  { %4444 = vrsqrt.f32 %v2384_v12  ;;  %v2289_v26 = vsub.f32 %v2225_v63, %v2257_v5  ;;  %v2226_v37 = vmul.f32 0.0078125, %v2156_v6  ;;  %2772 = vmatprep.mubr.bf16.mxu0 %v7198_v55  ;;  %v2446_v58 = vmul.f32 %v4441_v17, %v2350_v50 }
 0x3f9   :  { %v2062_v35 = vpop.xlane.xlu0 %2061  ;;  %v2483_v52 = vmul.f32 %v6316_v34, %v2445_v14  ;;  %v2354_v17 = vsub.f32 %v6289_v56, %v6493_v4 }
 0x3fa   :  { %v2321_v40 = vmax.f32 %v2289_v26, 0.0  ;;  %v2290_v42 = vsub.f32 %v2226_v37, %v2258_v15  ;;  %v6499_v1 = vmul.f32 0.0078125, %v2062_v35  ;;  %v2484_v47 = vmul.f32 %v6316_v34, %v2446_v58  ;;  %v4202_v35 = vld [vmem:[#allocation10 + $0x70] sm:$0xff]  }
 0x3fb   :  { %v2064_v51 = vpop.xlane.xlu1 %2063  ;;  %v2521_v31 = vadd.f32 %v6327_v10, %v2483_v52  ;;  %v4203_v52 = vld [vmem:[#allocation10 + $0x30] sm:$0xff]   ;;  %4013 = vmatprep.subr.bf16.mxu1 %v4202_v35 }
 0x3fc   :  { %v2385_v0 = vadd.f32 1e-05, %v2321_v40  ;;  %v2322_v7 = vmax.f32 %v2290_v42, 0.0  ;;  %v6502_v24 = vmul.f32 0.0078125, %v2064_v51  ;;  %v2522_v8 = vadd.f32 %v6327_v10, %v2484_v47  ;;  %4014 = vmatpush3.bf16.msra.mxu1 %v4203_v52 }
 0x3fd   :  { %v2158_v43 = vpop.xlane.xlu0 %2157  ;;  %v2259_v23 = vmul.f32 %v6499_v1, %v6499_v1 }
 0x3fe   :  { %4446 = vrsqrt.f32 %v2385_v0  ;;  %v2386_v32 = vadd.f32 1e-05, %v2322_v7  ;;  %v2227_v22 = vmul.f32 0.0078125, %v2158_v43  ;;  %v2543_v61 = vpack.c.bf16 %v2522_v8, %v2521_v31 }
 0x3ff   :  { %v2160_v21 = vpop.xlane.xlu1 %2159  ;;  %v2260_v54 = vmul.f32 %v6502_v24, %v6502_v24 }
 0x400   :  { %v4443_v11 = vpop.eup %4442  ;;  %4448 = vrsqrt.f32 %v2386_v32  ;;  %v2291_v9 = vsub.f32 %v2227_v22, %v2259_v23  ;;  %v2228_v49 = vmul.f32 0.0078125, %v2160_v21  ;;  %2773 = vmatmul.mubr.bf16.gmra.mrb[104].mxu0 %v2543_v61  ;;  %v4591_v32 = vld [vmem:[#allocation11 + $0x1a0] sm:$0xff] }
 0x401   :  { %v2066_v30 = vpop.xlane.xlu0 %2065  ;;  %v2447_v25 = vmul.f32 %v4443_v11, %v2351_v20  ;;  %2782 = vmatprep.mubr.bf16.mxu0 %v7198_v55  ;;  %v2355_v23 = vsub.f32 %v4591_v32, %v6499_v1 }
 0x402   :  { %v4445_v13 = vpop.eup %4444  ;;  %v2323_v19 = vmax.f32 %v2291_v9, 0.0  ;;  %v2292_v57 = vsub.f32 %v2228_v49, %v2260_v54  ;;  %v6514_v39 = vmul.f32 0.0078125, %v2066_v30  ;;  %v4592_v49 = vld [vmem:[#allocation11 + $0x1b0] sm:$0xff] }
 0x403   :  { %v2068_v33 = vpop.xlane.xlu1 %2067  ;;  %v2448_v16 = vmul.f32 %v4445_v13, %v2352_v48  ;;  %v2485_v2 = vmul.f32 %v6316_v34, %v2447_v25  ;;  %v2356_v48 = vsub.f32 %v4592_v49, %v6502_v24  ;;  %v4204_v13 = vld [vmem:[#allocation10 + $0x78] sm:$0xff]  }
 0x404   :  { %v2387_v45 = vadd.f32 1e-05, %v2323_v19  ;;  %v2324_v46 = vmax.f32 %v2292_v57, 0.0  ;;  %v6518_v60 = vmul.f32 0.0078125, %v2068_v33  ;;  %v2261_v18 = vmul.f32 %v6514_v39, %v6514_v39  ;;  %v4205_v19 = vld [vmem:[#allocation10 + $0x38] sm:$0xff]   ;;  %4015 = vmatprep.subr.bf16.mxu1 %v4204_v13 }
 0x405   :  { %v2162_v36 = vpop.xlane.xlu0 %2161  ;;  %v2486_v62 = vmul.f32 %v6316_v34, %v2448_v16  ;;  %v2523_v5 = vadd.f32 %v6327_v10, %v2485_v2  ;;  %4016 = vmatpush3.bf16.msra.mxu1 %v4205_v19 }
 0x406   :  { %4450 = vrsqrt.f32 %v2387_v45  ;;  %v2388_v3 = vadd.f32 1e-05, %v2324_v46  ;;  %v2229_v38 = vmul.f32 0.0078125, %v2162_v36  ;;  %v2262_v12 = vmul.f32 %v6518_v60, %v6518_v60 }
 0x407   :  { %v2164_v50 = vpop.xlane.xlu1 %2163  ;;  %v2524_v44 = vadd.f32 %v6327_v10, %v2486_v62  ;;  %v4593_v62 = vld [vmem:[#allocation11 + $0x1c0] sm:$0xff] }
 0x408   :  { %v4447_v41 = vpop.eup %4446  ;;  %4452 = vrsqrt.f32 %v2388_v3  ;;  %v2293_v63 = vsub.f32 %v2229_v38, %v2261_v18  ;;  %v2230_v14 = vmul.f32 0.0078125, %v2164_v50  ;;  %v2357_v3 = vsub.f32 %v4593_v62, %v6514_v39  ;;  %v4594_v50 = vld [vmem:[#allocation11 + $0x1d0] sm:$0xff] }
 0x409   :  { %v2070_v15 = vpop.xlane.xlu0 %2069  ;;  %v2544_v6 = vpack.c.bf16 %v2524_v44, %v2523_v5  ;;  %v2449_v26 = vmul.f32 %v4447_v41, %v2353_v29  ;;  %v2358_v5 = vsub.f32 %v4594_v50, %v6518_v60 }
 0x40a   :  { %v4449_v37 = vpop.eup %4448  ;;  %v2325_v59 = vmax.f32 %v2293_v63, 0.0  ;;  %v2294_v28 = vsub.f32 %v2230_v14, %v2262_v12  ;;  %v6531_v58 = vmul.f32 0.0078125, %v2070_v15 }
 0x40b   :  { %v2072_v40 = vpop.xlane.xlu1 %2071  ;;  %2783 = vmatmul.mubr.bf16.gmra.mrb[108].mxu0 %v2544_v6  ;;  %v2450_v42 = vmul.f32 %v4449_v37, %v2354_v17  ;;  %v2487_v47 = vmul.f32 %v6316_v34, %v2449_v26  ;;  %v4595_v17 = vld [vmem:[#allocation11 + $0x1e0] sm:$0xff] }
 0x40c   :  { %v2389_v51 = vadd.f32 1e-05, %v2325_v59  ;;  %v2326_v0 = vmax.f32 %v2294_v28, 0.0  ;;  %2792 = vmatprep.mubr.bf16.mxu0 %v7198_v55  ;;  %v6535_v56 = vmul.f32 0.0078125, %v2072_v40  ;;  %v2263_v31 = vmul.f32 %v6531_v58, %v6531_v58 }
 0x40d   :  { %v2166_v4 = vpop.xlane.xlu0 %2165  ;;  %v2488_v7 = vmul.f32 %v6316_v34, %v2450_v42  ;;  %v2525_v20 = vadd.f32 %v6327_v10, %v2487_v47  ;;  %v2359_v15 = vsub.f32 %v4595_v17, %v6531_v58 }
 0x40e   :  { %4454 = vrsqrt.f32 %v2389_v51  ;;  %v2390_v43 = vadd.f32 1e-05, %v2326_v0  ;;  %v2231_v8 = vmul.f32 0.0078125, %v2166_v4  ;;  %v2264_v11 = vmul.f32 %v6535_v56, %v6535_v56 }
 0x40f   :  { %v2168_v22 = vpop.xlane.xlu1 %2167  ;;  %v2526_v21 = vadd.f32 %v6327_v10, %v2488_v7  ;;  %v2360_v60 = vsub.f32 %v6304_v53, %v6535_v56  ;;  %v1975_v53 = vld [vmem:[%s7190_s10] sm:$0x3]  ;;  %v7199_v0 = vsub.s32 0, %v5341_v27  ;;  %v7200_v4 = vsub.s32 1, %v5341_v27 }
 0x410   :  { %v4451_v61 = vpop.eup %4450  ;;  %4456 = vrsqrt.f32 %v2390_v43  ;;  %v2295_v54 = vsub.f32 %v2231_v8, %v2263_v31  ;;  %v2232_v9 = vmul.f32 0.0078125, %v2168_v22 }
 0x411   :  { %v2545_v30 = vpack.c.bf16 %v2526_v21, %v2525_v20  ;;  %v2451_v25 = vmul.f32 %v4451_v61, %v2355_v23  ;;  %v6571_v56 = vrot.slane %v1975_v53, %v7199_v0  ;;  %v6575_v7 = vrot.slane %v1975_v53, %v7200_v4 }
 0x412   :  { %v4453_v1 = vpop.eup %4452  ;;  %v2327_v57 = vmax.f32 %v2295_v54, 0.0  ;;  %v2296_v33 = vsub.f32 %v2232_v9, %v2264_v11 }
 0x413   :  { %2793 = vmatmul.mubr.bf16.gmra.mrb[112].mxu0 %v2545_v30  ;;  %v2452_v16 = vmul.f32 %v4453_v1, %v2356_v48  ;;  %v2489_v2 = vmul.f32 %v6316_v34, %v2451_v25 }
 0x414   :  { %v2391_v45 = vadd.f32 1e-05, %v2327_v57  ;;  %v2328_v46 = vmax.f32 %v2296_v33, 0.0  ;;  %2802 = vmatprep.mubr.bf16.mxu0 %v7198_v55 }
 0x415   :  { %v2490_v36 = vmul.f32 %v6316_v34, %v2452_v16  ;;  %v2527_v18 = vadd.f32 %v6327_v10, %v2489_v2 }
 0x416   :  { %4458 = vrsqrt.f32 %v2391_v45  ;;  %v2392_v24 = vadd.f32 1e-05, %v2328_v46 }
 0x417   :  { %v2528_v38 = vadd.f32 %v6327_v10, %v2490_v36 }
 0x418   :  { %v4455_v29 = vpop.eup %4454  ;;  %4460 = vrsqrt.f32 %v2392_v24 }
 0x419   :  { %v2546_v44 = vpack.c.bf16 %v2528_v38, %v2527_v18  ;;  %v2453_v41 = vmul.f32 %v4455_v29, %v2357_v3 }
 0x41a   :  { %v4457_v12 = vpop.eup %4456 }
 0x41b   :  { %2803 = vmatmul.mubr.bf16.gmra.mrb[116].mxu0 %v2546_v44  ;;  %v2454_v63 = vmul.f32 %v4457_v12, %v2358_v5  ;;  %v2491_v14 = vmul.f32 %v6316_v34, %v2453_v41 }
 0x41c   :  { %2812 = vmatprep.mubr.bf16.mxu0 %v7198_v55 }
 0x41d   :  { %v2492_v39 = vmul.f32 %v6316_v34, %v2454_v63  ;;  %v2529_v6 = vadd.f32 %v6327_v10, %v2491_v14 }
 0x41f   :  { %v2530_v26 = vadd.f32 %v6327_v10, %v2492_v39 }
 0x420   :  { %v4459_v37 = vpop.eup %4458 }
 0x421   :  { %v2547_v59 = vpack.c.bf16 %v2530_v26, %v2529_v6  ;;  %v2455_v28 = vmul.f32 %v4459_v37, %v2359_v15 }
 0x422   :  { %v4461_v35 = vpop.eup %4460 }
 0x423   :  { %2813 = vmatmul.mubr.bf16.gmra.mrb[120].mxu0 %v2547_v59  ;;  %v2456_v52 = vmul.f32 %v4461_v35, %v2360_v60  ;;  %v2493_v40 = vmul.f32 %v6316_v34, %v2455_v28 }
 0x424   :  { %2822 = vmatprep.mubr.bf16.mxu0 %v7198_v55 }
 0x425   :  { %v2494_v42 = vmul.f32 %v6316_v34, %v2456_v52  ;;  %v2531_v58 = vadd.f32 %v6327_v10, %v2493_v40 }
 0x427   :  { %v2532_v47 = vadd.f32 %v6327_v10, %v2494_v42 }
 0x429   :  { %v2548_v51 = vpack.c.bf16 %v2532_v47, %v2531_v58 }
 0x42b   :  { %2823 = vmatmul.mubr.bf16.gmra.mrb[124].mxu0 %v2548_v51 }
 0x46a   :  { %v2674_v55 = vpop.f32.mrb[64].mxu0 }
 0x46b   :  { %v6578_v34 = vadd.f32 %v2674_v55, %v6571_v56  ;;  %v2676_v43 = vpop.f32.mrb[65].mxu0 }
 0x46c   :  { %v6581_v10 = vadd.f32 %v2676_v43, %v6575_v7  ;;  %v2678_v31 = vpop.f32.mrb[66].mxu0 }
 0x46d   :  { %v2833_v8 = vmul.f32 %v6578_v34, %v6578_v34  ;;  %v6586_v32 = vadd.f32 %v2678_v31, %v6571_v56  ;;  %v2680_v23 = vpop.f32.mrb[67].mxu0 }
 0x46e   :  { %v2834_v27 = vmul.f32 %v6581_v10, %v6581_v10  ;;  %v6591_v22 = vadd.f32 %v2680_v23, %v6575_v7 }
 0x46f   :  { %v2897_v20 = vmul.f32 %v2833_v8, %v6578_v34  ;;  %v2835_v21 = vmul.f32 %v6586_v32, %v6586_v32 }
 0x470   :  { %v2898_v61 = vmul.f32 %v2834_v27, %v6581_v10  ;;  %v2836_v11 = vmul.f32 %v6591_v22, %v6591_v22 }
 0x471   :  { %v2961_v54 = vmul.f32 0.044715, %v2897_v20  ;;  %v2899_v9 = vmul.f32 %v2835_v21, %v6586_v32 }
 0x472   :  { %v2962_v49 = vmul.f32 0.044715, %v2898_v61  ;;  %v2900_v48 = vmul.f32 %v2836_v11, %v6591_v22 }
 0x473   :  { %v3025_v30 = vadd.f32 %v2961_v54, %v6578_v34  ;;  %v2963_v25 = vmul.f32 0.044715, %v2899_v9 }
 0x474   :  { %v3026_v13 = vadd.f32 %v2962_v49, %v6581_v10  ;;  %v2964_v19 = vmul.f32 0.044715, %v2900_v48 }
 0x475   :  { %v3089_v1 = vmul.f32 0.7978846, %v3025_v30  ;;  %v3027_v57 = vadd.f32 %v2963_v25, %v6586_v32  ;;  %v2684_v33 = vpop.f32.mrb[68].mxu0 }
 0x476   :  { %v3090_v16 = vmul.f32 0.7978846, %v3026_v13  ;;  %v3028_v2 = vadd.f32 %v2964_v19, %v6591_v22  ;;  %v6606_v45 = vadd.f32 %v2684_v33, %v6571_v56  ;;  %v2686_v46 = vpop.f32.mrb[69].mxu0 }
 0x477   :  { %4462 = vtanh.f32 %v3089_v1  ;;  %v3091_v36 = vmul.f32 0.7978846, %v3027_v57  ;;  %v6609_v24 = vadd.f32 %v2686_v46, %v6575_v7  ;;  %v2688_v62 = vpop.f32.mrb[70].mxu0 }
 0x478   :  { %4464 = vtanh.f32 %v3090_v16  ;;  %v3092_v3 = vmul.f32 0.7978846, %v3028_v2  ;;  %v2837_v18 = vmul.f32 %v6606_v45, %v6606_v45  ;;  %v6614_v38 = vadd.f32 %v2688_v62, %v6571_v56  ;;  %v2690_v29 = vpop.f32.mrb[71].mxu0 }
 0x479   :  { %4466 = vtanh.f32 %v3091_v36  ;;  %v2838_v50 = vmul.f32 %v6609_v24, %v6609_v24  ;;  %v6619_v5 = vadd.f32 %v2690_v29, %v6575_v7 }
 0x47a   :  { %4468 = vtanh.f32 %v3092_v3  ;;  %v2901_v44 = vmul.f32 %v2837_v18, %v6606_v45  ;;  %v2839_v41 = vmul.f32 %v6614_v38, %v6614_v38 }
 0x47b   :  { %v2902_v12 = vmul.f32 %v2838_v50, %v6609_v24  ;;  %v2840_v63 = vmul.f32 %v6619_v5, %v6619_v5 }
 0x47c   :  { %v2965_v14 = vmul.f32 0.044715, %v2901_v44  ;;  %v2903_v39 = vmul.f32 %v2839_v41, %v6614_v38 }
 0x47d   :  { %v2966_v17 = vmul.f32 0.044715, %v2902_v12  ;;  %v2904_v15 = vmul.f32 %v2840_v63, %v6619_v5 }
 0x47e   :  { %v3029_v6 = vadd.f32 %v2965_v14, %v6606_v45  ;;  %v2967_v26 = vmul.f32 0.044715, %v2903_v39 }
 0x47f   :  { %v3030_v37 = vadd.f32 %v2966_v17, %v6609_v24  ;;  %v2968_v60 = vmul.f32 0.044715, %v2904_v15  ;;  %v2694_v59 = vpop.f32.mrb[72].mxu0 }
 0x480   :  { %v3093_v28 = vmul.f32 0.7978846, %v3029_v6  ;;  %v3031_v35 = vadd.f32 %v2967_v26, %v6614_v38  ;;  %v6633_v52 = vadd.f32 %v2694_v59, %v6571_v56  ;;  %v2696_v40 = vpop.f32.mrb[73].mxu0 }
 0x481   :  { %v4463_v42 = vpop.eup %4462  ;;  %v3094_v58 = vmul.f32 0.7978846, %v3030_v37  ;;  %v3032_v47 = vadd.f32 %v2968_v60, %v6619_v5  ;;  %v6637_v51 = vadd.f32 %v2696_v40, %v6575_v7  ;;  %v2698_v53 = vpop.f32.mrb[74].mxu0 }
 0x482   :  { %v4465_v0 = vpop.eup %4464  ;;  %v3217_v4 = vadd.f32 1.0, %v4463_v42  ;;  %v3095_v55 = vmul.f32 0.7978846, %v3031_v35  ;;  %v2841_v43 = vmul.f32 %v6633_v52, %v6633_v52  ;;  %v2700_v31 = vpop.f32.mrb[75].mxu0  ;;  %v6644_v20 = vadd.f32 %v2698_v53, %v6571_v56 }
 0x483   :  { %v4467_v8 = vpop.eup %4466  ;;  %4470 = vtanh.f32 %v3094_v58  ;;  %v3096_v23 = vmul.f32 0.7978846, %v3032_v47  ;;  %v2842_v27 = vmul.f32 %v6637_v51, %v6637_v51  ;;  %v6651_v48 = vadd.f32 %v2700_v31, %v6575_v7 }
 0x484   :  { %v4469_v21 = vpop.eup %4468  ;;  %v3281_v61 = vmul.f32 0.5, %v3217_v4  ;;  %v3219_v11 = vadd.f32 1.0, %v4467_v8  ;;  %4472 = vtanh.f32 %v3093_v28  ;;  %v2905_v54 = vmul.f32 %v2841_v43, %v6633_v52 }
 0x485   :  { %4474 = vtanh.f32 %v3096_v23  ;;  %v2906_v9 = vmul.f32 %v2842_v27, %v6637_v51  ;;  %v2843_v49 = vmul.f32 %v6644_v20, %v6644_v20  ;;  %v3218_v13 = vadd.f32 1.0, %v4465_v0 }
 0x486   :  { %v3283_v30 = vmul.f32 0.5, %v3219_v11  ;;  %4476 = vtanh.f32 %v3095_v55  ;;  %v2969_v25 = vmul.f32 0.044715, %v2905_v54  ;;  %v2844_v57 = vmul.f32 %v6651_v48, %v6651_v48 }
 0x487   :  { %v2970_v19 = vmul.f32 0.044715, %v2906_v9  ;;  %v2907_v1 = vmul.f32 %v2843_v49, %v6644_v20  ;;  %v3220_v33 = vadd.f32 1.0, %v4469_v21  ;;  %v3345_v16 = vmul.f32 %v3281_v61, %v6578_v34 }
 0x488   :  { %v3347_v2 = vmul.f32 %v3283_v30, %v6586_v32  ;;  %v3033_v46 = vadd.f32 %v2969_v25, %v6633_v52  ;;  %v3282_v36 = vmul.f32 0.5, %v3218_v13  ;;  %v2908_v18 = vmul.f32 %v2844_v57, %v6651_v48 }
 0x489   :  { %v3034_v62 = vadd.f32 %v2970_v19, %v6637_v51  ;;  %v2971_v3 = vmul.f32 0.044715, %v2907_v1  ;;  %v3284_v29 = vmul.f32 0.5, %v3220_v33 }
 0x48a   :  { %v3409_v50 = vpack.c.bf16 %v3347_v2, %v3345_v16  ;;  %v3097_v44 = vmul.f32 0.7978846, %v3033_v46  ;;  %v2704_v41 = vpop.f32.mrb[76].mxu0  ;;  %v2972_v14 = vmul.f32 0.044715, %v2908_v18  ;;  %v3346_v15 = vmul.f32 %v3282_v36, %v6581_v10 }
 0x48b   :  { %v3098_v12 = vmul.f32 0.7978846, %v3034_v62  ;;  %v3035_v63 = vadd.f32 %v2971_v3, %v6644_v20  ;;  %v6663_v34 = vadd.f32 %v2704_v41, %v6571_v56  ;;  %v2706_v32 = vpop.f32.mrb[77].mxu0  ;;  %v3348_v6 = vmul.f32 %v3284_v29, %v6591_v22 }
 0x48c   :  { %4478 = vtanh.f32 %v3097_v44  ;;  %v6666_v39 = vadd.f32 %v2706_v32, %v6575_v7  ;;  %v2708_v17 = vpop.f32.mrb[78].mxu0  ;;  %v3036_v60 = vadd.f32 %v2972_v14, %v6651_v48 }
 0x48d   :  { %v4471_v26 = vpop.eup %4470  ;;  %4480 = vtanh.f32 %v3098_v12  ;;  %v3099_v37 = vmul.f32 0.7978846, %v3035_v63  ;;  %v2845_v59 = vmul.f32 %v6663_v34, %v6663_v34  ;;  %v2710_v28 = vpop.f32.mrb[79].mxu0  ;;  %v6676_v42 = vadd.f32 %v2708_v17, %v6571_v56 }
 0x48e   :  { %v4473_v35 = vpop.eup %4472  ;;  %v2846_v40 = vmul.f32 %v6666_v39, %v6666_v39  ;;  %v6679_v10 = vadd.f32 %v2710_v28, %v6575_v7  ;;  %v3410_v22 = vpack.c.bf16 %v3348_v6, %v3346_v15  ;;  %v3100_v47 = vmul.f32 0.7978846, %v3036_v60 }
 0x48f   :  { %v4475_v58 = vpop.eup %4474  ;;  %4482 = vtanh.f32 %v3099_v37  ;;  %v2909_v53 = vmul.f32 %v2845_v59, %v6663_v34  ;;  %v3222_v0 = vadd.f32 1.0, %v4471_v26  ;;  %v2847_v43 = vmul.f32 %v6676_v42, %v6676_v42 }
 0x490   :  { %v4477_v4 = vpop.eup %4476  ;;  %v2910_v55 = vmul.f32 %v2846_v40, %v6666_v39  ;;  %v2848_v31 = vmul.f32 %v6679_v10, %v6679_v10  ;;  %3575 = vmatprep.mubr.bf16.mxu1 %v3410_v22  ;;  %v3224_v8 = vadd.f32 1.0, %v4475_v58  ;;  %4484 = vtanh.f32 %v3100_v47 }
 0x491   :  { %v2973_v23 = vmul.f32 0.044715, %v2909_v53  ;;  %3576 = vmatmul.mubr.bf16.vlgmr.msra.gmra.mrb[64].mxu1 %v3409_v50  ;;  %v3286_v27 = vmul.f32 0.5, %v3222_v0  ;;  %v3221_v21 = vadd.f32 1.0, %v4473_v35  ;;  %v2911_v11 = vmul.f32 %v2847_v43, %v6676_v42 }
 0x492   :  { %v2974_v61 = vmul.f32 0.044715, %v2910_v55  ;;  %v2912_v54 = vmul.f32 %v2848_v31, %v6679_v10  ;;  %v3288_v9 = vmul.f32 0.5, %v3224_v8  ;;  %v3223_v25 = vadd.f32 1.0, %v4477_v4 }
 0x493   :  { %v3037_v49 = vadd.f32 %v2973_v23, %v6663_v34  ;;  %v3350_v30 = vmul.f32 %v3286_v27, %v6609_v24  ;;  %v3285_v13 = vmul.f32 0.5, %v3221_v21  ;;  %v2975_v1 = vmul.f32 0.044715, %v2911_v11 }
 0x494   :  { %v3038_v19 = vadd.f32 %v2974_v61, %v6666_v39  ;;  %v2976_v57 = vmul.f32 0.044715, %v2912_v54  ;;  %v2714_v33 = vpop.f32.mrb[80].mxu0  ;;  %v3352_v16 = vmul.f32 %v3288_v9, %v6619_v5  ;;  %v3287_v62 = vmul.f32 0.5, %v3223_v25 }
 0x495   :  { %v3101_v2 = vmul.f32 0.7978846, %v3037_v49  ;;  %v6694_v46 = vadd.f32 %v2714_v33, %v6571_v56  ;;  %v2716_v36 = vpop.f32.mrb[81].mxu0  ;;  %v3349_v3 = vmul.f32 %v3285_v13, %v6606_v45  ;;  %v3039_v24 = vadd.f32 %v2975_v1, %v6676_v42 }
 0x496   :  { %v4479_v18 = vpop.eup %4478  ;;  %v3102_v29 = vmul.f32 0.7978846, %v3038_v19  ;;  %v3040_v50 = vadd.f32 %v2976_v57, %v6679_v10  ;;  %v6700_v44 = vadd.f32 %v2716_v36, %v6575_v7  ;;  %v2718_v41 = vpop.f32.mrb[82].mxu0  ;;  %v3412_v45 = vpack.c.bf16 %v3352_v16, %v3350_v30 }
 0x497   :  { %v4481_v12 = vpop.eup %4480  ;;  %4486 = vtanh.f32 %v3101_v2  ;;  %v2849_v5 = vmul.f32 %v6694_v46, %v6694_v46  ;;  %v6705_v63 = vadd.f32 %v2718_v41, %v6571_v56  ;;  %v2720_v14 = vpop.f32.mrb[83].mxu0  ;;  %v3103_v32 = vmul.f32 0.7978846, %v3039_v24 }
 0x498   :  { %4488 = vtanh.f32 %v3102_v29  ;;  %v3104_v17 = vmul.f32 0.7978846, %v3040_v50  ;;  %v2850_v15 = vmul.f32 %v6700_v44, %v6700_v44  ;;  %v6713_v60 = vadd.f32 %v2720_v14, %v6575_v7  ;;  %3583 = vmatprep.mubr.bf16.mxu1 %v3412_v45 }
 0x499   :  { %v4483_v6 = vpop.eup %4482  ;;  %v2913_v26 = vmul.f32 %v2849_v5, %v6694_v46  ;;  %v2851_v37 = vmul.f32 %v6705_v63, %v6705_v63  ;;  %v3351_v59 = vmul.f32 %v3287_v62, %v6614_v38  ;;  %4490 = vtanh.f32 %v3103_v32 }
 0x49a   :  { %v2914_v28 = vmul.f32 %v2850_v15, %v6700_v44  ;;  %v3226_v35 = vadd.f32 1.0, %v4481_v12  ;;  %v3225_v40 = vadd.f32 1.0, %v4479_v18  ;;  %v4485_v22 = vpop.eup %4484  ;;  %4492 = vtanh.f32 %v3104_v17 }
 0x49b   :  { %v2977_v58 = vmul.f32 0.044715, %v2913_v26  ;;  %v2915_v47 = vmul.f32 %v2851_v37, %v6705_v63  ;;  %v2852_v53 = vmul.f32 %v6713_v60, %v6713_v60  ;;  %v3411_v4 = vpack.c.bf16 %v3351_v59, %v3349_v3 }
 0x49c   :  { %v2978_v0 = vmul.f32 0.044715, %v2914_v28  ;;  %v3228_v55 = vadd.f32 1.0, %v4485_v22  ;;  %v3290_v43 = vmul.f32 0.5, %v3226_v35  ;;  %v3227_v23 = vadd.f32 1.0, %v4483_v6 }
 0x49d   :  { %v3041_v31 = vadd.f32 %v2977_v58, %v6694_v46  ;;  %v2979_v38 = vmul.f32 0.044715, %v2915_v47  ;;  %v2916_v8 = vmul.f32 %v2852_v53, %v6713_v60  ;;  %3584 = vmatmul.mubr.bf16.gmra.mrb[68].mxu1 %v3411_v4  ;;  %v3289_v11 = vmul.f32 0.5, %v3225_v40 }
 0x49e   :  { %v3042_v27 = vadd.f32 %v2978_v0, %v6700_v44  ;;  %v3292_v21 = vmul.f32 0.5, %v3228_v55  ;;  %v3354_v61 = vmul.f32 %v3290_v43, %v6637_v51  ;;  %v3291_v25 = vmul.f32 0.5, %v3227_v23 }
 0x49f   :  { %v3105_v54 = vmul.f32 0.7978846, %v3041_v31  ;;  %v3043_v9 = vadd.f32 %v2979_v38, %v6705_v63  ;;  %v2980_v49 = vmul.f32 0.044715, %v2916_v8  ;;  %v2724_v30 = vpop.f32.mrb[84].mxu0  ;;  %v3353_v33 = vmul.f32 %v3289_v11, %v6633_v52 }
 0x4a0   :  { %v3106_v13 = vmul.f32 0.7978846, %v3042_v27  ;;  %v6726_v19 = vadd.f32 %v2724_v30, %v6571_v56  ;;  %v2726_v1 = vpop.f32.mrb[85].mxu0  ;;  %v3356_v57 = vmul.f32 %v3292_v21, %v6651_v48  ;;  %v3355_v45 = vmul.f32 %v3291_v25, %v6644_v20 }
 0x4a1   :  { %v4487_v16 = vpop.eup %4486  ;;  %4494 = vtanh.f32 %v3105_v54  ;;  %v3107_v2 = vmul.f32 0.7978846, %v3043_v9  ;;  %v3044_v51 = vadd.f32 %v2980_v49, %v6713_v60  ;;  %v6732_v36 = vadd.f32 %v2726_v1, %v6575_v7  ;;  %v2728_v62 = vpop.f32.mrb[86].mxu0 }
 0x4a2   :  { %v4489_v3 = vpop.eup %4488  ;;  %4496 = vtanh.f32 %v3106_v13  ;;  %v2853_v18 = vmul.f32 %v6726_v19, %v6726_v19  ;;  %v6737_v29 = vadd.f32 %v2728_v62, %v6571_v56  ;;  %v2730_v48 = vpop.f32.mrb[87].mxu0  ;;  %v3414_v24 = vpack.c.bf16 %v3356_v57, %v3354_v61 }
 0x4a3   :  { %4498 = vtanh.f32 %v3107_v2  ;;  %v3108_v52 = vmul.f32 0.7978846, %v3044_v51  ;;  %v2854_v50 = vmul.f32 %v6732_v36, %v6732_v36  ;;  %v6742_v41 = vadd.f32 %v2730_v48, %v6575_v7  ;;  %v4491_v12 = vpop.eup %4490 }
 0x4a4   :  { %v2917_v5 = vmul.f32 %v2853_v18, %v6726_v19  ;;  %v2855_v14 = vmul.f32 %v6737_v29, %v6737_v29  ;;  %3591 = vmatprep.mubr.bf16.mxu1 %v3414_v24  ;;  %v3230_v32 = vadd.f32 1.0, %v4489_v3  ;;  %v4493_v17 = vpop.eup %4492  ;;  %v3229_v26 = vadd.f32 1.0, %v4487_v16 }
 0x4a5   :  { %4500 = vtanh.f32 %v3108_v52  ;;  %v2918_v15 = vmul.f32 %v2854_v50, %v6732_v36  ;;  %v2856_v6 = vmul.f32 %v6742_v41, %v6742_v41  ;;  %v3413_v28 = vpack.c.bf16 %v3355_v45, %v3353_v33 }
 0x4a6   :  { %v2981_v37 = vmul.f32 0.044715, %v2917_v5  ;;  %v2919_v59 = vmul.f32 %v2855_v14, %v6737_v29  ;;  %v3232_v35 = vadd.f32 1.0, %v4493_v17  ;;  %v3294_v58 = vmul.f32 0.5, %v3230_v32 }
 0x4a7   :  { %v2982_v40 = vmul.f32 0.044715, %v2918_v15  ;;  %v2920_v22 = vmul.f32 %v2856_v6, %v6742_v41  ;;  %v3231_v47 = vadd.f32 1.0, %v4491_v12  ;;  %3592 = vmatmul.mubr.bf16.gmra.mrb[72].mxu1 %v3413_v28  ;;  %v3293_v4 = vmul.f32 0.5, %v3229_v26 }
 0x4a8   :  { %v3045_v20 = vadd.f32 %v2981_v37, %v6726_v19  ;;  %v2983_v53 = vmul.f32 0.044715, %v2919_v59  ;;  %v3296_v0 = vmul.f32 0.5, %v3232_v35  ;;  %v3358_v38 = vmul.f32 %v3294_v58, %v6666_v39 }
 0x4a9   :  { %v3046_v55 = vadd.f32 %v2982_v40, %v6732_v36  ;;  %v2984_v43 = vmul.f32 0.044715, %v2920_v22  ;;  %v2734_v31 = vpop.f32.mrb[88].mxu0  ;;  %v3295_v8 = vmul.f32 0.5, %v3231_v47  ;;  %v3357_v39 = vmul.f32 %v3293_v4, %v6663_v34 }
 0x4aa   :  { %v3109_v23 = vmul.f32 0.7978846, %v3045_v20  ;;  %v3047_v27 = vadd.f32 %v2983_v53, %v6737_v29  ;;  %v6758_v21 = vadd.f32 %v2734_v31, %v6571_v56  ;;  %v2736_v61 = vpop.f32.mrb[89].mxu0  ;;  %v3360_v11 = vmul.f32 %v3296_v0, %v6679_v10 }
 0x4ab   :  { %v4495_v54 = vpop.eup %4494  ;;  %v3110_v9 = vmul.f32 0.7978846, %v3046_v55  ;;  %v3048_v49 = vadd.f32 %v2984_v43, %v6742_v41  ;;  %v6763_v30 = vadd.f32 %v2736_v61, %v6575_v7  ;;  %v2738_v25 = vpop.f32.mrb[90].mxu0  ;;  %v3359_v50 = vmul.f32 %v3295_v8, %v6676_v42 }
 0x4ac   :  { %v4497_v13 = vpop.eup %4496  ;;  %4502 = vtanh.f32 %v3109_v23  ;;  %v3111_v1 = vmul.f32 0.7978846, %v3047_v27  ;;  %v2857_v57 = vmul.f32 %v6758_v21, %v6758_v21  ;;  %v6769_v33 = vadd.f32 %v2738_v25, %v6571_v56  ;;  %v2740_v10 = vpop.f32.mrb[91].mxu0 }
 0x4ad   :  { %v4499_v16 = vpop.eup %4498  ;;  %4504 = vtanh.f32 %v3110_v9  ;;  %v3112_v2 = vmul.f32 0.7978846, %v3048_v49  ;;  %v2858_v51 = vmul.f32 %v6763_v30, %v6763_v30  ;;  %v6774_v62 = vadd.f32 %v2740_v10, %v6575_v7 }
 0x4ae   :  { %4506 = vtanh.f32 %v3111_v1  ;;  %v2921_v34 = vmul.f32 %v2857_v57, %v6758_v21  ;;  %v2859_v3 = vmul.f32 %v6769_v33, %v6769_v33  ;;  %v3416_v18 = vpack.c.bf16 %v3360_v11, %v3358_v38 }
 0x4af   :  { %v4501_v48 = vpop.eup %4500  ;;  %4508 = vtanh.f32 %v3112_v2  ;;  %v2922_v24 = vmul.f32 %v2858_v51, %v6763_v30  ;;  %v2860_v52 = vmul.f32 %v6774_v62, %v6774_v62  ;;  %v3234_v14 = vadd.f32 1.0, %v4497_v13 }
 0x4b0   :  { %v2985_v12 = vmul.f32 0.044715, %v2921_v34  ;;  %v2923_v5 = vmul.f32 %v2859_v3, %v6769_v33  ;;  %3599 = vmatprep.mubr.bf16.mxu1 %v3416_v18  ;;  %v3236_v45 = vadd.f32 1.0, %v4501_v48  ;;  %v3415_v15 = vpack.c.bf16 %v3359_v50, %v3357_v39 }
 0x4b1   :  { %v2986_v32 = vmul.f32 0.044715, %v2922_v24  ;;  %v2924_v17 = vmul.f32 %v2860_v52, %v6774_v62  ;;  %v3233_v6 = vadd.f32 1.0, %v4495_v54  ;;  %v3298_v59 = vmul.f32 0.5, %v3234_v14 }
 0x4b2   :  { %v3049_v26 = vadd.f32 %v2985_v12, %v6758_v21  ;;  %v2987_v37 = vmul.f32 0.044715, %v2923_v5  ;;  %v3300_v28 = vmul.f32 0.5, %v3236_v45  ;;  %3600 = vmatmul.mubr.bf16.gmra.mrb[76].mxu1 %v3415_v15  ;;  %v3235_v42 = vadd.f32 1.0, %v4499_v16 }
 0x4b3   :  { %v3050_v35 = vadd.f32 %v2986_v32, %v6763_v30  ;;  %v2988_v40 = vmul.f32 0.044715, %v2924_v17  ;;  %v3297_v22 = vmul.f32 0.5, %v3233_v6  ;;  %v3362_v53 = vmul.f32 %v3298_v59, %v6700_v44 }
 0x4b4   :  { %v3113_v58 = vmul.f32 0.7978846, %v3049_v26  ;;  %v3051_v47 = vadd.f32 %v2987_v37, %v6769_v33  ;;  %v2744_v20 = vpop.f32.mrb[92].mxu0  ;;  %v3364_v0 = vmul.f32 %v3300_v28, %v6713_v60  ;;  %v3299_v38 = vmul.f32 0.5, %v3235_v42 }
 0x4b5   :  { %v3114_v4 = vmul.f32 0.7978846, %v3050_v35  ;;  %v3052_v55 = vadd.f32 %v2988_v40, %v6774_v62  ;;  %v6792_v43 = vadd.f32 %v2744_v20, %v6571_v56  ;;  %v2746_v31 = vpop.f32.mrb[93].mxu0  ;;  %v3361_v1 = vmul.f32 %v3297_v22, %v6694_v46 }
 0x4b6   :  { %v4503_v8 = vpop.eup %4502  ;;  %4510 = vtanh.f32 %v3113_v58  ;;  %v3115_v23 = vmul.f32 0.7978846, %v3051_v47  ;;  %v6795_v27 = vadd.f32 %v2746_v31, %v6575_v7  ;;  %v2748_v61 = vpop.f32.mrb[94].mxu0  ;;  %v3418_v11 = vpack.c.bf16 %v3364_v0, %v3362_v53 }
 0x4b7   :  { %v4505_v54 = vpop.eup %4504  ;;  %4512 = vtanh.f32 %v3114_v4  ;;  %v3116_v44 = vmul.f32 0.7978846, %v3052_v55  ;;  %v2861_v60 = vmul.f32 %v6792_v43, %v6792_v43  ;;  %v6800_v9 = vadd.f32 %v2748_v61, %v6571_v56  ;;  %v2750_v49 = vpop.f32.mrb[95].mxu0 }
 0x4b8   :  { %v4507_v25 = vpop.eup %4506  ;;  %4514 = vtanh.f32 %v3115_v23  ;;  %v2862_v39 = vmul.f32 %v6795_v27, %v6795_v27  ;;  %v6805_v13 = vadd.f32 %v2750_v49, %v6575_v7  ;;  %3607 = vmatprep.mubr.bf16.mxu1 %v3418_v11  ;;  %v3363_v2 = vmul.f32 %v3299_v38, %v6705_v63 }
 0x4b9   :  { %v4509_v57 = vpop.eup %4508  ;;  %4516 = vtanh.f32 %v3116_v44  ;;  %v2925_v10 = vmul.f32 %v2861_v60, %v6792_v43  ;;  %v2863_v16 = vmul.f32 %v6800_v9, %v6800_v9  ;;  %v3238_v3 = vadd.f32 1.0, %v4505_v54 }
 0x4ba   :  { %v2926_v51 = vmul.f32 %v2862_v39, %v6795_v27  ;;  %v2864_v34 = vmul.f32 %v6805_v13, %v6805_v13  ;;  %v3240_v18 = vadd.f32 1.0, %v4509_v57  ;;  %v3417_v46 = vpack.c.bf16 %v3363_v2, %v3361_v1 }
 0x4bb   :  { %v2989_v48 = vmul.f32 0.044715, %v2925_v10  ;;  %v2927_v24 = vmul.f32 %v2863_v16, %v6800_v9  ;;  %v3237_v52 = vadd.f32 1.0, %v4503_v8  ;;  %v3302_v5 = vmul.f32 0.5, %v3238_v3 }
 0x4bc   :  { %v2990_v50 = vmul.f32 0.044715, %v2926_v51  ;;  %v2928_v12 = vmul.f32 %v2864_v34, %v6805_v13  ;;  %v3304_v14 = vmul.f32 0.5, %v3240_v18  ;;  %3608 = vmatmul.mubr.bf16.gmra.mrb[80].mxu1 %v3417_v46  ;;  %v3239_v32 = vadd.f32 1.0, %v4507_v25 }
 0x4bd   :  { %v3053_v45 = vadd.f32 %v2989_v48, %v6792_v43  ;;  %v2991_v63 = vmul.f32 0.044715, %v2927_v24  ;;  %v3301_v17 = vmul.f32 0.5, %v3237_v52  ;;  %v3366_v37 = vmul.f32 %v3302_v5, %v6732_v36 }
 0x4be   :  { %v3054_v15 = vadd.f32 %v2990_v50, %v6795_v27  ;;  %v2992_v6 = vmul.f32 0.044715, %v2928_v12  ;;  %v2754_v26 = vpop.f32.mrb[96].mxu0  ;;  %v3368_v59 = vmul.f32 %v3304_v14, %v6742_v41  ;;  %v3303_v22 = vmul.f32 0.5, %v3239_v32 }
 0x4bf   :  { %v3117_v28 = vmul.f32 0.7978846, %v3053_v45  ;;  %v3055_v35 = vadd.f32 %v2991_v63, %v6800_v9  ;;  %v6823_v40 = vadd.f32 %v2754_v26, %v6571_v56  ;;  %v2756_v42 = vpop.f32.mrb[97].mxu0  ;;  %v3365_v49 = vmul.f32 %v3301_v17, %v6726_v19 }
 0x4c0   :  { %v4511_v58 = vpop.eup %4510  ;;  %v3118_v47 = vmul.f32 0.7978846, %v3054_v15  ;;  %v3056_v20 = vadd.f32 %v2992_v6, %v6805_v13  ;;  %v6827_v53 = vadd.f32 %v2756_v42, %v6575_v7  ;;  %v2758_v0 = vpop.f32.mrb[98].mxu0  ;;  %v3420_v4 = vpack.c.bf16 %v3368_v59, %v3366_v37 }
 0x4c1   :  { %v4513_v36 = vpop.eup %4512  ;;  %4518 = vtanh.f32 %v3117_v28  ;;  %v3119_v41 = vmul.f32 0.7978846, %v3055_v35  ;;  %v2865_v55 = vmul.f32 %v6823_v40, %v6823_v40  ;;  %v6832_v31 = vadd.f32 %v2758_v0, %v6571_v56  ;;  %v2760_v38 = vpop.f32.mrb[99].mxu0 }
 0x4c2   :  { %v4515_v8 = vpop.eup %4514  ;;  %4520 = vtanh.f32 %v3118_v47  ;;  %v3120_v23 = vmul.f32 0.7978846, %v3056_v20  ;;  %v2866_v61 = vmul.f32 %v6827_v53, %v6827_v53  ;;  %v6837_v11 = vadd.f32 %v2760_v38, %v6575_v7  ;;  %3615 = vmatprep.mubr.bf16.mxu1 %v3420_v4 }
 0x4c3   :  { %v4517_v54 = vpop.eup %4516  ;;  %4522 = vtanh.f32 %v3119_v41  ;;  %v2929_v44 = vmul.f32 %v2865_v55, %v6823_v40  ;;  %v2867_v60 = vmul.f32 %v6832_v31, %v6832_v31  ;;  %v3367_v1 = vmul.f32 %v3303_v22, %v6737_v29 }
 0x4c4   :  { %4524 = vtanh.f32 %v3120_v23  ;;  %v2930_v25 = vmul.f32 %v2866_v61, %v6827_v53  ;;  %v2868_v39 = vmul.f32 %v6837_v11, %v6837_v11  ;;  %v3242_v16 = vadd.f32 1.0, %v4513_v36 }
 0x4c5   :  { %v2993_v57 = vmul.f32 0.044715, %v2929_v44  ;;  %v2931_v10 = vmul.f32 %v2867_v60, %v6832_v31  ;;  %v3244_v2 = vadd.f32 1.0, %v4517_v54  ;;  %v3419_v3 = vpack.c.bf16 %v3367_v1, %v3365_v49 }
 0x4c6   :  { %v2994_v51 = vmul.f32 0.044715, %v2930_v25  ;;  %v2932_v34 = vmul.f32 %v2868_v39, %v6837_v11  ;;  %v3241_v18 = vadd.f32 1.0, %v4511_v58  ;;  %v3306_v24 = vmul.f32 0.5, %v3242_v16 }
 0x4c7   :  { %v3057_v19 = vadd.f32 %v2993_v57, %v6823_v40  ;;  %v2995_v48 = vmul.f32 0.044715, %v2931_v10  ;;  %v3308_v46 = vmul.f32 0.5, %v3244_v2  ;;  %3616 = vmatmul.mubr.bf16.gmra.mrb[84].mxu1 %v3419_v3  ;;  %v3243_v29 = vadd.f32 1.0, %v4515_v8 }
 0x4c8   :  { %v3058_v52 = vadd.f32 %v2994_v51, %v6827_v53  ;;  %v2996_v50 = vmul.f32 0.044715, %v2932_v34  ;;  %v3305_v12 = vmul.f32 0.5, %v3241_v18  ;;  %v3370_v45 = vmul.f32 %v3306_v24, %v6763_v30 }
 0x4c9   :  { %v3121_v5 = vmul.f32 0.7978846, %v3057_v19  ;;  %v3059_v14 = vadd.f32 %v2995_v48, %v6832_v31  ;;  %v3372_v63 = vmul.f32 %v3308_v46, %v6774_v62  ;;  %v3307_v6 = vmul.f32 0.5, %v3243_v29 }
 0x4ca   :  { %v3122_v32 = vmul.f32 0.7978846, %v3058_v52  ;;  %v3060_v17 = vadd.f32 %v2996_v50, %v6837_v11  ;;  %v2764_v15 = vpop.f32.mrb[100].mxu0  ;;  %v3369_v26 = vmul.f32 %v3305_v12, %v6758_v21 }
 0x4cb   :  { %v4519_v37 = vpop.eup %4518  ;;  %4526 = vtanh.f32 %v3121_v5  ;;  %v3123_v59 = vmul.f32 0.7978846, %v3059_v14  ;;  %v6857_v28 = vadd.f32 %v2764_v15, %v6571_v56  ;;  %v2766_v35 = vpop.f32.mrb[101].mxu0  ;;  %v3422_v42 = vpack.c.bf16 %v3372_v63, %v3370_v45 }
 0x4cc   :  { %v4521_v22 = vpop.eup %4520  ;;  %4528 = vtanh.f32 %v3122_v32  ;;  %v3124_v30 = vmul.f32 0.7978846, %v3060_v17  ;;  %v6860_v62 = vadd.f32 %v2766_v35, %v6575_v7  ;;  %v2768_v58 = vpop.f32.mrb[102].mxu0  ;;  %v3371_v47 = vmul.f32 %v3307_v6, %v6769_v33 }
 0x4cd   :  { %v4523_v20 = vpop.eup %4522  ;;  %4530 = vtanh.f32 %v3123_v59  ;;  %v2869_v21 = vmul.f32 %v6857_v28, %v6857_v28  ;;  %v6866_v0 = vadd.f32 %v2768_v58, %v6571_v56  ;;  %v2770_v4 = vpop.f32.mrb[103].mxu0  ;;  %3623 = vmatprep.mubr.bf16.mxu1 %v3422_v42  ;;  %v3246_v36 = vadd.f32 1.0, %v4521_v22 }
 0x4ce   :  { %v4525_v41 = vpop.eup %4524  ;;  %4532 = vtanh.f32 %v3124_v30  ;;  %v2870_v55 = vmul.f32 %v6860_v62, %v6860_v62  ;;  %v6871_v38 = vadd.f32 %v2770_v4, %v6575_v7  ;;  %v3421_v33 = vpack.c.bf16 %v3371_v47, %v3369_v26 }
 0x4cf   :  { %v2933_v8 = vmul.f32 %v2869_v21, %v6857_v28  ;;  %v2871_v23 = vmul.f32 %v6866_v0, %v6866_v0  ;;  %v3248_v61 = vadd.f32 1.0, %v4525_v41  ;;  %v3310_v54 = vmul.f32 0.5, %v3246_v36 }
 0x4d0   :  { %v2934_v44 = vmul.f32 %v2870_v55, %v6860_v62  ;;  %v2872_v60 = vmul.f32 %v6871_v38, %v6871_v38  ;;  %3624 = vmatmul.mubr.bf16.gmra.mrb[88].mxu1 %v3421_v33  ;;  %v3245_v49 = vadd.f32 1.0, %v4519_v37  ;;  %v3247_v25 = vadd.f32 1.0, %v4523_v20 }
 0x4d1   :  { %v2997_v39 = vmul.f32 0.044715, %v2933_v8  ;;  %v2935_v1 = vmul.f32 %v2871_v23, %v6866_v0  ;;  %v3312_v57 = vmul.f32 0.5, %v3248_v61  ;;  %v3374_v18 = vmul.f32 %v3310_v54, %v6795_v27 }
 0x4d2   :  { %v2998_v10 = vmul.f32 0.044715, %v2934_v44  ;;  %v2936_v16 = vmul.f32 %v2872_v60, %v6871_v38  ;;  %v3309_v2 = vmul.f32 0.5, %v3245_v49  ;;  %v3311_v51 = vmul.f32 0.5, %v3247_v25 }
 0x4d3   :  { %v3061_v34 = vadd.f32 %v2997_v39, %v6857_v28  ;;  %v2999_v3 = vmul.f32 0.044715, %v2935_v1  ;;  %v3376_v19 = vmul.f32 %v3312_v57, %v6805_v13  ;;  %v2774_v46 = vpop.f32.mrb[104].mxu0 }
 0x4d4   :  { %v3062_v48 = vadd.f32 %v2998_v10, %v6860_v62  ;;  %v3000_v24 = vmul.f32 0.044715, %v2936_v16  ;;  %v3373_v52 = vmul.f32 %v3309_v2, %v6792_v43  ;;  %v3375_v50 = vmul.f32 %v3311_v51, %v6800_v9  ;;  %v2776_v45 = vpop.f32.mrb[105].mxu0 }
 0x4d5   :  { %v4527_v29 = vpop.eup %4526  ;;  %v3125_v12 = vmul.f32 0.7978846, %v3061_v34  ;;  %v3063_v5 = vadd.f32 %v2999_v3, %v6866_v0  ;;  %v6889_v14 = vadd.f32 %v2774_v46, %v6571_v56  ;;  %v3424_v63 = vpack.c.bf16 %v3376_v19, %v3374_v18  ;;  %v2778_v15 = vpop.f32.mrb[106].mxu0 }
 0x4d6   :  { %v4529_v27 = vpop.eup %4528  ;;  %v3126_v32 = vmul.f32 0.7978846, %v3062_v48  ;;  %v3064_v13 = vadd.f32 %v3000_v24, %v6871_v38  ;;  %v6893_v17 = vadd.f32 %v2776_v45, %v6575_v7  ;;  %v3423_v43 = vpack.c.bf16 %v3375_v50, %v3373_v52  ;;  %v2780_v59 = vpop.f32.mrb[107].mxu0 }
 0x4d7   :  { %v4531_v6 = vpop.eup %4530  ;;  %4534 = vtanh.f32 %v3125_v12  ;;  %v3127_v9 = vmul.f32 0.7978846, %v3063_v5  ;;  %v2873_v26 = vmul.f32 %v6889_v14, %v6889_v14  ;;  %v6898_v37 = vadd.f32 %v2778_v15, %v6571_v56  ;;  %3631 = vmatprep.mubr.bf16.mxu1 %v3424_v63 }
 0x4d8   :  { %v4533_v35 = vpop.eup %4532  ;;  %4536 = vtanh.f32 %v3126_v32  ;;  %v3128_v42 = vmul.f32 0.7978846, %v3064_v13  ;;  %v2874_v22 = vmul.f32 %v6893_v17, %v6893_v17  ;;  %v6903_v30 = vadd.f32 %v2780_v59, %v6575_v7  ;;  %3632 = vmatmul.mubr.bf16.gmra.mrb[92].mxu1 %v3423_v43 }
 0x4d9   :  { %4538 = vtanh.f32 %v3127_v9  ;;  %v2937_v58 = vmul.f32 %v2873_v26, %v6889_v14  ;;  %v2875_v47 = vmul.f32 %v6898_v37, %v6898_v37  ;;  %v3250_v20 = vadd.f32 1.0, %v4529_v27 }
 0x4da   :  { %4540 = vtanh.f32 %v3128_v42  ;;  %v2938_v21 = vmul.f32 %v2874_v22, %v6893_v17  ;;  %v2876_v4 = vmul.f32 %v6903_v30, %v6903_v30  ;;  %v3252_v36 = vadd.f32 1.0, %v4533_v35 }
 0x4db   :  { %v3001_v41 = vmul.f32 0.044715, %v2937_v58  ;;  %v2939_v55 = vmul.f32 %v2875_v47, %v6898_v37  ;;  %v3314_v33 = vmul.f32 0.5, %v3250_v20  ;;  %v3249_v8 = vadd.f32 1.0, %v4527_v29 }
 0x4dc   :  { %v3002_v23 = vmul.f32 0.044715, %v2938_v21  ;;  %v2940_v61 = vmul.f32 %v2876_v4, %v6903_v30  ;;  %v3316_v54 = vmul.f32 0.5, %v3252_v36  ;;  %v3251_v44 = vadd.f32 1.0, %v4531_v6 }
 0x4dd   :  { %v3065_v60 = vadd.f32 %v3001_v41, %v6889_v14  ;;  %v3003_v49 = vmul.f32 0.044715, %v2939_v55  ;;  %v3378_v25 = vmul.f32 %v3314_v33, %v6827_v53  ;;  %v3313_v39 = vmul.f32 0.5, %v3249_v8 }
 0x4de   :  { %v3066_v1 = vadd.f32 %v3002_v23, %v6893_v17  ;;  %v3004_v57 = vmul.f32 0.044715, %v2940_v61  ;;  %v2784_v10 = vpop.f32.mrb[108].mxu0  ;;  %v3380_v16 = vmul.f32 %v3316_v54, %v6837_v11  ;;  %v3315_v2 = vmul.f32 0.5, %v3251_v44 }
 0x4df   :  { %v3129_v51 = vmul.f32 0.7978846, %v3065_v60  ;;  %v3067_v34 = vadd.f32 %v3003_v49, %v6898_v37  ;;  %v6919_v3 = vadd.f32 %v2784_v10, %v6571_v56  ;;  %v2786_v18 = vpop.f32.mrb[109].mxu0  ;;  %v3377_v19 = vmul.f32 %v3313_v39, %v6823_v40 }
 0x4e0   :  { %v3130_v48 = vmul.f32 0.7978846, %v3066_v1  ;;  %v3068_v53 = vadd.f32 %v3004_v57, %v6903_v30  ;;  %v6924_v24 = vadd.f32 %v2786_v18, %v6575_v7  ;;  %v2788_v46 = vpop.f32.mrb[110].mxu0  ;;  %v3426_v52 = vpack.c.bf16 %v3380_v16, %v3378_v25 }
 0x4e1   :  { %v4535_v50 = vpop.eup %4534  ;;  %4542 = vtanh.f32 %v3129_v51  ;;  %v3131_v11 = vmul.f32 0.7978846, %v3067_v34  ;;  %v2877_v29 = vmul.f32 %v6919_v3, %v6919_v3  ;;  %v6929_v12 = vadd.f32 %v2788_v46, %v6571_v56  ;;  %v2790_v5 = vpop.f32.mrb[111].mxu0 }
 0x4e2   :  { %v4537_v45 = vpop.eup %4536  ;;  %4544 = vtanh.f32 %v3130_v48  ;;  %v3132_v40 = vmul.f32 0.7978846, %v3068_v53  ;;  %v2878_v63 = vmul.f32 %v6924_v24, %v6924_v24  ;;  %v6934_v27 = vadd.f32 %v2790_v5, %v6575_v7  ;;  %3639 = vmatprep.mubr.bf16.mxu1 %v3426_v52 }
 0x4e3   :  { %v4539_v32 = vpop.eup %4538  ;;  %4546 = vtanh.f32 %v3131_v11  ;;  %v2941_v13 = vmul.f32 %v2877_v29, %v6919_v3  ;;  %v2879_v15 = vmul.f32 %v6929_v12, %v6929_v12  ;;  %v3379_v43 = vmul.f32 %v3315_v2, %v6832_v31 }
 0x4e4   :  { %v4541_v6 = vpop.eup %4540  ;;  %4548 = vtanh.f32 %v3132_v40  ;;  %v2942_v9 = vmul.f32 %v2878_v63, %v6924_v24  ;;  %v2880_v26 = vmul.f32 %v6934_v27, %v6934_v27  ;;  %v3254_v59 = vadd.f32 1.0, %v4537_v45 }
 0x4e5   :  { %v3005_v35 = vmul.f32 0.044715, %v2941_v13  ;;  %v2943_v42 = vmul.f32 %v2879_v15, %v6929_v12  ;;  %v3425_v22 = vpack.c.bf16 %v3379_v43, %v3377_v19  ;;  %v3256_v58 = vadd.f32 1.0, %v4541_v6 }
 0x4e6   :  { %v3006_v47 = vmul.f32 0.044715, %v2942_v9  ;;  %v2944_v20 = vmul.f32 %v2880_v26, %v6934_v27  ;;  %v2794_v21 = vpop.f32.mrb[112].mxu0  ;;  %v3318_v4 = vmul.f32 0.5, %v3254_v59  ;;  %v3253_v36 = vadd.f32 1.0, %v4535_v50 }
 0x4e7   :  { %v3069_v31 = vadd.f32 %v3005_v35, %v6919_v3  ;;  %v3007_v41 = vmul.f32 0.044715, %v2943_v42  ;;  %v6947_v55 = vadd.f32 %v2794_v21, %v6571_v56  ;;  %v2796_v33 = vpop.f32.mrb[113].mxu0  ;;  %3640 = vmatmul.mubr.bf16.gmra.mrb[96].mxu1 %v3425_v22  ;;  %v3320_v8 = vmul.f32 0.5, %v3256_v58 }
 0x4e8   :  { %v3070_v23 = vadd.f32 %v3006_v47, %v6924_v24  ;;  %v3008_v61 = vmul.f32 0.044715, %v2944_v20  ;;  %v6951_v54 = vadd.f32 %v2796_v33, %v6575_v7  ;;  %v2798_v44 = vpop.f32.mrb[114].mxu0  ;;  %v3382_v60 = vmul.f32 %v3318_v4, %v6860_v62 }
 0x4e9   :  { %v3133_v49 = vmul.f32 0.7978846, %v3069_v31  ;;  %v3071_v25 = vadd.f32 %v3007_v41, %v6929_v12  ;;  %v2881_v39 = vmul.f32 %v6947_v55, %v6947_v55  ;;  %v6958_v1 = vadd.f32 %v2798_v44, %v6571_v56  ;;  %v2800_v57 = vpop.f32.mrb[115].mxu0 }
 0x4ea   :  { %v3134_v10 = vmul.f32 0.7978846, %v3070_v23  ;;  %v3072_v16 = vadd.f32 %v3008_v61, %v6934_v27  ;;  %v2882_v2 = vmul.f32 %v6951_v54, %v6951_v54  ;;  %v6964_v51 = vadd.f32 %v2800_v57, %v6575_v7 }
 0x4eb   :  { %v6966_v62 = vpop.eup %4542  ;;  %4550 = vtanh.f32 %v3133_v49  ;;  %v3135_v34 = vmul.f32 0.7978846, %v3071_v25  ;;  %v2945_v18 = vmul.f32 %v2881_v39, %v6947_v55  ;;  %v2883_v19 = vmul.f32 %v6958_v1, %v6958_v1 }
 0x4ec   :  { %v6971_v48 = vpop.eup %4544  ;;  %4552 = vtanh.f32 %v3134_v10  ;;  %v3136_v53 = vmul.f32 0.7978846, %v3072_v16  ;;  %v2946_v46 = vmul.f32 %v2882_v2, %v6951_v54  ;;  %v2884_v52 = vmul.f32 %v6964_v51, %v6964_v51 }
 0x4ed   :  { %v6976_v50 = vpop.eup %4546  ;;  %4554 = vtanh.f32 %v3135_v34  ;;  %v3009_v11 = vmul.f32 0.044715, %v2945_v18  ;;  %v2947_v29 = vmul.f32 %v2883_v19, %v6958_v1  ;;  %v3384_v5 = vmul.f32 %v3320_v8, %v6871_v38 }
 0x4ee   :  { %v6980_v45 = vpop.eup %4548  ;;  %4556 = vtanh.f32 %v3136_v53  ;;  %v3010_v40 = vmul.f32 0.044715, %v2946_v46  ;;  %v2948_v63 = vmul.f32 %v2884_v52, %v6964_v51  ;;  %v2804_v13 = vpop.f32.mrb[116].mxu0  ;;  %v3255_v15 = vadd.f32 1.0, %v4539_v32 }
 0x4ef   :  { %v3073_v43 = vadd.f32 %v3009_v11, %v6947_v55  ;;  %v3011_v6 = vmul.f32 0.044715, %v2947_v29  ;;  %v6985_v9 = vadd.f32 %v2804_v13, %v6571_v56  ;;  %v2806_v26 = vpop.f32.mrb[117].mxu0  ;;  %v3428_v59 = vpack.c.bf16 %v3384_v5, %v3382_v60 }
 0x4f0   :  { %v3074_v35 = vadd.f32 %v3010_v40, %v6951_v54  ;;  %v3012_v42 = vmul.f32 0.044715, %v2948_v63  ;;  %v6989_v38 = vadd.f32 %v2806_v26, %v6575_v7  ;;  %v2808_v22 = vpop.f32.mrb[118].mxu0  ;;  %v3317_v58 = vmul.f32 0.5, %v3253_v36 }
 0x4f1   :  { %v3137_v47 = vmul.f32 0.7978846, %v3073_v43  ;;  %v3075_v20 = vadd.f32 %v3011_v6, %v6958_v1  ;;  %v2885_v32 = vmul.f32 %v6985_v9, %v6985_v9  ;;  %v6995_v21 = vadd.f32 %v2808_v22, %v6571_v56  ;;  %v2810_v4 = vpop.f32.mrb[119].mxu0  ;;  %3647 = vmatprep.mubr.bf16.mxu1 %v3428_v59 }
 0x4f2   :  { %v3138_v31 = vmul.f32 0.7978846, %v3074_v35  ;;  %v3076_v41 = vadd.f32 %v3012_v42, %v6964_v51  ;;  %v2886_v33 = vmul.f32 %v6989_v38, %v6989_v38  ;;  %v7001_v8 = vadd.f32 %v2810_v4, %v6575_v7 }
 0x4f3   :  { %4558 = vtanh.f32 %v3137_v47  ;;  %v3139_v36 = vmul.f32 0.7978846, %v3075_v20  ;;  %v2949_v23 = vmul.f32 %v2885_v32, %v6985_v9  ;;  %v2887_v61 = vmul.f32 %v6995_v21, %v6995_v21 }
 0x4f4   :  { %4560 = vtanh.f32 %v3138_v31  ;;  %v3140_v44 = vmul.f32 0.7978846, %v3076_v41  ;;  %v2950_v60 = vmul.f32 %v2886_v33, %v6989_v38  ;;  %v2888_v49 = vmul.f32 %v7001_v8, %v7001_v8 }
 0x4f5   :  { %v7009_v25 = vpop.eup %4550  ;;  %4562 = vtanh.f32 %v3139_v36  ;;  %v3013_v39 = vmul.f32 0.044715, %v2949_v23  ;;  %v2951_v57 = vmul.f32 %v2887_v61, %v6995_v21  ;;  %v3319_v10 = vmul.f32 0.5, %v3255_v15 }
 0x4f6   :  { %v7012_v16 = vpop.eup %4552  ;;  %4564 = vtanh.f32 %v3140_v44  ;;  %v3014_v2 = vmul.f32 0.044715, %v2950_v60  ;;  %v2952_v34 = vmul.f32 %v2888_v49, %v7001_v8  ;;  %v3381_v18 = vmul.f32 %v3317_v58, %v6857_v28  ;;  %v2814_v19 = vpop.f32.mrb[120].mxu0 }
 0x4f7   :  { %v7016_v53 = vpop.eup %4554  ;;  %v3077_v46 = vadd.f32 %v3013_v39, %v6985_v9  ;;  %v3015_v52 = vmul.f32 0.044715, %v2951_v57  ;;  %v3383_v11 = vmul.f32 %v3319_v10, %v6866_v0  ;;  %v7021_v29 = vadd.f32 %v2814_v19, %v6571_v56  ;;  %v2816_v5 = vpop.f32.mrb[121].mxu0 }
 0x4f8   :  { %v7023_v40 = vpop.eup %4556  ;;  %v3078_v63 = vadd.f32 %v3014_v2, %v6989_v38  ;;  %v3016_v13 = vmul.f32 0.044715, %v2952_v34  ;;  %v7027_v15 = vadd.f32 %v2816_v5, %v6575_v7  ;;  %v2818_v28 = vpop.f32.mrb[122].mxu0  ;;  %v3258_v43 = vadd.f32 1.0, %v6971_v48 }
 0x4f9   :  { %v3141_v6 = vmul.f32 0.7978846, %v3077_v46  ;;  %v3079_v26 = vadd.f32 %v3015_v52, %v6995_v21  ;;  %v3427_v59 = vpack.c.bf16 %v3383_v11, %v3381_v18  ;;  %v2889_v0 = vmul.f32 %v7021_v29, %v7021_v29  ;;  %v2820_v35 = vpop.f32.mrb[123].mxu0 }
 0x4fa   :  { %v3142_v42 = vmul.f32 0.7978846, %v3078_v63  ;;  %v3080_v22 = vadd.f32 %v3016_v13, %v7001_v8  ;;  %v2890_v58 = vmul.f32 %v7027_v15, %v7027_v15  ;;  %v7037_v47 = vadd.f32 %v2818_v28, %v6571_v56 }
 0x4fb   :  { %4566 = vtanh.f32 %v3141_v6  ;;  %v3143_v20 = vmul.f32 0.7978846, %v3079_v26  ;;  %3648 = vmatmul.mubr.bf16.gmra.mrb[100].mxu1 %v3427_v59  ;;  %v2953_v48 = vmul.f32 %v2889_v0, %v7021_v29  ;;  %v7041_v32 = vadd.f32 %v2820_v35, %v6575_v7 }
 0x4fc   :  { %4568 = vtanh.f32 %v3142_v42  ;;  %v3144_v4 = vmul.f32 0.7978846, %v3080_v22  ;;  %v2954_v31 = vmul.f32 %v2890_v58, %v7027_v15  ;;  %v2891_v41 = vmul.f32 %v7037_v47, %v7037_v47 }
 0x4fd   :  { %v7046_v33 = vpop.eup %4558  ;;  %4570 = vtanh.f32 %v3143_v20  ;;  %v3017_v36 = vmul.f32 0.044715, %v2953_v48  ;;  %v2892_v23 = vmul.f32 %v7041_v32, %v7041_v32  ;;  %v3260_v61 = vadd.f32 1.0, %v6980_v45 }
 0x4fe   :  { %v7051_v44 = vpop.eup %4560  ;;  %4572 = vtanh.f32 %v3144_v4  ;;  %v3018_v60 = vmul.f32 0.044715, %v2954_v31  ;;  %v2955_v49 = vmul.f32 %v2891_v41, %v7037_v47  ;;  %v3322_v39 = vmul.f32 0.5, %v3258_v43  ;;  %v2824_v57 = vpop.f32.mrb[124].mxu0 }
 0x4ff   :  { %v7054_v10 = vpop.eup %4562  ;;  %v3081_v2 = vadd.f32 %v3017_v36, %v7021_v29  ;;  %v2956_v34 = vmul.f32 %v2892_v23, %v7041_v32  ;;  %v3324_v18 = vmul.f32 0.5, %v3260_v61  ;;  %v3257_v19 = vadd.f32 1.0, %v6966_v62  ;;  %v2826_v46 = vpop.f32.mrb[125].mxu0 }
 0x500   :  { %v7059_v52 = vpop.eup %4564  ;;  %v3082_v45 = vadd.f32 %v3018_v60, %v7027_v15  ;;  %v3019_v11 = vmul.f32 0.044715, %v2955_v49  ;;  %v3386_v5 = vmul.f32 %v3322_v39, %v6893_v17  ;;  %v3259_v63 = vadd.f32 1.0, %v6976_v50  ;;  %v2828_v13 = vpop.f32.mrb[126].mxu0 }
 0x501   :  { %v3145_v28 = vmul.f32 0.7978846, %v3081_v2  ;;  %v3020_v43 = vmul.f32 0.044715, %v2956_v34  ;;  %v3388_v6 = vmul.f32 %v3324_v18, %v6903_v30  ;;  %v3321_v26 = vmul.f32 0.5, %v3257_v19  ;;  %v2830_v59 = vpop.f32.mrb[127].mxu0 }
 0x502   :  { %v3146_v0 = vmul.f32 0.7978846, %v3082_v45  ;;  %v3083_v62 = vadd.f32 %v3019_v11, %v7037_v47  ;;  %v3323_v35 = vmul.f32 0.5, %v3259_v63  ;;  %v7067_v42 = vadd.f32 %v2824_v57, %v6571_v56 }
 0x503   :  { %4574 = vtanh.f32 %v3145_v28  ;;  %v3084_v22 = vadd.f32 %v3020_v43, %v7041_v32  ;;  %v3430_v17 = vpack.c.bf16 %v3388_v6, %v3386_v5  ;;  %v3385_v50 = vmul.f32 %v3321_v26, %v6889_v14 }
 0x504   :  { %4576 = vtanh.f32 %v3146_v0  ;;  %v3387_v58 = vmul.f32 %v3323_v35, %v6898_v37  ;;  %v2893_v30 = vmul.f32 %v7067_v42, %v7067_v42  ;;  %v7077_v4 = vadd.f32 %v2826_v46, %v6575_v7 }
 0x505   :  { %v7074_v20 = vpop.eup %4566  ;;  %v3148_v48 = vmul.f32 0.7978846, %v3084_v22  ;;  %3655 = vmatprep.mubr.bf16.mxu1 %v3430_v17  ;;  %v7080_v31 = vadd.f32 %v2828_v13, %v6571_v56  ;;  %v7083_v41 = vadd.f32 %v2830_v59, %v6575_v7  ;;  %v3147_v14 = vmul.f32 0.7978846, %v3083_v62 }
 0x506   :  { %v4569_v36 = vpop.eup %4568  ;;  %v3429_v23 = vpack.c.bf16 %v3387_v58, %v3385_v50  ;;  %v2957_v37 = vmul.f32 %v2893_v30, %v7067_v42  ;;  %v3262_v61 = vadd.f32 1.0, %v7012_v16  ;;  %v2894_v49 = vmul.f32 %v7077_v4, %v7077_v4 }
 0x507   :  { %v4571_v60 = vpop.eup %4570  ;;  %4578 = vtanh.f32 %v3148_v48  ;;  %v2895_v39 = vmul.f32 %v7080_v31, %v7080_v31  ;;  %v2896_v56 = vmul.f32 %v7083_v41, %v7083_v41  ;;  %v3264_v2 = vadd.f32 1.0, %v7023_v40 }
 0x508   :  { %v4573_v7 = vpop.eup %4572  ;;  %3656 = vmatmul.mubr.bf16.gmra.mrb[104].mxu1 %v3429_v23  ;;  %v3021_v57 = vmul.f32 0.044715, %v2957_v37  ;;  %v3326_v34 = vmul.f32 0.5, %v3262_v61  ;;  %v3261_v18 = vadd.f32 1.0, %v7009_v25  ;;  %v2958_v16 = vmul.f32 %v2894_v49, %v7077_v4 }
 0x509   :  { %v2959_v19 = vmul.f32 %v2895_v39, %v7080_v31  ;;  %v2960_v46 = vmul.f32 %v2896_v56, %v7083_v41  ;;  %v3263_v45 = vadd.f32 1.0, %v7016_v53  ;;  %4580 = vtanh.f32 %v3147_v14 }
 0x50a   :  { %v3085_v11 = vadd.f32 %v3021_v57, %v7067_v42  ;;  %v3328_v5 = vmul.f32 0.5, %v3264_v2  ;;  %v3325_v63 = vmul.f32 0.5, %v3261_v18  ;;  %v3022_v13 = vmul.f32 0.044715, %v2958_v16 }
 0x50b   :  { %v3023_v28 = vmul.f32 0.044715, %v2959_v19  ;;  %v3024_v43 = vmul.f32 0.044715, %v2960_v46  ;;  %v3390_v40 = vmul.f32 %v3326_v34, %v6924_v24  ;;  %v3327_v26 = vmul.f32 0.5, %v3263_v45 }
 0x50c   :  { %v3149_v6 = vmul.f32 0.7978846, %v3085_v11  ;;  %v3392_v25 = vmul.f32 %v3328_v5, %v6934_v27  ;;  %v3389_v59 = vmul.f32 %v3325_v63, %v6919_v3  ;;  %v3086_v62 = vadd.f32 %v3022_v13, %v7077_v4 }
 0x50d   :  { %v4575_v0 = vpop.eup %4574  ;;  %v3087_v53 = vadd.f32 %v3023_v28, %v7080_v31  ;;  %v3088_v35 = vadd.f32 %v3024_v43, %v7083_v41  ;;  %v3266_v22 = vadd.f32 1.0, %v7051_v44  ;;  %v3391_v24 = vmul.f32 %v3327_v26, %v6929_v12 }
 0x50e   :  { %v4577_v17 = vpop.eup %4576  ;;  %4582 = vtanh.f32 %v3149_v6  ;;  %v3432_v50 = vpack.c.bf16 %v3392_v25, %v3390_v40  ;;  %v3268_v58 = vadd.f32 1.0, %v7059_v52  ;;  %v3150_v27 = vmul.f32 0.7978846, %v3086_v62 }
 0x50f   :  { %v3151_v30 = vmul.f32 0.7978846, %v3087_v53  ;;  %v3152_v48 = vmul.f32 0.7978846, %v3088_v35  ;;  %v3431_v3 = vpack.c.bf16 %v3391_v24, %v3389_v59  ;;  %v3330_v14 = vmul.f32 0.5, %v3266_v22 }
 0x510   :  { %3663 = vmatprep.mubr.bf16.mxu1 %v3432_v50  ;;  %v3332_v23 = vmul.f32 0.5, %v3268_v58  ;;  %v3265_v37 = vadd.f32 1.0, %v7046_v33  ;;  %4584 = vtanh.f32 %v3150_v27  ;;  %v3267_v44 = vadd.f32 1.0, %v7054_v10 }
 0x511   :  { %v4579_v61 = vpop.eup %4578  ;;  %v3270_v49 = vadd.f32 1.0, %v4569_v36  ;;  %v3272_v39 = vadd.f32 1.0, %v4573_v7  ;;  %4586 = vtanh.f32 %v3151_v30  ;;  %3664 = vmatmul.mubr.bf16.gmra.mrb[108].mxu1 %v3431_v3  ;;  %v3394_v12 = vmul.f32 %v3330_v14, %v6951_v54 }
 0x512   :  { %v3396_v52 = vmul.f32 %v3332_v23, %v6964_v51  ;;  %v3329_v56 = vmul.f32 0.5, %v3265_v37  ;;  %4588 = vtanh.f32 %v3152_v48  ;;  %v3331_v57 = vmul.f32 0.5, %v3267_v44  ;;  %v7131_v23 = vld [vmem:[%s7192_s12] ss:$0 sm:$0xff]  ;;  %s4780_s12 = smov [#allocation11]  }
 0x513   :  { %v3334_v2 = vmul.f32 0.5, %v3270_v49  ;;  %v3336_v34 = vmul.f32 0.5, %v3272_v39  ;;  %v4581_v18 = vpop.eup %4580  ;;  %v3269_v19 = vadd.f32 1.0, %v7074_v20  ;;  %v3271_v10 = vadd.f32 1.0, %v4571_v60  ;;  %s3805_s30 = sshll.u32 %s4780_s12, 4  ;;  %s3806_s30 = int_to_ptr.vmem [resolvable:$true] %s3805_s30 }
 0x514   :  { %v3434_v16 = vpack.c.bf16 %v3396_v52, %v3394_v12  ;;  %v3393_v33 = vmul.f32 %v3329_v56, %v6947_v55  ;;  %v3395_v36 = vmul.f32 %v3331_v57, %v6958_v1  ;;  %v3274_v46 = vadd.f32 1.0, %v4577_v17  ;;  %v4597_v12 = vld [vmem:[#allocation2 + $0x18] sm:$0xff]  ;;  %s4738_s19 = scalar_lea.vmem %s3806_s30, 8192  ;;  %p4743_p13 = scmp.lt.s32.totalorder %s3806_s30, %s3806_s30 }
 0x515   :  { %v3398_v7 = vmul.f32 %v3334_v2, %v6989_v38  ;;  %v3400_v54 = vmul.f32 %v3336_v34, %v7001_v8  ;;  %v3333_v51 = vmul.f32 0.5, %v3269_v19  ;;  %v3335_v45 = vmul.f32 0.5, %v3271_v10  ;;  %v4598_v19 = vld [vmem:[#allocation2 + $0x28] sm:$0xff]  ;;  %p4739_p12 = scmp.ne.s32.totalorder %s3806_s30, %s4738_s19  ;;  %p4744_p0 = scmp.lt.s32.totalorder %s4738_s19, %s4738_s19 }
 0x516   :  { %3671 = vmatprep.mubr.bf16.mxu1 %v3434_v16  ;;  %v3276_v11 = vadd.f32 1.0, %v4579_v61  ;;  %v3273_v5 = vadd.f32 1.0, %v4575_v0  ;;  %v3433_v63 = vpack.c.bf16 %v3395_v36, %v3393_v33  ;;  %v3338_v28 = vmul.f32 0.5, %v3274_v46 }
 0x517   :  { %v3436_v13 = vpack.c.bf16 %v3400_v54, %v3398_v7  ;;  %v3275_v43 = vadd.f32 1.0, %v4581_v18  ;;  %v3397_v20 = vmul.f32 %v3333_v51, %v6985_v9  ;;  %v3399_v60 = vmul.f32 %v3335_v45, %v6995_v21  ;;  %v4599_v7 = vld [vmem:[#allocation2 + $0x38] sm:$0xff]  ;;  %p4745_p1 = por %p4744_p0, %p4743_p13 }
 0x518   :  { %v4583_v55 = vpop.eup %4582  ;;  %v3340_v1 = vmul.f32 0.5, %v3276_v11  ;;  %v3337_v40 = vmul.f32 0.5, %v3273_v5  ;;  %v3402_v25 = vmul.f32 %v3338_v28, %v7027_v15  ;;  %v4600_v28 = vld [vmem:[#allocation2 + $0x48] sm:$0xff] }
 0x519   :  { %v3339_v38 = vmul.f32 0.5, %v3275_v43  ;;  %v3277_v6 = vadd.f32 1.0, %v4583_v55  ;;  %3672 = vmatmul.mubr.bf16.gmra.mrb[112].mxu1 %v3433_v63  ;;  %v3435_v8 = vpack.c.bf16 %v3399_v60, %v3397_v20  ;;  %v4601_v20 = vld [vmem:[#allocation2 + $0x58] sm:$0xff]  ;;  %p4746_p2 = pnand %p4745_p1, %p4739_p12 }
 0x51a   :  { %v3404_v26 = vmul.f32 %v3340_v1, %v7041_v32  ;;  %v4585_v59 = vpop.eup %4584  ;;  %3679 = vmatprep.mubr.bf16.mxu1 %v3436_v13  ;;  %v3401_v0 = vmul.f32 %v3337_v40, %v7021_v29 }
 0x51b   :  { %v3403_v62 = vmul.f32 %v3339_v38, %v7037_v47  ;;  %v4587_v53 = vpop.eup %4586  ;;  %v3278_v35 = vadd.f32 1.0, %v4585_v59  ;;  %v3341_v50 = vmul.f32 0.5, %v3277_v6  ;;  %v4602_v59 = vld [vmem:[#allocation2 + $0x68] sm:$0xff] }
 0x51c   :  { %v3438_v9 = vpack.c.bf16 %v3404_v26, %v3402_v25  ;;  %v4589_v21 = vpop.eup %4588  ;;  %v3279_v17 = vadd.f32 1.0, %v4587_v53  ;;  %v4603_v53 = vld [vmem:[#allocation2 + $0x78] sm:$0xff] }
 0x51d   :  { %v3437_v22 = vpack.c.bf16 %v3403_v62, %v3401_v0  ;;  %v3280_v24 = vadd.f32 1.0, %v4589_v21  ;;  %v3342_v58 = vmul.f32 0.5, %v3278_v35  ;;  %v3405_v15 = vmul.f32 %v3341_v50, %v7067_v42 }
 0x51e   :  { %v3343_v27 = vmul.f32 0.5, %v3279_v17 }
 0x51f   :  { %v3344_v30 = vmul.f32 0.5, %v3280_v24  ;;  %v3406_v29 = vmul.f32 %v3342_v58, %v7077_v4 }
 0x520   :  { %v3407_v32 = vmul.f32 %v3343_v27, %v7080_v31  ;;  %v4604_v27 = vld [vmem:[#allocation2 + $0x88] sm:$0xff] }
 0x521   :  { %3680 = vmatmul.mubr.bf16.gmra.mrb[116].mxu1 %v3435_v8  ;;  %v3408_v47 = vmul.f32 %v3344_v30, %v7083_v41  ;;  %v4596_v41 = vld [vmem:[#allocation2 + $0x8] sm:$0xff] }
 0x522   :  { %3687 = vmatprep.mubr.bf16.mxu1 %v3438_v9  ;;  %v3439_v48 = vpack.c.bf16 %v3407_v32, %v3405_v15  ;;  %v4605_v32 = vld [vmem:[#allocation2 + $0x98] sm:$0xff] }
 0x523   :  { %v3440_v3 = vpack.c.bf16 %v3408_v47, %v3406_v29 }
 0x529   :  { %3688 = vmatmul.mubr.bf16.gmra.mrb[120].mxu1 %v3437_v22 }
 0x52a   :  { %3695 = vmatprep.mubr.bf16.mxu1 %v3440_v3 }
 0x531   :  { %3696 = vmatmul.mubr.bf16.gmra.mrb[124].mxu1 %v3439_v48 }
 0x564   :  { %v4017_v14 = vpop.f32.mrb[64].mxu1 }
 0x565   :  { %v4018_v42 = vpop.f32.mrb[65].mxu1 }
 0x566   :  { %v4019_v37 = vadd.f32 %v4018_v42, %v4017_v14  ;;  %v4020_v31 = vpop.f32.mrb[66].mxu1 }
 0x567   :  { %v4021_v61 = vpop.f32.mrb[67].mxu1 }
 0x568   :  { %v3578_v4 = vadd.f32 %v4019_v37, %v7131_v23  ;;  %v4022_v44 = vadd.f32 %v4021_v61, %v4020_v31  ;;  %v4606_v61 = vld [vmem:[#allocation2 + $0xa8] sm:$0xff] }
 0x56a   :  { %v3704_v49 = vadd.f32 %v4596_v41, %v3578_v4  ;;  %v3581_v39 = vadd.f32 %v4022_v44, %v7131_v23  ;;  %v4607_v41 = vld [vmem:[#allocation2 + $0xb8] sm:$0xff] }
 0x56c   :  { %3768 = vst [vmem:[#allocation11 + $0x8] sm:$0xff] %v3704_v49  ;;  %v3705_v52 = vadd.f32 %v4597_v12, %v3581_v39 }
 0x56e   :  { %3769 = vst [vmem:[#allocation11 + $0x18] sm:$0xff] %v3705_v52 }
 0x570   :  { %v4023_v56 = vpop.f32.mrb[68].mxu1 }
 0x571   :  { %v4024_v57 = vpop.f32.mrb[69].mxu1 }
 0x572   :  { %v4025_v2 = vadd.f32 %v4024_v57, %v4023_v56  ;;  %v4026_v34 = vpop.f32.mrb[70].mxu1 }
 0x573   :  { %v4027_v18 = vpop.f32.mrb[71].mxu1 }
 0x574   :  { %v3586_v16 = vadd.f32 %v4025_v2, %v7131_v23  ;;  %v4028_v33 = vadd.f32 %v4027_v18, %v4026_v34  ;;  %v4608_v18 = vld [vmem:[#allocation2 + $0xc8] sm:$0xff] }
 0x576   :  { %v3706_v10 = vadd.f32 %v4598_v19, %v3586_v16  ;;  %v3589_v36 = vadd.f32 %v4028_v33, %v7131_v23  ;;  %v4609_v19 = vld [vmem:[#allocation2 + $0xd8] sm:$0xff] }
 0x578   :  { %3770 = vst [vmem:[#allocation11 + $0x28] sm:$0xff] %v3706_v10  ;;  %v3707_v54 = vadd.f32 %v4599_v7, %v3589_v36 }
 0x57a   :  { %3771 = vst [vmem:[#allocation11 + $0x38] sm:$0xff] %v3707_v54  ;;  %v4029_v46 = vpop.f32.mrb[72].mxu1 }
 0x57b   :  { %v4030_v51 = vpop.f32.mrb[73].mxu1 }
 0x57c   :  { %v4031_v45 = vadd.f32 %v4030_v51, %v4029_v46  ;;  %v4032_v11 = vpop.f32.mrb[74].mxu1 }
 0x57d   :  { %v4033_v5 = vpop.f32.mrb[75].mxu1 }
 0x57e   :  { %v3594_v63 = vadd.f32 %v4031_v45, %v7131_v23  ;;  %v4034_v13 = vadd.f32 %v4033_v5, %v4032_v11  ;;  %v4610_v5 = vld [vmem:[#allocation2 + $0xe8] sm:$0xff] }
 0x580   :  { %v3708_v43 = vadd.f32 %v4600_v28, %v3594_v63  ;;  %v3597_v55 = vadd.f32 %v4034_v13, %v7131_v23  ;;  %v4611_v28 = vld [vmem:[#allocation2 + $0xf8] sm:$0xff] }
 0x582   :  { %3772 = vst [vmem:[#allocation11 + $0x48] sm:$0xff] %v3708_v43  ;;  %v3709_v60 = vadd.f32 %v4601_v20, %v3597_v55 }
 0x584   :  { %3773 = vst [vmem:[#allocation11 + $0x58] sm:$0xff] %v3709_v60 }
 0x585   :  { %v4035_v1 = vpop.f32.mrb[76].mxu1 }
 0x586   :  { %v4036_v40 = vpop.f32.mrb[77].mxu1 }
 0x587   :  { %v4037_v38 = vadd.f32 %v4036_v40, %v4035_v1  ;;  %v4038_v6 = vpop.f32.mrb[78].mxu1 }
 0x588   :  { %v4039_v8 = vpop.f32.mrb[79].mxu1 }
 0x589   :  { %v3602_v25 = vadd.f32 %v4037_v38, %v7131_v23  ;;  %v4040_v26 = vadd.f32 %v4039_v8, %v4038_v6  ;;  %v4612_v8 = vld [vmem:[#allocation2 + $0x108] sm:$0xff] }
 0x58b   :  { %v3710_v0 = vadd.f32 %v4602_v59, %v3602_v25  ;;  %v3605_v62 = vadd.f32 %v4040_v26, %v7131_v23  ;;  %v4613_v59 = vld [vmem:[#allocation2 + $0x118] sm:$0xff] }
 0x58d   :  { %3774 = vst [vmem:[#allocation11 + $0x68] sm:$0xff] %v3710_v0  ;;  %v3711_v9 = vadd.f32 %v4603_v53, %v3605_v62 }
 0x58f   :  { %3775 = vst [vmem:[#allocation11 + $0x78] sm:$0xff] %v3711_v9  ;;  %v4041_v35 = vpop.f32.mrb[80].mxu1 }
 0x590   :  { %v4042_v21 = vpop.f32.mrb[81].mxu1 }
 0x591   :  { %v4043_v22 = vadd.f32 %v4042_v21, %v4041_v35  ;;  %v4044_v17 = vpop.f32.mrb[82].mxu1 }
 0x592   :  { %v4045_v50 = vpop.f32.mrb[83].mxu1 }
 0x593   :  { %v3610_v24 = vadd.f32 %v4043_v22, %v7131_v23  ;;  %v4046_v58 = vadd.f32 %v4045_v50, %v4044_v17  ;;  %v4614_v50 = vld [vmem:[#allocation2 + $0x128] sm:$0xff] }
 0x595   :  { %v3712_v30 = vadd.f32 %v4604_v27, %v3610_v24  ;;  %v3613_v15 = vadd.f32 %v4046_v58, %v7131_v23  ;;  %v4615_v27 = vld [vmem:[#allocation2 + $0x138] sm:$0xff] }
 0x597   :  { %3776 = vst [vmem:[#allocation11 + $0x88] sm:$0xff] %v3712_v30  ;;  %v3713_v29 = vadd.f32 %v4605_v32, %v3613_v15 }
 0x599   :  { %3777 = vst [vmem:[#allocation11 + $0x98] sm:$0xff] %v3713_v29 }
 0x59a   :  { %v4047_v47 = vpop.f32.mrb[84].mxu1 }
 0x59b   :  { %v4048_v48 = vpop.f32.mrb[85].mxu1 }
 0x59c   :  { %v4049_v3 = vadd.f32 %v4048_v48, %v4047_v47  ;;  %v4050_v14 = vpop.f32.mrb[86].mxu1 }
 0x59d   :  { %v4051_v42 = vpop.f32.mrb[87].mxu1 }
 0x59e   :  { %v3618_v37 = vadd.f32 %v4049_v3, %v7131_v23  ;;  %v4052_v31 = vadd.f32 %v4051_v42, %v4050_v14  ;;  %v4616_v42 = vld [vmem:[#allocation2 + $0x148] sm:$0xff] }
 0x5a0   :  { %v3714_v4 = vadd.f32 %v4606_v61, %v3618_v37  ;;  %v3621_v44 = vadd.f32 %v4052_v31, %v7131_v23  ;;  %v4617_v61 = vld [vmem:[#allocation2 + $0x158] sm:$0xff] }
 0x5a2   :  { %3778 = vst [vmem:[#allocation11 + $0xa8] sm:$0xff] %v3714_v4  ;;  %v3715_v49 = vadd.f32 %v4607_v41, %v3621_v44 }
 0x5a3   :  { %v4053_v39 = vpop.f32.mrb[88].mxu1 }
 0x5a4   :  { %v4054_v12 = vpop.f32.mrb[89].mxu1  ;;  %3779 = vst [vmem:[#allocation11 + $0xb8] sm:$0xff] %v3715_v49 }
 0x5a5   :  { %v4055_v52 = vadd.f32 %v4054_v12, %v4053_v39  ;;  %v4056_v56 = vpop.f32.mrb[90].mxu1 }
 0x5a6   :  { %v4057_v57 = vpop.f32.mrb[91].mxu1 }
 0x5a7   :  { %v3626_v2 = vadd.f32 %v4055_v52, %v7131_v23  ;;  %v4058_v34 = vadd.f32 %v4057_v57, %v4056_v56  ;;  %v4618_v57 = vld [vmem:[#allocation2 + $0x168] sm:$0xff] }
 0x5a9   :  { %v3716_v16 = vadd.f32 %v4608_v18, %v3626_v2  ;;  %v3629_v33 = vadd.f32 %v4058_v34, %v7131_v23  ;;  %v4619_v18 = vld [vmem:[#allocation2 + $0x178] sm:$0xff] }
 0x5ab   :  { %3780 = vst [vmem:[#allocation11 + $0xc8] sm:$0xff] %v3716_v16  ;;  %v3717_v10 = vadd.f32 %v4609_v19, %v3629_v33  ;;  %v4059_v36 = vpop.f32.mrb[92].mxu1 }
 0x5ac   :  { %v4060_v7 = vpop.f32.mrb[93].mxu1 }
 0x5ad   :  { %3781 = vst [vmem:[#allocation11 + $0xd8] sm:$0xff] %v3717_v10  ;;  %v4061_v54 = vadd.f32 %v4060_v7, %v4059_v36  ;;  %v4062_v46 = vpop.f32.mrb[94].mxu1 }
 0x5ae   :  { %v4063_v51 = vpop.f32.mrb[95].mxu1 }
 0x5af   :  { %v3634_v45 = vadd.f32 %v4061_v54, %v7131_v23  ;;  %v4064_v11 = vadd.f32 %v4063_v51, %v4062_v46  ;;  %v4620_v51 = vld [vmem:[#allocation2 + $0x188] sm:$0xff] }
 0x5b1   :  { %v3718_v63 = vadd.f32 %v4610_v5, %v3634_v45  ;;  %v3637_v13 = vadd.f32 %v4064_v11, %v7131_v23  ;;  %v4621_v5 = vld [vmem:[#allocation2 + $0x198] sm:$0xff] }
 0x5b3   :  { %3782 = vst [vmem:[#allocation11 + $0xe8] sm:$0xff] %v3718_v63  ;;  %v3719_v43 = vadd.f32 %v4611_v28, %v3637_v13 }
 0x5b5   :  { %3783 = vst [vmem:[#allocation11 + $0xf8] sm:$0xff] %v3719_v43 }
 0x5ba   :  { %v4065_v55 = vpop.f32.mrb[96].mxu1 }
 0x5bb   :  { %v4066_v20 = vpop.f32.mrb[97].mxu1 }
 0x5bc   :  { %v4067_v60 = vadd.f32 %v4066_v20, %v4065_v55  ;;  %v4068_v1 = vpop.f32.mrb[98].mxu1 }
 0x5bd   :  { %v4069_v40 = vpop.f32.mrb[99].mxu1 }
 0x5be   :  { %v3642_v38 = vadd.f32 %v4067_v60, %v7131_v23  ;;  %v4070_v6 = vadd.f32 %v4069_v40, %v4068_v1  ;;  %v4622_v40 = vld [vmem:[#allocation2 + $0x1a8] sm:$0xff] }
 0x5c0   :  { %v3720_v25 = vadd.f32 %v4612_v8, %v3642_v38  ;;  %v3645_v26 = vadd.f32 %v4070_v6, %v7131_v23  ;;  %v4623_v8 = vld [vmem:[#allocation2 + $0x1b8] sm:$0xff] }
 0x5c2   :  { %3784 = vst [vmem:[#allocation11 + $0x108] sm:$0xff] %v3720_v25  ;;  %v3721_v0 = vadd.f32 %v4613_v59, %v3645_v26 }
 0x5c4   :  { %3785 = vst [vmem:[#allocation11 + $0x118] sm:$0xff] %v3721_v0 }
 0x5ce   :  { %v4071_v62 = vpop.f32.mrb[100].mxu1 }
 0x5cf   :  { %v4072_v53 = vpop.f32.mrb[101].mxu1 }
 0x5d0   :  { %v4073_v9 = vadd.f32 %v4072_v53, %v4071_v62  ;;  %v4074_v35 = vpop.f32.mrb[102].mxu1 }
 0x5d1   :  { %v4075_v21 = vpop.f32.mrb[103].mxu1 }
 0x5d2   :  { %v3650_v22 = vadd.f32 %v4073_v9, %v7131_v23  ;;  %v4076_v17 = vadd.f32 %v4075_v21, %v4074_v35  ;;  %v4624_v21 = vld [vmem:[#allocation2 + $0x1c8] sm:$0xff] }
 0x5d4   :  { %v3722_v24 = vadd.f32 %v4614_v50, %v3650_v22  ;;  %v3653_v58 = vadd.f32 %v4076_v17, %v7131_v23  ;;  %v4625_v50 = vld [vmem:[#allocation2 + $0x1d8] sm:$0xff] }
 0x5d6   :  { %3786 = vst [vmem:[#allocation11 + $0x128] sm:$0xff] %v3722_v24  ;;  %v3723_v30 = vadd.f32 %v4615_v27, %v3653_v58 }
 0x5d8   :  { %3787 = vst [vmem:[#allocation11 + $0x138] sm:$0xff] %v3723_v30 }
 0x5db   :  { %v4077_v15 = vpop.f32.mrb[104].mxu1 }
 0x5dc   :  { %v4078_v32 = vpop.f32.mrb[105].mxu1 }
 0x5dd   :  { %v4079_v29 = vadd.f32 %v4078_v32, %v4077_v15  ;;  %v4080_v47 = vpop.f32.mrb[106].mxu1 }
 0x5de   :  { %v4081_v48 = vpop.f32.mrb[107].mxu1 }
 0x5df   :  { %v3658_v3 = vadd.f32 %v4079_v29, %v7131_v23  ;;  %v4082_v14 = vadd.f32 %v4081_v48, %v4080_v47  ;;  %v4626_v48 = vld [vmem:[#allocation2 + $0x1e8] sm:$0xff] }
 0x5e1   :  { %v3724_v37 = vadd.f32 %v4616_v42, %v3658_v3  ;;  %v3661_v31 = vadd.f32 %v4082_v14, %v7131_v23  ;;  %v4627_v42 = vld [vmem:[#allocation2 + $0x1f8] sm:$0xff] }
 0x5e3   :  { %3788 = vst [vmem:[#allocation11 + $0x148] sm:$0xff] %v3724_v37  ;;  %v3725_v4 = vadd.f32 %v4617_v61, %v3661_v31 }
 0x5e4   :  { %v4083_v44 = vpop.f32.mrb[108].mxu1 }
 0x5e5   :  { %3789 = vst [vmem:[#allocation11 + $0x158] sm:$0xff] %v3725_v4  ;;  %v4084_v41 = vpop.f32.mrb[109].mxu1 }
 0x5e6   :  { %v4085_v49 = vadd.f32 %v4084_v41, %v4083_v44  ;;  %v4086_v39 = vpop.f32.mrb[110].mxu1 }
 0x5e7   :  { %v4087_v12 = vpop.f32.mrb[111].mxu1 }
 0x5e8   :  { %v3666_v52 = vadd.f32 %v4085_v49, %v7131_v23  ;;  %v4088_v56 = vadd.f32 %v4087_v12, %v4086_v39 }
 0x5ea   :  { %v3726_v2 = vadd.f32 %v4618_v57, %v3666_v52  ;;  %v3669_v34 = vadd.f32 %v4088_v56, %v7131_v23 }
 0x5ec   :  { %3790 = vst [vmem:[#allocation11 + $0x168] sm:$0xff] %v3726_v2  ;;  %v3727_v16 = vadd.f32 %v4619_v18, %v3669_v34  ;;  %v4089_v33 = vpop.f32.mrb[112].mxu1 }
 0x5ed   :  { %v4090_v19 = vpop.f32.mrb[113].mxu1 }
 0x5ee   :  { %3791 = vst [vmem:[#allocation11 + $0x178] sm:$0xff] %v3727_v16  ;;  %v4091_v10 = vadd.f32 %v4090_v19, %v4089_v33  ;;  %v4092_v36 = vpop.f32.mrb[114].mxu1 }
 0x5ef   :  { %v4093_v7 = vpop.f32.mrb[115].mxu1 }
 0x5f0   :  { %v3674_v54 = vadd.f32 %v4091_v10, %v7131_v23  ;;  %v4094_v46 = vadd.f32 %v4093_v7, %v4092_v36 }
 0x5f2   :  { %v3728_v45 = vadd.f32 %v4620_v51, %v3674_v54  ;;  %v3677_v11 = vadd.f32 %v4094_v46, %v7131_v23 }
 0x5f4   :  { %3792 = vst [vmem:[#allocation11 + $0x188] sm:$0xff] %v3728_v45  ;;  %v3729_v63 = vadd.f32 %v4621_v5, %v3677_v11  ;;  %v4095_v13 = vpop.f32.mrb[116].mxu1 }
 0x5f5   :  { %v4096_v28 = vpop.f32.mrb[117].mxu1 }
 0x5f6   :  { %3793 = vst [vmem:[#allocation11 + $0x198] sm:$0xff] %v3729_v63  ;;  %v4097_v43 = vadd.f32 %v4096_v28, %v4095_v13  ;;  %v4098_v55 = vpop.f32.mrb[118].mxu1 }
 0x5f7   :  { %v4099_v20 = vpop.f32.mrb[119].mxu1 }
 0x5f8   :  { %v3682_v60 = vadd.f32 %v4097_v43, %v7131_v23  ;;  %v4100_v1 = vadd.f32 %v4099_v20, %v4098_v55 }
 0x5fa   :  { %v3730_v38 = vadd.f32 %v4622_v40, %v3682_v60  ;;  %v3685_v6 = vadd.f32 %v4100_v1, %v7131_v23 }
 0x5fc   :  { %3794 = vst [vmem:[#allocation11 + $0x1a8] sm:$0xff] %v3730_v38  ;;  %v3731_v25 = vadd.f32 %v4623_v8, %v3685_v6  ;;  %v4101_v26 = vpop.f32.mrb[120].mxu1 }
 0x5fd   :  { %v4102_v59 = vpop.f32.mrb[121].mxu1 }
 0x5fe   :  { %3795 = vst [vmem:[#allocation11 + $0x1b8] sm:$0xff] %v3731_v25  ;;  %v4103_v0 = vadd.f32 %v4102_v59, %v4101_v26  ;;  %v4104_v62 = vpop.f32.mrb[122].mxu1 }
 0x5ff   :  { %v4105_v53 = vpop.f32.mrb[123].mxu1 }
 0x600   :  { %v3690_v9 = vadd.f32 %v4103_v0, %v7131_v23  ;;  %v4106_v35 = vadd.f32 %v4105_v53, %v4104_v62 }
 0x602   :  { %v3732_v22 = vadd.f32 %v4624_v21, %v3690_v9  ;;  %v3693_v17 = vadd.f32 %v4106_v35, %v7131_v23 }
 0x604   :  { %3796 = vst [vmem:[#allocation11 + $0x1c8] sm:$0xff] %v3732_v22  ;;  %v3733_v24 = vadd.f32 %v4625_v50, %v3693_v17  ;;  %v4107_v58 = vpop.f32.mrb[124].mxu1 }
 0x605   :  { %v4108_v27 = vpop.f32.mrb[125].mxu1 }
 0x606   :  { %3797 = vst [vmem:[#allocation11 + $0x1d8] sm:$0xff] %v3733_v24  ;;  %v4109_v30 = vadd.f32 %v4108_v27, %v4107_v58  ;;  %v4110_v15 = vpop.f32.mrb[126].mxu1 }
 0x607   :  { %v4111_v32 = vpop.f32.mrb[127].mxu1 }
 0x608   :  { %v3698_v29 = vadd.f32 %v4109_v30, %v7131_v23  ;;  %v4112_v47 = vadd.f32 %v4111_v32, %v4110_v15 }
 0x60a   :  { %v3734_v3 = vadd.f32 %v4626_v48, %v3698_v29  ;;  %v3701_v14 = vadd.f32 %v4112_v47, %v7131_v23 }
 0x60c   :  { %3798 = vst [vmem:[#allocation11 + $0x1e8] sm:$0xff] %v3734_v3  ;;  %v3735_v37 = vadd.f32 %v4627_v42, %v3701_v14 }
 0x60e   :  { %3799 = vst [vmem:[#allocation11 + $0x1f8] sm:$0xff] %v3735_v37 }
 0x60f   :  { %4749 = shalt.err (!%p4746_p2)
}
 0x610   :  { %s4750_s16 = scalar_lea.hbm %s7193_s13, 8192 }
 0x611   :  { %p4751_p3 = scmp.ne.s32.totalorder %s7193_s13, %s4750_s16  ;;  %p4754_p4 = scmp.lt.u32.totalorder %s4750_s16, %s7193_s13 }
 0x613   :  { %p4756_p5 = pnand %p4754_p4, %p4751_p3 }
 0x615   :  { %4759 = shalt.err (!%p4756_p5)
}
 0x616   :  { %3811 = dma.vmem_to_hbm [thread:$0]  %s3806_s30, 8192, %s7193_s13, [#allocation4], %s4773_s9, %s4773_s9, %s4774_s18  }
 0x617   :  { %4766 = dma.done.wait [#allocation4], 8192  }
 0x618   :  { %4767 = vsyncadd [#allocation4], 4294959104 }
 0x619   :  { %3815 = vsyncpa [#allocation3], 1 }
 0x61a   :  { %3816 = vsyncpa [#allocation6], 1 }
 0x61b   :  { %3817 = vsyncpa [#allocation9], 1 }
 0x61c   :  { %3818 = vsyncpa [#allocation4], 1 }

</bundles_post_ra>
